<compile_context>
chip_gen: v7x
topology: tpu7x:2x2x1
jax: 0.10.0
libtpu: 0.0.40
codegen_flags: <defaults>
</compile_context>

<pallas_src>
import jax
import jax.numpy as jnp
from jax import lax
from jax.experimental import pallas as pl
from jax.experimental.pallas import tpu as pltpu


# ----------------------------------------------------------------------------
# Fused whole-InvNet kernel (one image per grid step, all blocks inside)
# ----------------------------------------------------------------------------
def _make_invnet_kernel(nb, H, W, sp1, sp2, clamp):
    L = H * W
    # Tap order matches the host-side weight packing: t = (dy+1)*3 + (dx+1).
    taps = [(dy, dx) for dy in (-1, 0, 1) for dx in (-1, 0, 1)]

    def kernel(mask_ref, x_ref, wF_ref, bF_ref, wGH_ref, bGH_ref, y_ref):
        # Column-validity masks for the horizontal +/-1 taps (lane-dense (1, L)).
        m_neg = mask_ref[0]          # valid where x-1 >= 0
        m_pos = mask_ref[1]          # valid where x+1 <= W-1

        def shift_plane(v, dy, dx):
            # out[:, p] = v[:, p + dy*W + dx] with zeros outside the image.
            # Zero-fill handles the vertical (row) boundary; the two column
            # masks handle the horizontal boundary.  No wraparound ambiguity.
            off = dy * W + dx
            out = v
            if off > 0:
                z = jnp.zeros((v.shape[0], off), jnp.float32)
                out = jnp.concatenate([v[:, off:], z], axis=1)
            elif off < 0:
                z = jnp.zeros((v.shape[0], -off), jnp.float32)
                out = jnp.concatenate([z, v[:, :off]], axis=1)
            if dx == -1:
                out = out * m_neg
            elif dx == 1:
                out = out * m_pos
            return out

        def conv3x3(v, w_ref, b_ref, blk, cout):
            # 3x3 "SAME" conv over the flattened-HW lane axis.
            # v: (Cin, L); w_ref[blk, k]: (Cout, 1) weight column for
            # k = tap*Cin + ci; b_ref[blk]: (Cout, 1).
            # Weight-stationary VPU outer-product FMAs (K = Cin is tiny, so
            # the MXU would run at ~2% utilization -- skip it entirely).
            cin = v.shape[0]
            acc = None
            k = 0
            for dy, dx in taps:
                sv = shift_plane(v, dy, dx)              # (Cin, L)
                for ci in range(cin):
                    wcol = w_ref[blk, k]                 # (Cout, 1)
                    term = wcol * sv[ci:ci + 1, :]       # -> (Cout, L)
                    acc = term if acc is None else acc + term
                    k += 1
            return acc + b_ref[blk]                      # bias (Cout, 1) broadcast

        x = x_ref[0].astype(jnp.float32)                 # (C, L), lane-dense
        x1 = x[:sp1, :]
        x2 = x[sp1:, :]

        # All InvBlocks fused: the activation stays resident in vregs/VMEM.
        for blk in range(nb):
            # y1 = x1 + F(x2)
            y1 = x1 + conv3x3(x2, wF_ref, bF_ref, blk, sp1)
            # Fused H/G conv on y1: rows [:sp2] = H(y1), rows [sp2:] = G(y1).
            gh = conv3x3(y1, wGH_ref, bGH_ref, blk, 2 * sp2)
            # tanh(0.5*z) == 2*sigmoid(z) - 1  (single EUP op).
            s = clamp * jnp.tanh(0.5 * gh[:sp2, :])
            y2 = x2 * jnp.exp(s) + gh[sp2:, :]
            x1, x2 = y1, y2

        # Lane-dense, sublane-sliced stores (no lane-axis concat).
        y_ref[0, 0:sp1, :] = x1.astype(y_ref.dtype)
        y_ref[0, sp1:, :] = x2.astype(y_ref.dtype)

    return kernel


# ----------------------------------------------------------------------------
# Host-side packing
# ----------------------------------------------------------------------------
def _x_masks(H, W):
    # (2, 1, H*W): row 0 -> valid columns for the dx=-1 taps, row 1 -> dx=+1.
    col = jnp.arange(H * W, dtype=jnp.int32) % W
    m_neg = (col >= 1).astype(jnp.float32)
    m_pos = (col <= W - 2).astype(jnp.float32)
    return jnp.stack([m_neg, m_pos]).reshape(2, 1, H * W)


def _pack_w(w):
    # (3, 3, Cin, Cout) HWIO -> (9*Cin, Cout, 1); row index = tap*Cin + ci
    # with tap = ky*3 + kx (matches the kernel's tap/ci loop order).
    cin, cout = w.shape[2], w.shape[3]
    return w.reshape(9 * cin, cout)[:, :, None]


def pack_invnet_params(blocks_params):
    """Stack all InvBlocks' weights (G and H fused along Cout)."""
    b0 = blocks_params[0]
    sp2, sp1 = b0["wF"].shape[2], b0["wF"].shape[3]
    wF = jnp.stack([_pack_w(p["wF"]) for p in blocks_params])          # (nb, 9*sp2, sp1, 1)
    bF = jnp.stack([p["bF"].reshape(sp1, 1) for p in blocks_params])   # (nb, sp1, 1)
    wGH = jnp.stack([_pack_w(jnp.concatenate([p["wH"], p["wG"]], axis=-1))
                     for p in blocks_params])                          # (nb, 9*sp1, 2*sp2, 1)
    bGH = jnp.stack([jnp.concatenate([p["bH"], p["bG"]], axis=-1).reshape(2 * sp2, 1)
                     for p in blocks_params])                          # (nb, 2*sp2, 1)
    return dict(wF=wF, bF=bF, wGH=wGH, bGH=bGH, sp1=sp1, sp2=sp2)


# ----------------------------------------------------------------------------
# pallas_call wrapper
# ----------------------------------------------------------------------------
def _invnet_pallas_call(x_flat, pp, H, W, clamp):
    N, C, L = x_flat.shape
    nb = pp["wF"].shape[0]
    sp1, sp2 = pp["sp1"], pp["sp2"]
    masks = _x_masks(H, W)
    kernel = _make_invnet_kernel(nb, H, W, sp1, sp2, clamp)

    def full_spec(a):
        nd = a.ndim
        return pl.BlockSpec(a.shape, lambda n, _nd=nd: (0,) * _nd)

    act_spec = pl.BlockSpec((1, C, L), lambda n: (n, 0, 0))

    return pl.pallas_call(
        kernel,
        out_shape=jax.ShapeDtypeStruct((N, C, L), x_flat.dtype),
        grid_spec=pltpu.PrefetchScalarGridSpec(
            num_scalar_prefetch=0,
            grid=(N,),                      # one image per step; N >= 2 so both
            in_specs=[                      # v7x TensorCores get work.
                full_spec(masks),
                act_spec,
                full_spec(pp["wF"]), full_spec(pp["bF"]),
                full_spec(pp["wGH"]), full_spec(pp["bGH"]),
            ],
            out_specs=act_spec,
        ),
        compiler_params=pltpu.CompilerParams(
            dimension_semantics=("parallel",),
            vmem_limit_bytes=32 * 1024 * 1024),
    )(masks, x_flat, pp["wF"], pp["bF"], pp["wGH"], pp["bGH"])


def invnet_forward(x_nchw, blocks_params, clamp=1.0, rev=False):
    """InvNet forward (rev=False). x: (N, C, H, W) NCHW."""
    if rev:
        # TODO(synk): reverse path (rev=True) and cal_jacobian not implemented.
        raise NotImplementedError("only forward (rev=False) is implemented")
    N, C, H, W = x_nchw.shape
    pp = pack_invnet_params(blocks_params)
    assert pp["sp1"] + pp["sp2"] == C
    # NCHW -> (N, C, H*W): a pure reshape (no transpose, no extra HBM pass);
    # the flattened spatial axis becomes the lane dimension in the kernel.
    x_flat = x_nchw.reshape(N, C, H * W)
    y_flat = _invnet_pallas_call(x_flat, pp, H, W, clamp)
    return y_flat.reshape(N, C, H, W)


# ----------------------------------------------------------------------------
# Deterministic parameter init (PyTorch Conv2d-style uniform bounds)
# ----------------------------------------------------------------------------
def _conv_params(key, cin, cout):
    kw, kb = jax.random.split(key)
    bound = 1.0 / jnp.sqrt(cin * 3.0 * 3.0)
    w = jax.random.uniform(kw, (3, 3, cin, cout), jnp.float32, -bound, bound)
    b = jax.random.uniform(kb, (1, cout), jnp.float32, -bound, bound)
    return w, b


def make_invnet_params(key, sp1, sp2, block_num, down_num):
    n_blocks = sum(block_num[:down_num])
    blocks = []
    for i in range(n_blocks):
        kF, kG, kH, key = jax.random.split(jax.random.fold_in(key, i), 4)
        wF, bF = _conv_params(kF, sp2, sp1)   # F: split_len2 -> split_len1
        wG, bG = _conv_params(kG, sp1, sp2)   # G: split_len1 -> split_len2
        wH, bH = _conv_params(kH, sp1, sp2)   # H: split_len1 -> split_len2
        blocks.append(dict(wF=wF, bF=bF, wG=wG, bG=bG, wH=wH, bH=bH))
    return blocks


# ----------------------------------------------------------------------------
# Pure-JAX reference (NHWC) for the correctness check
# ----------------------------------------------------------------------------
def _conv3x3_ref(x, w, b):
    y = lax.conv_general_dilated(
        x, w, window_strides=(1, 1), padding="SAME",
        dimension_numbers=("NHWC", "HWIO", "NHWC"),
        precision=lax.Precision.HIGHEST)
    return y + b.reshape(1, 1, 1, -1)


def _inv_block_ref(x, p, clamp=1.0):
    sp1 = p["wF"].shape[3]
    x1, x2 = x[..., :sp1], x[..., sp1:]
    y1 = x1 + _conv3x3_ref(x2, p["wF"], p["bF"])
    s = clamp * (jax.nn.sigmoid(_conv3x3_ref(y1, p["wH"], p["bH"])) * 2.0 - 1.0)
    y2 = x2 * jnp.exp(s) + _conv3x3_ref(y1, p["wG"], p["bG"])
    return jnp.concatenate([y1, y2], axis=-1)


def _invnet_ref(x_nchw, blocks_params, clamp=1.0):
    out = jnp.transpose(x_nchw, (0, 2, 3, 1))
    for p in blocks_params:
        out = _inv_block_ref(out, p, clamp)
    return jnp.transpose(out, (0, 3, 1, 2))


# ----------------------------------------------------------------------------
if __name__ == "__main__":
    key = jax.random.PRNGKey(0)
    kx, kp = jax.random.split(key)

    # Small config: sp1 = sp2 = 4 -> channels = 8; block_num = [1, 1], down_num = 2.
    sp1, sp2 = 4, 4
    block_num, down_num = [1, 1], 2
    N, C, H, W = 2, sp1 + sp2, 16, 16

    x = jax.random.normal(kx, (N, C, H, W), jnp.float32)
    params = make_invnet_params(kp, sp1, sp2, block_num, down_num)

    fwd = jax.jit(invnet_forward)
    out = jax.block_until_ready(fwd(x, params))

    ref = jax.block_until_ready(_invnet_ref(x, params))
    assert out.shape == (N, C, H, W)
    assert jnp.allclose(out, ref, atol=2e-4, rtol=2e-4), "mismatch vs reference"

    print("KERNEL_OK")
</pallas_src>

<mosaic_0001>
module attributes {stable_mosaic.version = 11 : i64} {
  func.func @kernel(%arg0: i32, %arg1: memref<2x1x256xf32, #tpu.memory_space<vmem>>, %arg2: memref<1x8x256xf32, #tpu.memory_space<vmem>>, %arg3: memref<2x36x4x1xf32, #tpu.memory_space<vmem>>, %arg4: memref<2x4x1xf32, #tpu.memory_space<vmem>>, %arg5: memref<2x36x8x1xf32, #tpu.memory_space<vmem>>, %arg6: memref<2x8x1xf32, #tpu.memory_space<vmem>>, %arg7: memref<1x8x256xf32, #tpu.memory_space<vmem>>) attributes {dimension_semantics = [#tpu.dimension_semantics<parallel>], iteration_bounds = array<i64: 2>, scalar_prefetch = 0 : i64, scratch_operands = 0 : i64, tpu.core_type = #tpu.core_type<tc>, window_params = [{pipeline_mode = #tpu.pipeline_mode<synchronous>, transform_indices = @transform_0, window_bounds = array<i64: 2, 1, 256>}, {transform_indices = @transform_1, window_bounds = array<i64: 1, 8, 256>}, {pipeline_mode = #tpu.pipeline_mode<synchronous>, transform_indices = @transform_2, window_bounds = array<i64: 2, 36, 4, 1>}, {pipeline_mode = #tpu.pipeline_mode<synchronous>, transform_indices = @transform_3, window_bounds = array<i64: 2, 4, 1>}, {pipeline_mode = #tpu.pipeline_mode<synchronous>, transform_indices = @transform_4, window_bounds = array<i64: 2, 36, 8, 1>}, {pipeline_mode = #tpu.pipeline_mode<synchronous>, transform_indices = @transform_5, window_bounds = array<i64: 2, 8, 1>}, {transform_indices = @transform_6, window_bounds = array<i64: 1, 8, 256>}]} {
    %c0 = arith.constant 0 : index
    %c0_0 = arith.constant 0 : index
    %c0_1 = arith.constant 0 : index
    %0 = vector.load %arg1[%c0, %c0_0, %c0_1] : memref<2x1x256xf32, #tpu.memory_space<vmem>>, vector<1x1x256xf32>
    %1 = vector.shape_cast %0 : vector<1x1x256xf32> to vector<1x256xf32>
    %c1 = arith.constant 1 : index
    %c0_2 = arith.constant 0 : index
    %c0_3 = arith.constant 0 : index
    %2 = vector.load %arg1[%c1, %c0_2, %c0_3] : memref<2x1x256xf32, #tpu.memory_space<vmem>>, vector<1x1x256xf32>
    %3 = vector.shape_cast %2 : vector<1x1x256xf32> to vector<1x256xf32>
    %c0_4 = arith.constant 0 : index
    %c0_5 = arith.constant 0 : index
    %c0_6 = arith.constant 0 : index
    %4 = vector.load %arg2[%c0_4, %c0_5, %c0_6] : memref<1x8x256xf32, #tpu.memory_space<vmem>>, vector<1x8x256xf32>
    %5 = vector.shape_cast %4 : vector<1x8x256xf32> to vector<8x256xf32>
    %6 = vector.extract_strided_slice %5 {offsets = [0, 0], sizes = [4, 256], strides = [1, 1]} : vector<8x256xf32> to vector<4x256xf32>
    %7 = vector.extract_strided_slice %5 {offsets = [4, 0], sizes = [4, 256], strides = [1, 1]} : vector<8x256xf32> to vector<4x256xf32>
    %cst = arith.constant 0.000000e+00 : f32
    %8 = vector.broadcast %cst : f32 to vector<4x17xf32>
    %9 = vector.extract_strided_slice %7 {offsets = [0, 0], sizes = [4, 239], strides = [1, 1]} : vector<4x256xf32> to vector<4x239xf32>
    %10 = tpu.concatenate %8, %9 in 1 : vector<4x17xf32>, vector<4x239xf32> -> vector<4x256xf32>
    %11 = vector.broadcast %1 : vector<1x256xf32> to vector<4x256xf32>
    %12 = arith.mulf %10, %11 : vector<4x256xf32>
    %c0_7 = arith.constant 0 : index
    %c0_8 = arith.constant 0 : index
    %c0_9 = arith.constant 0 : index
    %c0_10 = arith.constant 0 : index
    %13 = vector.load %arg3[%c0_7, %c0_8, %c0_9, %c0_10] : memref<2x36x4x1xf32, #tpu.memory_space<vmem>>, vector<1x1x4x1xf32>
    %14 = vector.shape_cast %13 : vector<1x1x4x1xf32> to vector<4x1xf32>
    %15 = vector.extract_strided_slice %12 {offsets = [0, 0], sizes = [1, 256], strides = [1, 1]} : vector<4x256xf32> to vector<1x256xf32>
    %16 = vector.broadcast %14 : vector<4x1xf32> to vector<4x256xf32>
    %17 = vector.broadcast %15 : vector<1x256xf32> to vector<4x256xf32>
    %18 = arith.mulf %16, %17 : vector<4x256xf32>
    %c0_11 = arith.constant 0 : index
    %c1_12 = arith.constant 1 : index
    %c0_13 = arith.constant 0 : index
    %c0_14 = arith.constant 0 : index
    %19 = vector.load %arg3[%c0_11, %c1_12, %c0_13, %c0_14] : memref<2x36x4x1xf32, #tpu.memory_space<vmem>>, vector<1x1x4x1xf32>
    %20 = vector.shape_cast %19 : vector<1x1x4x1xf32> to vector<4x1xf32>
    %21 = vector.extract_strided_slice %12 {offsets = [1, 0], sizes = [1, 256], strides = [1, 1]} : vector<4x256xf32> to vector<1x256xf32>
    %22 = vector.broadcast %20 : vector<4x1xf32> to vector<4x256xf32>
    %23 = vector.broadcast %21 : vector<1x256xf32> to vector<4x256xf32>
    %24 = arith.mulf %22, %23 : vector<4x256xf32>
    %25 = arith.addf %18, %24 : vector<4x256xf32>
    %c0_15 = arith.constant 0 : index
    %c2 = arith.constant 2 : index
    %c0_16 = arith.constant 0 : index
    %c0_17 = arith.constant 0 : index
    %26 = vector.load %arg3[%c0_15, %c2, %c0_16, %c0_17] : memref<2x36x4x1xf32, #tpu.memory_space<vmem>>, vector<1x1x4x1xf32>
    %27 = vector.shape_cast %26 : vector<1x1x4x1xf32> to vector<4x1xf32>
    %28 = vector.extract_strided_slice %12 {offsets = [2, 0], sizes = [1, 256], strides = [1, 1]} : vector<4x256xf32> to vector<1x256xf32>
    %29 = vector.broadcast %27 : vector<4x1xf32> to vector<4x256xf32>
    %30 = vector.broadcast %28 : vector<1x256xf32> to vector<4x256xf32>
    %31 = arith.mulf %29, %30 : vector<4x256xf32>
    %32 = arith.addf %25, %31 : vector<4x256xf32>
    %c0_18 = arith.constant 0 : index
    %c3 = arith.constant 3 : index
    %c0_19 = arith.constant 0 : index
    %c0_20 = arith.constant 0 : index
    %33 = vector.load %arg3[%c0_18, %c3, %c0_19, %c0_20] : memref<2x36x4x1xf32, #tpu.memory_space<vmem>>, vector<1x1x4x1xf32>
    %34 = vector.shape_cast %33 : vector<1x1x4x1xf32> to vector<4x1xf32>
    %35 = vector.extract_strided_slice %12 {offsets = [3, 0], sizes = [1, 256], strides = [1, 1]} : vector<4x256xf32> to vector<1x256xf32>
    %36 = vector.broadcast %34 : vector<4x1xf32> to vector<4x256xf32>
    %37 = vector.broadcast %35 : vector<1x256xf32> to vector<4x256xf32>
    %38 = arith.mulf %36, %37 : vector<4x256xf32>
    %39 = arith.addf %32, %38 : vector<4x256xf32>
    %cst_21 = arith.constant 0.000000e+00 : f32
    %40 = vector.broadcast %cst_21 : f32 to vector<4x16xf32>
    %41 = vector.extract_strided_slice %7 {offsets = [0, 0], sizes = [4, 240], strides = [1, 1]} : vector<4x256xf32> to vector<4x240xf32>
    %42 = tpu.concatenate %40, %41 in 1 : vector<4x16xf32>, vector<4x240xf32> -> vector<4x256xf32>
    %c0_22 = arith.constant 0 : index
    %c4 = arith.constant 4 : index
    %c0_23 = arith.constant 0 : index
    %c0_24 = arith.constant 0 : index
    %43 = vector.load %arg3[%c0_22, %c4, %c0_23, %c0_24] : memref<2x36x4x1xf32, #tpu.memory_space<vmem>>, vector<1x1x4x1xf32>
    %44 = vector.shape_cast %43 : vector<1x1x4x1xf32> to vector<4x1xf32>
    %45 = vector.extract_strided_slice %42 {offsets = [0, 0], sizes = [1, 256], strides = [1, 1]} : vector<4x256xf32> to vector<1x256xf32>
    %46 = vector.broadcast %44 : vector<4x1xf32> to vector<4x256xf32>
    %47 = vector.broadcast %45 : vector<1x256xf32> to vector<4x256xf32>
    %48 = arith.mulf %46, %47 : vector<4x256xf32>
    %49 = arith.addf %39, %48 : vector<4x256xf32>
    %c0_25 = arith.constant 0 : index
    %c5 = arith.constant 5 : index
    %c0_26 = arith.constant 0 : index
    %c0_27 = arith.constant 0 : index
    %50 = vector.load %arg3[%c0_25, %c5, %c0_26, %c0_27] : memref<2x36x4x1xf32, #tpu.memory_space<vmem>>, vector<1x1x4x1xf32>
    %51 = vector.shape_cast %50 : vector<1x1x4x1xf32> to vector<4x1xf32>
    %52 = vector.extract_strided_slice %42 {offsets = [1, 0], sizes = [1, 256], strides = [1, 1]} : vector<4x256xf32> to vector<1x256xf32>
    %53 = vector.broadcast %51 : vector<4x1xf32> to vector<4x256xf32>
    %54 = vector.broadcast %52 : vector<1x256xf32> to vector<4x256xf32>
    %55 = arith.mulf %53, %54 : vector<4x256xf32>
    %56 = arith.addf %49, %55 : vector<4x256xf32>
    %c0_28 = arith.constant 0 : index
    %c6 = arith.constant 6 : index
    %c0_29 = arith.constant 0 : index
    %c0_30 = arith.constant 0 : index
    %57 = vector.load %arg3[%c0_28, %c6, %c0_29, %c0_30] : memref<2x36x4x1xf32, #tpu.memory_space<vmem>>, vector<1x1x4x1xf32>
    %58 = vector.shape_cast %57 : vector<1x1x4x1xf32> to vector<4x1xf32>
    %59 = vector.extract_strided_slice %42 {offsets = [2, 0], sizes = [1, 256], strides = [1, 1]} : vector<4x256xf32> to vector<1x256xf32>
    %60 = vector.broadcast %58 : vector<4x1xf32> to vector<4x256xf32>
    %61 = vector.broadcast %59 : vector<1x256xf32> to vector<4x256xf32>
    %62 = arith.mulf %60, %61 : vector<4x256xf32>
    %63 = arith.addf %56, %62 : vector<4x256xf32>
    %c0_31 = arith.constant 0 : index
    %c7 = arith.constant 7 : index
    %c0_32 = arith.constant 0 : index
    %c0_33 = arith.constant 0 : index
    %64 = vector.load %arg3[%c0_31, %c7, %c0_32, %c0_33] : memref<2x36x4x1xf32, #tpu.memory_space<vmem>>, vector<1x1x4x1xf32>
    %65 = vector.shape_cast %64 : vector<1x1x4x1xf32> to vector<4x1xf32>
    %66 = vector.extract_strided_slice %42 {offsets = [3, 0], sizes = [1, 256], strides = [1, 1]} : vector<4x256xf32> to vector<1x256xf32>
    %67 = vector.broadcast %65 : vector<4x1xf32> to vector<4x256xf32>
    %68 = vector.broadcast %66 : vector<1x256xf32> to vector<4x256xf32>
    %69 = arith.mulf %67, %68 : vector<4x256xf32>
    %70 = arith.addf %63, %69 : vector<4x256xf32>
    %cst_34 = arith.constant 0.000000e+00 : f32
    %71 = vector.broadcast %cst_34 : f32 to vector<4x15xf32>
    %72 = vector.extract_strided_slice %7 {offsets = [0, 0], sizes = [4, 241], strides = [1, 1]} : vector<4x256xf32> to vector<4x241xf32>
    %73 = tpu.concatenate %71, %72 in 1 : vector<4x15xf32>, vector<4x241xf32> -> vector<4x256xf32>
    %74 = vector.broadcast %3 : vector<1x256xf32> to vector<4x256xf32>
    %75 = arith.mulf %73, %74 : vector<4x256xf32>
    %c0_35 = arith.constant 0 : index
    %c8 = arith.constant 8 : index
    %c0_36 = arith.constant 0 : index
    %c0_37 = arith.constant 0 : index
    %76 = vector.load %arg3[%c0_35, %c8, %c0_36, %c0_37] : memref<2x36x4x1xf32, #tpu.memory_space<vmem>>, vector<1x1x4x1xf32>
    %77 = vector.shape_cast %76 : vector<1x1x4x1xf32> to vector<4x1xf32>
    %78 = vector.extract_strided_slice %75 {offsets = [0, 0], sizes = [1, 256], strides = [1, 1]} : vector<4x256xf32> to vector<1x256xf32>
    %79 = vector.broadcast %77 : vector<4x1xf32> to vector<4x256xf32>
    %80 = vector.broadcast %78 : vector<1x256xf32> to vector<4x256xf32>
    %81 = arith.mulf %79, %80 : vector<4x256xf32>
    %82 = arith.addf %70, %81 : vector<4x256xf32>
    %c0_38 = arith.constant 0 : index
    %c9 = arith.constant 9 : index
    %c0_39 = arith.constant 0 : index
    %c0_40 = arith.constant 0 : index
    %83 = vector.load %arg3[%c0_38, %c9, %c0_39, %c0_40] : memref<2x36x4x1xf32, #tpu.memory_space<vmem>>, vector<1x1x4x1xf32>
    %84 = vector.shape_cast %83 : vector<1x1x4x1xf32> to vector<4x1xf32>
    %85 = vector.extract_strided_slice %75 {offsets = [1, 0], sizes = [1, 256], strides = [1, 1]} : vector<4x256xf32> to vector<1x256xf32>
    %86 = vector.broadcast %84 : vector<4x1xf32> to vector<4x256xf32>
    %87 = vector.broadcast %85 : vector<1x256xf32> to vector<4x256xf32>
    %88 = arith.mulf %86, %87 : vector<4x256xf32>
    %89 = arith.addf %82, %88 : vector<4x256xf32>
    %c0_41 = arith.constant 0 : index
    %c10 = arith.constant 10 : index
    %c0_42 = arith.constant 0 : index
    %c0_43 = arith.constant 0 : index
    %90 = vector.load %arg3[%c0_41, %c10, %c0_42, %c0_43] : memref<2x36x4x1xf32, #tpu.memory_space<vmem>>, vector<1x1x4x1xf32>
    %91 = vector.shape_cast %90 : vector<1x1x4x1xf32> to vector<4x1xf32>
    %92 = vector.extract_strided_slice %75 {offsets = [2, 0], sizes = [1, 256], strides = [1, 1]} : vector<4x256xf32> to vector<1x256xf32>
    %93 = vector.broadcast %91 : vector<4x1xf32> to vector<4x256xf32>
    %94 = vector.broadcast %92 : vector<1x256xf32> to vector<4x256xf32>
    %95 = arith.mulf %93, %94 : vector<4x256xf32>
    %96 = arith.addf %89, %95 : vector<4x256xf32>
    %c0_44 = arith.constant 0 : index
    %c11 = arith.constant 11 : index
    %c0_45 = arith.constant 0 : index
    %c0_46 = arith.constant 0 : index
    %97 = vector.load %arg3[%c0_44, %c11, %c0_45, %c0_46] : memref<2x36x4x1xf32, #tpu.memory_space<vmem>>, vector<1x1x4x1xf32>
    %98 = vector.shape_cast %97 : vector<1x1x4x1xf32> to vector<4x1xf32>
    %99 = vector.extract_strided_slice %75 {offsets = [3, 0], sizes = [1, 256], strides = [1, 1]} : vector<4x256xf32> to vector<1x256xf32>
    %100 = vector.broadcast %98 : vector<4x1xf32> to vector<4x256xf32>
    %101 = vector.broadcast %99 : vector<1x256xf32> to vector<4x256xf32>
    %102 = arith.mulf %100, %101 : vector<4x256xf32>
    %103 = arith.addf %96, %102 : vector<4x256xf32>
    %cst_47 = arith.constant 0.000000e+00 : f32
    %104 = vector.broadcast %cst_47 : f32 to vector<4x1xf32>
    %105 = vector.extract_strided_slice %7 {offsets = [0, 0], sizes = [4, 255], strides = [1, 1]} : vector<4x256xf32> to vector<4x255xf32>
    %106 = tpu.concatenate %104, %105 in 1 : vector<4x1xf32>, vector<4x255xf32> -> vector<4x256xf32>
    %107 = vector.broadcast %1 : vector<1x256xf32> to vector<4x256xf32>
    %108 = arith.mulf %106, %107 : vector<4x256xf32>
    %c0_48 = arith.constant 0 : index
    %c12 = arith.constant 12 : index
    %c0_49 = arith.constant 0 : index
    %c0_50 = arith.constant 0 : index
    %109 = vector.load %arg3[%c0_48, %c12, %c0_49, %c0_50] : memref<2x36x4x1xf32, #tpu.memory_space<vmem>>, vector<1x1x4x1xf32>
    %110 = vector.shape_cast %109 : vector<1x1x4x1xf32> to vector<4x1xf32>
    %111 = vector.extract_strided_slice %108 {offsets = [0, 0], sizes = [1, 256], strides = [1, 1]} : vector<4x256xf32> to vector<1x256xf32>
    %112 = vector.broadcast %110 : vector<4x1xf32> to vector<4x256xf32>
    %113 = vector.broadcast %111 : vector<1x256xf32> to vector<4x256xf32>
    %114 = arith.mulf %112, %113 : vector<4x256xf32>
    %115 = arith.addf %103, %114 : vector<4x256xf32>
    %c0_51 = arith.constant 0 : index
    %c13 = arith.constant 13 : index
    %c0_52 = arith.constant 0 : index
    %c0_53 = arith.constant 0 : index
    %116 = vector.load %arg3[%c0_51, %c13, %c0_52, %c0_53] : memref<2x36x4x1xf32, #tpu.memory_space<vmem>>, vector<1x1x4x1xf32>
    %117 = vector.shape_cast %116 : vector<1x1x4x1xf32> to vector<4x1xf32>
    %118 = vector.extract_strided_slice %108 {offsets = [1, 0], sizes = [1, 256], strides = [1, 1]} : vector<4x256xf32> to vector<1x256xf32>
    %119 = vector.broadcast %117 : vector<4x1xf32> to vector<4x256xf32>
    %120 = vector.broadcast %118 : vector<1x256xf32> to vector<4x256xf32>
    %121 = arith.mulf %119, %120 : vector<4x256xf32>
    %122 = arith.addf %115, %121 : vector<4x256xf32>
    %c0_54 = arith.constant 0 : index
    %c14 = arith.constant 14 : index
    %c0_55 = arith.constant 0 : index
    %c0_56 = arith.constant 0 : index
    %123 = vector.load %arg3[%c0_54, %c14, %c0_55, %c0_56] : memref<2x36x4x1xf32, #tpu.memory_space<vmem>>, vector<1x1x4x1xf32>
    %124 = vector.shape_cast %123 : vector<1x1x4x1xf32> to vector<4x1xf32>
    %125 = vector.extract_strided_slice %108 {offsets = [2, 0], sizes = [1, 256], strides = [1, 1]} : vector<4x256xf32> to vector<1x256xf32>
    %126 = vector.broadcast %124 : vector<4x1xf32> to vector<4x256xf32>
    %127 = vector.broadcast %125 : vector<1x256xf32> to vector<4x256xf32>
    %128 = arith.mulf %126, %127 : vector<4x256xf32>
    %129 = arith.addf %122, %128 : vector<4x256xf32>
    %c0_57 = arith.constant 0 : index
    %c15 = arith.constant 15 : index
    %c0_58 = arith.constant 0 : index
    %c0_59 = arith.constant 0 : index
    %130 = vector.load %arg3[%c0_57, %c15, %c0_58, %c0_59] : memref<2x36x4x1xf32, #tpu.memory_space<vmem>>, vector<1x1x4x1xf32>
    %131 = vector.shape_cast %130 : vector<1x1x4x1xf32> to vector<4x1xf32>
    %132 = vector.extract_strided_slice %108 {offsets = [3, 0], sizes = [1, 256], strides = [1, 1]} : vector<4x256xf32> to vector<1x256xf32>
    %133 = vector.broadcast %131 : vector<4x1xf32> to vector<4x256xf32>
    %134 = vector.broadcast %132 : vector<1x256xf32> to vector<4x256xf32>
    %135 = arith.mulf %133, %134 : vector<4x256xf32>
    %136 = arith.addf %129, %135 : vector<4x256xf32>
    %c0_60 = arith.constant 0 : index
    %c16 = arith.constant 16 : index
    %c0_61 = arith.constant 0 : index
    %c0_62 = arith.constant 0 : index
    %137 = vector.load %arg3[%c0_60, %c16, %c0_61, %c0_62] : memref<2x36x4x1xf32, #tpu.memory_space<vmem>>, vector<1x1x4x1xf32>
    %138 = vector.shape_cast %137 : vector<1x1x4x1xf32> to vector<4x1xf32>
    %139 = vector.extract_strided_slice %7 {offsets = [0, 0], sizes = [1, 256], strides = [1, 1]} : vector<4x256xf32> to vector<1x256xf32>
    %140 = vector.broadcast %138 : vector<4x1xf32> to vector<4x256xf32>
    %141 = vector.broadcast %139 : vector<1x256xf32> to vector<4x256xf32>
    %142 = arith.mulf %140, %141 : vector<4x256xf32>
    %143 = arith.addf %136, %142 : vector<4x256xf32>
    %c0_63 = arith.constant 0 : index
    %c17 = arith.constant 17 : index
    %c0_64 = arith.constant 0 : index
    %c0_65 = arith.constant 0 : index
    %144 = vector.load %arg3[%c0_63, %c17, %c0_64, %c0_65] : memref<2x36x4x1xf32, #tpu.memory_space<vmem>>, vector<1x1x4x1xf32>
    %145 = vector.shape_cast %144 : vector<1x1x4x1xf32> to vector<4x1xf32>
    %146 = vector.extract_strided_slice %7 {offsets = [1, 0], sizes = [1, 256], strides = [1, 1]} : vector<4x256xf32> to vector<1x256xf32>
    %147 = vector.broadcast %145 : vector<4x1xf32> to vector<4x256xf32>
    %148 = vector.broadcast %146 : vector<1x256xf32> to vector<4x256xf32>
    %149 = arith.mulf %147, %148 : vector<4x256xf32>
    %150 = arith.addf %143, %149 : vector<4x256xf32>
    %c0_66 = arith.constant 0 : index
    %c18 = arith.constant 18 : index
    %c0_67 = arith.constant 0 : index
    %c0_68 = arith.constant 0 : index
    %151 = vector.load %arg3[%c0_66, %c18, %c0_67, %c0_68] : memref<2x36x4x1xf32, #tpu.memory_space<vmem>>, vector<1x1x4x1xf32>
    %152 = vector.shape_cast %151 : vector<1x1x4x1xf32> to vector<4x1xf32>
    %153 = vector.extract_strided_slice %7 {offsets = [2, 0], sizes = [1, 256], strides = [1, 1]} : vector<4x256xf32> to vector<1x256xf32>
    %154 = vector.broadcast %152 : vector<4x1xf32> to vector<4x256xf32>
    %155 = vector.broadcast %153 : vector<1x256xf32> to vector<4x256xf32>
    %156 = arith.mulf %154, %155 : vector<4x256xf32>
    %157 = arith.addf %150, %156 : vector<4x256xf32>
    %c0_69 = arith.constant 0 : index
    %c19 = arith.constant 19 : index
    %c0_70 = arith.constant 0 : index
    %c0_71 = arith.constant 0 : index
    %158 = vector.load %arg3[%c0_69, %c19, %c0_70, %c0_71] : memref<2x36x4x1xf32, #tpu.memory_space<vmem>>, vector<1x1x4x1xf32>
    %159 = vector.shape_cast %158 : vector<1x1x4x1xf32> to vector<4x1xf32>
    %160 = vector.extract_strided_slice %7 {offsets = [3, 0], sizes = [1, 256], strides = [1, 1]} : vector<4x256xf32> to vector<1x256xf32>
    %161 = vector.broadcast %159 : vector<4x1xf32> to vector<4x256xf32>
    %162 = vector.broadcast %160 : vector<1x256xf32> to vector<4x256xf32>
    %163 = arith.mulf %161, %162 : vector<4x256xf32>
    %164 = arith.addf %157, %163 : vector<4x256xf32>
    %cst_72 = arith.constant 0.000000e+00 : f32
    %165 = vector.broadcast %cst_72 : f32 to vector<4x1xf32>
    %166 = vector.extract_strided_slice %7 {offsets = [0, 1], sizes = [4, 255], strides = [1, 1]} : vector<4x256xf32> to vector<4x255xf32>
    %167 = tpu.concatenate %166, %165 in 1 : vector<4x255xf32>, vector<4x1xf32> -> vector<4x256xf32>
    %168 = vector.broadcast %3 : vector<1x256xf32> to vector<4x256xf32>
    %169 = arith.mulf %167, %168 : vector<4x256xf32>
    %c0_73 = arith.constant 0 : index
    %c20 = arith.constant 20 : index
    %c0_74 = arith.constant 0 : index
    %c0_75 = arith.constant 0 : index
    %170 = vector.load %arg3[%c0_73, %c20, %c0_74, %c0_75] : memref<2x36x4x1xf32, #tpu.memory_space<vmem>>, vector<1x1x4x1xf32>
    %171 = vector.shape_cast %170 : vector<1x1x4x1xf32> to vector<4x1xf32>
    %172 = vector.extract_strided_slice %169 {offsets = [0, 0], sizes = [1, 256], strides = [1, 1]} : vector<4x256xf32> to vector<1x256xf32>
    %173 = vector.broadcast %171 : vector<4x1xf32> to vector<4x256xf32>
    %174 = vector.broadcast %172 : vector<1x256xf32> to vector<4x256xf32>
    %175 = arith.mulf %173, %174 : vector<4x256xf32>
    %176 = arith.addf %164, %175 : vector<4x256xf32>
    %c0_76 = arith.constant 0 : index
    %c21 = arith.constant 21 : index
    %c0_77 = arith.constant 0 : index
    %c0_78 = arith.constant 0 : index
    %177 = vector.load %arg3[%c0_76, %c21, %c0_77, %c0_78] : memref<2x36x4x1xf32, #tpu.memory_space<vmem>>, vector<1x1x4x1xf32>
    %178 = vector.shape_cast %177 : vector<1x1x4x1xf32> to vector<4x1xf32>
    %179 = vector.extract_strided_slice %169 {offsets = [1, 0], sizes = [1, 256], strides = [1, 1]} : vector<4x256xf32> to vector<1x256xf32>
    %180 = vector.broadcast %178 : vector<4x1xf32> to vector<4x256xf32>
    %181 = vector.broadcast %179 : vector<1x256xf32> to vector<4x256xf32>
    %182 = arith.mulf %180, %181 : vector<4x256xf32>
    %183 = arith.addf %176, %182 : vector<4x256xf32>
    %c0_79 = arith.constant 0 : index
    %c22 = arith.constant 22 : index
    %c0_80 = arith.constant 0 : index
    %c0_81 = arith.constant 0 : index
    %184 = vector.load %arg3[%c0_79, %c22, %c0_80, %c0_81] : memref<2x36x4x1xf32, #tpu.memory_space<vmem>>, vector<1x1x4x1xf32>
    %185 = vector.shape_cast %184 : vector<1x1x4x1xf32> to vector<4x1xf32>
    %186 = vector.extract_strided_slice %169 {offsets = [2, 0], sizes = [1, 256], strides = [1, 1]} : vector<4x256xf32> to vector<1x256xf32>
    %187 = vector.broadcast %185 : vector<4x1xf32> to vector<4x256xf32>
    %188 = vector.broadcast %186 : vector<1x256xf32> to vector<4x256xf32>
    %189 = arith.mulf %187, %188 : vector<4x256xf32>
    %190 = arith.addf %183, %189 : vector<4x256xf32>
    %c0_82 = arith.constant 0 : index
    %c23 = arith.constant 23 : index
    %c0_83 = arith.constant 0 : index
    %c0_84 = arith.constant 0 : index
    %191 = vector.load %arg3[%c0_82, %c23, %c0_83, %c0_84] : memref<2x36x4x1xf32, #tpu.memory_space<vmem>>, vector<1x1x4x1xf32>
    %192 = vector.shape_cast %191 : vector<1x1x4x1xf32> to vector<4x1xf32>
    %193 = vector.extract_strided_slice %169 {offsets = [3, 0], sizes = [1, 256], strides = [1, 1]} : vector<4x256xf32> to vector<1x256xf32>
    %194 = vector.broadcast %192 : vector<4x1xf32> to vector<4x256xf32>
    %195 = vector.broadcast %193 : vector<1x256xf32> to vector<4x256xf32>
    %196 = arith.mulf %194, %195 : vector<4x256xf32>
    %197 = arith.addf %190, %196 : vector<4x256xf32>
    %cst_85 = arith.constant 0.000000e+00 : f32
    %198 = vector.broadcast %cst_85 : f32 to vector<4x15xf32>
    %199 = vector.extract_strided_slice %7 {offsets = [0, 15], sizes = [4, 241], strides = [1, 1]} : vector<4x256xf32> to vector<4x241xf32>
    %200 = tpu.concatenate %199, %198 in 1 : vector<4x241xf32>, vector<4x15xf32> -> vector<4x256xf32>
    %201 = vector.broadcast %1 : vector<1x256xf32> to vector<4x256xf32>
    %202 = arith.mulf %200, %201 : vector<4x256xf32>
    %c0_86 = arith.constant 0 : index
    %c24 = arith.constant 24 : index
    %c0_87 = arith.constant 0 : index
    %c0_88 = arith.constant 0 : index
    %203 = vector.load %arg3[%c0_86, %c24, %c0_87, %c0_88] : memref<2x36x4x1xf32, #tpu.memory_space<vmem>>, vector<1x1x4x1xf32>
    %204 = vector.shape_cast %203 : vector<1x1x4x1xf32> to vector<4x1xf32>
    %205 = vector.extract_strided_slice %202 {offsets = [0, 0], sizes = [1, 256], strides = [1, 1]} : vector<4x256xf32> to vector<1x256xf32>
    %206 = vector.broadcast %204 : vector<4x1xf32> to vector<4x256xf32>
    %207 = vector.broadcast %205 : vector<1x256xf32> to vector<4x256xf32>
    %208 = arith.mulf %206, %207 : vector<4x256xf32>
    %209 = arith.addf %197, %208 : vector<4x256xf32>
    %c0_89 = arith.constant 0 : index
    %c25 = arith.constant 25 : index
    %c0_90 = arith.constant 0 : index
    %c0_91 = arith.constant 0 : index
    %210 = vector.load %arg3[%c0_89, %c25, %c0_90, %c0_91] : memref<2x36x4x1xf32, #tpu.memory_space<vmem>>, vector<1x1x4x1xf32>
    %211 = vector.shape_cast %210 : vector<1x1x4x1xf32> to vector<4x1xf32>
    %212 = vector.extract_strided_slice %202 {offsets = [1, 0], sizes = [1, 256], strides = [1, 1]} : vector<4x256xf32> to vector<1x256xf32>
    %213 = vector.broadcast %211 : vector<4x1xf32> to vector<4x256xf32>
    %214 = vector.broadcast %212 : vector<1x256xf32> to vector<4x256xf32>
    %215 = arith.mulf %213, %214 : vector<4x256xf32>
    %216 = arith.addf %209, %215 : vector<4x256xf32>
    %c0_92 = arith.constant 0 : index
    %c26 = arith.constant 26 : index
    %c0_93 = arith.constant 0 : index
    %c0_94 = arith.constant 0 : index
    %217 = vector.load %arg3[%c0_92, %c26, %c0_93, %c0_94] : memref<2x36x4x1xf32, #tpu.memory_space<vmem>>, vector<1x1x4x1xf32>
    %218 = vector.shape_cast %217 : vector<1x1x4x1xf32> to vector<4x1xf32>
    %219 = vector.extract_strided_slice %202 {offsets = [2, 0], sizes = [1, 256], strides = [1, 1]} : vector<4x256xf32> to vector<1x256xf32>
    %220 = vector.broadcast %218 : vector<4x1xf32> to vector<4x256xf32>
    %221 = vector.broadcast %219 : vector<1x256xf32> to vector<4x256xf32>
    %222 = arith.mulf %220, %221 : vector<4x256xf32>
    %223 = arith.addf %216, %222 : vector<4x256xf32>
    %c0_95 = arith.constant 0 : index
    %c27 = arith.constant 27 : index
    %c0_96 = arith.constant 0 : index
    %c0_97 = arith.constant 0 : index
    %224 = vector.load %arg3[%c0_95, %c27, %c0_96, %c0_97] : memref<2x36x4x1xf32, #tpu.memory_space<vmem>>, vector<1x1x4x1xf32>
    %225 = vector.shape_cast %224 : vector<1x1x4x1xf32> to vector<4x1xf32>
    %226 = vector.extract_strided_slice %202 {offsets = [3, 0], sizes = [1, 256], strides = [1, 1]} : vector<4x256xf32> to vector<1x256xf32>
    %227 = vector.broadcast %225 : vector<4x1xf32> to vector<4x256xf32>
    %228 = vector.broadcast %226 : vector<1x256xf32> to vector<4x256xf32>
    %229 = arith.mulf %227, %228 : vector<4x256xf32>
    %230 = arith.addf %223, %229 : vector<4x256xf32>
    %cst_98 = arith.constant 0.000000e+00 : f32
    %231 = vector.broadcast %cst_98 : f32 to vector<4x16xf32>
    %232 = vector.extract_strided_slice %7 {offsets = [0, 16], sizes = [4, 240], strides = [1, 1]} : vector<4x256xf32> to vector<4x240xf32>
    %233 = tpu.concatenate %232, %231 in 1 : vector<4x240xf32>, vector<4x16xf32> -> vector<4x256xf32>
    %c0_99 = arith.constant 0 : index
    %c28 = arith.constant 28 : index
    %c0_100 = arith.constant 0 : index
    %c0_101 = arith.constant 0 : index
    %234 = vector.load %arg3[%c0_99, %c28, %c0_100, %c0_101] : memref<2x36x4x1xf32, #tpu.memory_space<vmem>>, vector<1x1x4x1xf32>
    %235 = vector.shape_cast %234 : vector<1x1x4x1xf32> to vector<4x1xf32>
    %236 = vector.extract_strided_slice %233 {offsets = [0, 0], sizes = [1, 256], strides = [1, 1]} : vector<4x256xf32> to vector<1x256xf32>
    %237 = vector.broadcast %235 : vector<4x1xf32> to vector<4x256xf32>
    %238 = vector.broadcast %236 : vector<1x256xf32> to vector<4x256xf32>
    %239 = arith.mulf %237, %238 : vector<4x256xf32>
    %240 = arith.addf %230, %239 : vector<4x256xf32>
    %c0_102 = arith.constant 0 : index
    %c29 = arith.constant 29 : index
    %c0_103 = arith.constant 0 : index
    %c0_104 = arith.constant 0 : index
    %241 = vector.load %arg3[%c0_102, %c29, %c0_103, %c0_104] : memref<2x36x4x1xf32, #tpu.memory_space<vmem>>, vector<1x1x4x1xf32>
    %242 = vector.shape_cast %241 : vector<1x1x4x1xf32> to vector<4x1xf32>
    %243 = vector.extract_strided_slice %233 {offsets = [1, 0], sizes = [1, 256], strides = [1, 1]} : vector<4x256xf32> to vector<1x256xf32>
    %244 = vector.broadcast %242 : vector<4x1xf32> to vector<4x256xf32>
    %245 = vector.broadcast %243 : vector<1x256xf32> to vector<4x256xf32>
    %246 = arith.mulf %244, %245 : vector<4x256xf32>
    %247 = arith.addf %240, %246 : vector<4x256xf32>
    %c0_105 = arith.constant 0 : index
    %c30 = arith.constant 30 : index
    %c0_106 = arith.constant 0 : index
    %c0_107 = arith.constant 0 : index
    %248 = vector.load %arg3[%c0_105, %c30, %c0_106, %c0_107] : memref<2x36x4x1xf32, #tpu.memory_space<vmem>>, vector<1x1x4x1xf32>
    %249 = vector.shape_cast %248 : vector<1x1x4x1xf32> to vector<4x1xf32>
    %250 = vector.extract_strided_slice %233 {offsets = [2, 0], sizes = [1, 256], strides = [1, 1]} : vector<4x256xf32> to vector<1x256xf32>
    %251 = vector.broadcast %249 : vector<4x1xf32> to vector<4x256xf32>
    %252 = vector.broadcast %250 : vector<1x256xf32> to vector<4x256xf32>
    %253 = arith.mulf %251, %252 : vector<4x256xf32>
    %254 = arith.addf %247, %253 : vector<4x256xf32>
    %c0_108 = arith.constant 0 : index
    %c31 = arith.constant 31 : index
    %c0_109 = arith.constant 0 : index
    %c0_110 = arith.constant 0 : index
    %255 = vector.load %arg3[%c0_108, %c31, %c0_109, %c0_110] : memref<2x36x4x1xf32, #tpu.memory_space<vmem>>, vector<1x1x4x1xf32>
    %256 = vector.shape_cast %255 : vector<1x1x4x1xf32> to vector<4x1xf32>
    %257 = vector.extract_strided_slice %233 {offsets = [3, 0], sizes = [1, 256], strides = [1, 1]} : vector<4x256xf32> to vector<1x256xf32>
    %258 = vector.broadcast %256 : vector<4x1xf32> to vector<4x256xf32>
    %259 = vector.broadcast %257 : vector<1x256xf32> to vector<4x256xf32>
    %260 = arith.mulf %258, %259 : vector<4x256xf32>
    %261 = arith.addf %254, %260 : vector<4x256xf32>
    %cst_111 = arith.constant 0.000000e+00 : f32
    %262 = vector.broadcast %cst_111 : f32 to vector<4x17xf32>
    %263 = vector.extract_strided_slice %7 {offsets = [0, 17], sizes = [4, 239], strides = [1, 1]} : vector<4x256xf32> to vector<4x239xf32>
    %264 = tpu.concatenate %263, %262 in 1 : vector<4x239xf32>, vector<4x17xf32> -> vector<4x256xf32>
    %265 = vector.broadcast %3 : vector<1x256xf32> to vector<4x256xf32>
    %266 = arith.mulf %264, %265 : vector<4x256xf32>
    %c0_112 = arith.constant 0 : index
    %c32 = arith.constant 32 : index
    %c0_113 = arith.constant 0 : index
    %c0_114 = arith.constant 0 : index
    %267 = vector.load %arg3[%c0_112, %c32, %c0_113, %c0_114] : memref<2x36x4x1xf32, #tpu.memory_space<vmem>>, vector<1x1x4x1xf32>
    %268 = vector.shape_cast %267 : vector<1x1x4x1xf32> to vector<4x1xf32>
    %269 = vector.extract_strided_slice %266 {offsets = [0, 0], sizes = [1, 256], strides = [1, 1]} : vector<4x256xf32> to vector<1x256xf32>
    %270 = vector.broadcast %268 : vector<4x1xf32> to vector<4x256xf32>
    %271 = vector.broadcast %269 : vector<1x256xf32> to vector<4x256xf32>
    %272 = arith.mulf %270, %271 : vector<4x256xf32>
    %273 = arith.addf %261, %272 : vector<4x256xf32>
    %c0_115 = arith.constant 0 : index
    %c33 = arith.constant 33 : index
    %c0_116 = arith.constant 0 : index
    %c0_117 = arith.constant 0 : index
    %274 = vector.load %arg3[%c0_115, %c33, %c0_116, %c0_117] : memref<2x36x4x1xf32, #tpu.memory_space<vmem>>, vector<1x1x4x1xf32>
    %275 = vector.shape_cast %274 : vector<1x1x4x1xf32> to vector<4x1xf32>
    %276 = vector.extract_strided_slice %266 {offsets = [1, 0], sizes = [1, 256], strides = [1, 1]} : vector<4x256xf32> to vector<1x256xf32>
    %277 = vector.broadcast %275 : vector<4x1xf32> to vector<4x256xf32>
    %278 = vector.broadcast %276 : vector<1x256xf32> to vector<4x256xf32>
    %279 = arith.mulf %277, %278 : vector<4x256xf32>
    %280 = arith.addf %273, %279 : vector<4x256xf32>
    %c0_118 = arith.constant 0 : index
    %c34 = arith.constant 34 : index
    %c0_119 = arith.constant 0 : index
    %c0_120 = arith.constant 0 : index
    %281 = vector.load %arg3[%c0_118, %c34, %c0_119, %c0_120] : memref<2x36x4x1xf32, #tpu.memory_space<vmem>>, vector<1x1x4x1xf32>
    %282 = vector.shape_cast %281 : vector<1x1x4x1xf32> to vector<4x1xf32>
    %283 = vector.extract_strided_slice %266 {offsets = [2, 0], sizes = [1, 256], strides = [1, 1]} : vector<4x256xf32> to vector<1x256xf32>
    %284 = vector.broadcast %282 : vector<4x1xf32> to vector<4x256xf32>
    %285 = vector.broadcast %283 : vector<1x256xf32> to vector<4x256xf32>
    %286 = arith.mulf %284, %285 : vector<4x256xf32>
    %287 = arith.addf %280, %286 : vector<4x256xf32>
    %c0_121 = arith.constant 0 : index
    %c35 = arith.constant 35 : index
    %c0_122 = arith.constant 0 : index
    %c0_123 = arith.constant 0 : index
    %288 = vector.load %arg3[%c0_121, %c35, %c0_122, %c0_123] : memref<2x36x4x1xf32, #tpu.memory_space<vmem>>, vector<1x1x4x1xf32>
    %289 = vector.shape_cast %288 : vector<1x1x4x1xf32> to vector<4x1xf32>
    %290 = vector.extract_strided_slice %266 {offsets = [3, 0], sizes = [1, 256], strides = [1, 1]} : vector<4x256xf32> to vector<1x256xf32>
    %291 = vector.broadcast %289 : vector<4x1xf32> to vector<4x256xf32>
    %292 = vector.broadcast %290 : vector<1x256xf32> to vector<4x256xf32>
    %293 = arith.mulf %291, %292 : vector<4x256xf32>
    %294 = arith.addf %287, %293 : vector<4x256xf32>
    %c0_124 = arith.constant 0 : index
    %c0_125 = arith.constant 0 : index
    %c0_126 = arith.constant 0 : index
    %295 = vector.load %arg4[%c0_124, %c0_125, %c0_126] : memref<2x4x1xf32, #tpu.memory_space<vmem>>, vector<1x4x1xf32>
    %296 = vector.shape_cast %295 : vector<1x4x1xf32> to vector<4x1xf32>
    %297 = vector.broadcast %296 : vector<4x1xf32> to vector<4x256xf32>
    %298 = arith.addf %294, %297 : vector<4x256xf32>
    %299 = arith.addf %6, %298 : vector<4x256xf32>
    %cst_127 = arith.constant 0.000000e+00 : f32
    %300 = vector.broadcast %cst_127 : f32 to vector<4x17xf32>
    %301 = vector.extract_strided_slice %299 {offsets = [0, 0], sizes = [4, 239], strides = [1, 1]} : vector<4x256xf32> to vector<4x239xf32>
    %302 = tpu.concatenate %300, %301 in 1 : vector<4x17xf32>, vector<4x239xf32> -> vector<4x256xf32>
    %303 = vector.broadcast %1 : vector<1x256xf32> to vector<4x256xf32>
    %304 = arith.mulf %302, %303 : vector<4x256xf32>
    %c0_128 = arith.constant 0 : index
    %c0_129 = arith.constant 0 : index
    %c0_130 = arith.constant 0 : index
    %c0_131 = arith.constant 0 : index
    %305 = vector.load %arg5[%c0_128, %c0_129, %c0_130, %c0_131] : memref<2x36x8x1xf32, #tpu.memory_space<vmem>>, vector<1x1x8x1xf32>
    %306 = vector.shape_cast %305 : vector<1x1x8x1xf32> to vector<8x1xf32>
    %307 = vector.extract_strided_slice %304 {offsets = [0, 0], sizes = [1, 256], strides = [1, 1]} : vector<4x256xf32> to vector<1x256xf32>
    %308 = vector.broadcast %306 : vector<8x1xf32> to vector<8x256xf32>
    %309 = vector.broadcast %307 : vector<1x256xf32> to vector<8x256xf32>
    %310 = arith.mulf %308, %309 : vector<8x256xf32>
    %c0_132 = arith.constant 0 : index
    %c1_133 = arith.constant 1 : index
    %c0_134 = arith.constant 0 : index
    %c0_135 = arith.constant 0 : index
    %311 = vector.load %arg5[%c0_132, %c1_133, %c0_134, %c0_135] : memref<2x36x8x1xf32, #tpu.memory_space<vmem>>, vector<1x1x8x1xf32>
    %312 = vector.shape_cast %311 : vector<1x1x8x1xf32> to vector<8x1xf32>
    %313 = vector.extract_strided_slice %304 {offsets = [1, 0], sizes = [1, 256], strides = [1, 1]} : vector<4x256xf32> to vector<1x256xf32>
    %314 = vector.broadcast %312 : vector<8x1xf32> to vector<8x256xf32>
    %315 = vector.broadcast %313 : vector<1x256xf32> to vector<8x256xf32>
    %316 = arith.mulf %314, %315 : vector<8x256xf32>
    %317 = arith.addf %310, %316 : vector<8x256xf32>
    %c0_136 = arith.constant 0 : index
    %c2_137 = arith.constant 2 : index
    %c0_138 = arith.constant 0 : index
    %c0_139 = arith.constant 0 : index
    %318 = vector.load %arg5[%c0_136, %c2_137, %c0_138, %c0_139] : memref<2x36x8x1xf32, #tpu.memory_space<vmem>>, vector<1x1x8x1xf32>
    %319 = vector.shape_cast %318 : vector<1x1x8x1xf32> to vector<8x1xf32>
    %320 = vector.extract_strided_slice %304 {offsets = [2, 0], sizes = [1, 256], strides = [1, 1]} : vector<4x256xf32> to vector<1x256xf32>
    %321 = vector.broadcast %319 : vector<8x1xf32> to vector<8x256xf32>
    %322 = vector.broadcast %320 : vector<1x256xf32> to vector<8x256xf32>
    %323 = arith.mulf %321, %322 : vector<8x256xf32>
    %324 = arith.addf %317, %323 : vector<8x256xf32>
    %c0_140 = arith.constant 0 : index
    %c3_141 = arith.constant 3 : index
    %c0_142 = arith.constant 0 : index
    %c0_143 = arith.constant 0 : index
    %325 = vector.load %arg5[%c0_140, %c3_141, %c0_142, %c0_143] : memref<2x36x8x1xf32, #tpu.memory_space<vmem>>, vector<1x1x8x1xf32>
    %326 = vector.shape_cast %325 : vector<1x1x8x1xf32> to vector<8x1xf32>
    %327 = vector.extract_strided_slice %304 {offsets = [3, 0], sizes = [1, 256], strides = [1, 1]} : vector<4x256xf32> to vector<1x256xf32>
    %328 = vector.broadcast %326 : vector<8x1xf32> to vector<8x256xf32>
    %329 = vector.broadcast %327 : vector<1x256xf32> to vector<8x256xf32>
    %330 = arith.mulf %328, %329 : vector<8x256xf32>
    %331 = arith.addf %324, %330 : vector<8x256xf32>
    %cst_144 = arith.constant 0.000000e+00 : f32
    %332 = vector.broadcast %cst_144 : f32 to vector<4x16xf32>
    %333 = vector.extract_strided_slice %299 {offsets = [0, 0], sizes = [4, 240], strides = [1, 1]} : vector<4x256xf32> to vector<4x240xf32>
    %334 = tpu.concatenate %332, %333 in 1 : vector<4x16xf32>, vector<4x240xf32> -> vector<4x256xf32>
    %c0_145 = arith.constant 0 : index
    %c4_146 = arith.constant 4 : index
    %c0_147 = arith.constant 0 : index
    %c0_148 = arith.constant 0 : index
    %335 = vector.load %arg5[%c0_145, %c4_146, %c0_147, %c0_148] : memref<2x36x8x1xf32, #tpu.memory_space<vmem>>, vector<1x1x8x1xf32>
    %336 = vector.shape_cast %335 : vector<1x1x8x1xf32> to vector<8x1xf32>
    %337 = vector.extract_strided_slice %334 {offsets = [0, 0], sizes = [1, 256], strides = [1, 1]} : vector<4x256xf32> to vector<1x256xf32>
    %338 = vector.broadcast %336 : vector<8x1xf32> to vector<8x256xf32>
    %339 = vector.broadcast %337 : vector<1x256xf32> to vector<8x256xf32>
    %340 = arith.mulf %338, %339 : vector<8x256xf32>
    %341 = arith.addf %331, %340 : vector<8x256xf32>
    %c0_149 = arith.constant 0 : index
    %c5_150 = arith.constant 5 : index
    %c0_151 = arith.constant 0 : index
    %c0_152 = arith.constant 0 : index
    %342 = vector.load %arg5[%c0_149, %c5_150, %c0_151, %c0_152] : memref<2x36x8x1xf32, #tpu.memory_space<vmem>>, vector<1x1x8x1xf32>
    %343 = vector.shape_cast %342 : vector<1x1x8x1xf32> to vector<8x1xf32>
    %344 = vector.extract_strided_slice %334 {offsets = [1, 0], sizes = [1, 256], strides = [1, 1]} : vector<4x256xf32> to vector<1x256xf32>
    %345 = vector.broadcast %343 : vector<8x1xf32> to vector<8x256xf32>
    %346 = vector.broadcast %344 : vector<1x256xf32> to vector<8x256xf32>
    %347 = arith.mulf %345, %346 : vector<8x256xf32>
    %348 = arith.addf %341, %347 : vector<8x256xf32>
    %c0_153 = arith.constant 0 : index
    %c6_154 = arith.constant 6 : index
    %c0_155 = arith.constant 0 : index
    %c0_156 = arith.constant 0 : index
    %349 = vector.load %arg5[%c0_153, %c6_154, %c0_155, %c0_156] : memref<2x36x8x1xf32, #tpu.memory_space<vmem>>, vector<1x1x8x1xf32>
    %350 = vector.shape_cast %349 : vector<1x1x8x1xf32> to vector<8x1xf32>
    %351 = vector.extract_strided_slice %334 {offsets = [2, 0], sizes = [1, 256], strides = [1, 1]} : vector<4x256xf32> to vector<1x256xf32>
    %352 = vector.broadcast %350 : vector<8x1xf32> to vector<8x256xf32>
    %353 = vector.broadcast %351 : vector<1x256xf32> to vector<8x256xf32>
    %354 = arith.mulf %352, %353 : vector<8x256xf32>
    %355 = arith.addf %348, %354 : vector<8x256xf32>
    %c0_157 = arith.constant 0 : index
    %c7_158 = arith.constant 7 : index
    %c0_159 = arith.constant 0 : index
    %c0_160 = arith.constant 0 : index
    %356 = vector.load %arg5[%c0_157, %c7_158, %c0_159, %c0_160] : memref<2x36x8x1xf32, #tpu.memory_space<vmem>>, vector<1x1x8x1xf32>
    %357 = vector.shape_cast %356 : vector<1x1x8x1xf32> to vector<8x1xf32>
    %358 = vector.extract_strided_slice %334 {offsets = [3, 0], sizes = [1, 256], strides = [1, 1]} : vector<4x256xf32> to vector<1x256xf32>
    %359 = vector.broadcast %357 : vector<8x1xf32> to vector<8x256xf32>
    %360 = vector.broadcast %358 : vector<1x256xf32> to vector<8x256xf32>
    %361 = arith.mulf %359, %360 : vector<8x256xf32>
    %362 = arith.addf %355, %361 : vector<8x256xf32>
    %cst_161 = arith.constant 0.000000e+00 : f32
    %363 = vector.broadcast %cst_161 : f32 to vector<4x15xf32>
    %364 = vector.extract_strided_slice %299 {offsets = [0, 0], sizes = [4, 241], strides = [1, 1]} : vector<4x256xf32> to vector<4x241xf32>
    %365 = tpu.concatenate %363, %364 in 1 : vector<4x15xf32>, vector<4x241xf32> -> vector<4x256xf32>
    %366 = vector.broadcast %3 : vector<1x256xf32> to vector<4x256xf32>
    %367 = arith.mulf %365, %366 : vector<4x256xf32>
    %c0_162 = arith.constant 0 : index
    %c8_163 = arith.constant 8 : index
    %c0_164 = arith.constant 0 : index
    %c0_165 = arith.constant 0 : index
    %368 = vector.load %arg5[%c0_162, %c8_163, %c0_164, %c0_165] : memref<2x36x8x1xf32, #tpu.memory_space<vmem>>, vector<1x1x8x1xf32>
    %369 = vector.shape_cast %368 : vector<1x1x8x1xf32> to vector<8x1xf32>
    %370 = vector.extract_strided_slice %367 {offsets = [0, 0], sizes = [1, 256], strides = [1, 1]} : vector<4x256xf32> to vector<1x256xf32>
    %371 = vector.broadcast %369 : vector<8x1xf32> to vector<8x256xf32>
    %372 = vector.broadcast %370 : vector<1x256xf32> to vector<8x256xf32>
    %373 = arith.mulf %371, %372 : vector<8x256xf32>
    %374 = arith.addf %362, %373 : vector<8x256xf32>
    %c0_166 = arith.constant 0 : index
    %c9_167 = arith.constant 9 : index
    %c0_168 = arith.constant 0 : index
    %c0_169 = arith.constant 0 : index
    %375 = vector.load %arg5[%c0_166, %c9_167, %c0_168, %c0_169] : memref<2x36x8x1xf32, #tpu.memory_space<vmem>>, vector<1x1x8x1xf32>
    %376 = vector.shape_cast %375 : vector<1x1x8x1xf32> to vector<8x1xf32>
    %377 = vector.extract_strided_slice %367 {offsets = [1, 0], sizes = [1, 256], strides = [1, 1]} : vector<4x256xf32> to vector<1x256xf32>
    %378 = vector.broadcast %376 : vector<8x1xf32> to vector<8x256xf32>
    %379 = vector.broadcast %377 : vector<1x256xf32> to vector<8x256xf32>
    %380 = arith.mulf %378, %379 : vector<8x256xf32>
    %381 = arith.addf %374, %380 : vector<8x256xf32>
    %c0_170 = arith.constant 0 : index
    %c10_171 = arith.constant 10 : index
    %c0_172 = arith.constant 0 : index
    %c0_173 = arith.constant 0 : index
    %382 = vector.load %arg5[%c0_170, %c10_171, %c0_172, %c0_173] : memref<2x36x8x1xf32, #tpu.memory_space<vmem>>, vector<1x1x8x1xf32>
    %383 = vector.shape_cast %382 : vector<1x1x8x1xf32> to vector<8x1xf32>
    %384 = vector.extract_strided_slice %367 {offsets = [2, 0], sizes = [1, 256], strides = [1, 1]} : vector<4x256xf32> to vector<1x256xf32>
    %385 = vector.broadcast %383 : vector<8x1xf32> to vector<8x256xf32>
    %386 = vector.broadcast %384 : vector<1x256xf32> to vector<8x256xf32>
    %387 = arith.mulf %385, %386 : vector<8x256xf32>
    %388 = arith.addf %381, %387 : vector<8x256xf32>
    %c0_174 = arith.constant 0 : index
    %c11_175 = arith.constant 11 : index
    %c0_176 = arith.constant 0 : index
    %c0_177 = arith.constant 0 : index
    %389 = vector.load %arg5[%c0_174, %c11_175, %c0_176, %c0_177] : memref<2x36x8x1xf32, #tpu.memory_space<vmem>>, vector<1x1x8x1xf32>
    %390 = vector.shape_cast %389 : vector<1x1x8x1xf32> to vector<8x1xf32>
    %391 = vector.extract_strided_slice %367 {offsets = [3, 0], sizes = [1, 256], strides = [1, 1]} : vector<4x256xf32> to vector<1x256xf32>
    %392 = vector.broadcast %390 : vector<8x1xf32> to vector<8x256xf32>
    %393 = vector.broadcast %391 : vector<1x256xf32> to vector<8x256xf32>
    %394 = arith.mulf %392, %393 : vector<8x256xf32>
    %395 = arith.addf %388, %394 : vector<8x256xf32>
    %cst_178 = arith.constant 0.000000e+00 : f32
    %396 = vector.broadcast %cst_178 : f32 to vector<4x1xf32>
    %397 = vector.extract_strided_slice %299 {offsets = [0, 0], sizes = [4, 255], strides = [1, 1]} : vector<4x256xf32> to vector<4x255xf32>
    %398 = tpu.concatenate %396, %397 in 1 : vector<4x1xf32>, vector<4x255xf32> -> vector<4x256xf32>
    %399 = vector.broadcast %1 : vector<1x256xf32> to vector<4x256xf32>
    %400 = arith.mulf %398, %399 : vector<4x256xf32>
    %c0_179 = arith.constant 0 : index
    %c12_180 = arith.constant 12 : index
    %c0_181 = arith.constant 0 : index
    %c0_182 = arith.constant 0 : index
    %401 = vector.load %arg5[%c0_179, %c12_180, %c0_181, %c0_182] : memref<2x36x8x1xf32, #tpu.memory_space<vmem>>, vector<1x1x8x1xf32>
    %402 = vector.shape_cast %401 : vector<1x1x8x1xf32> to vector<8x1xf32>
    %403 = vector.extract_strided_slice %400 {offsets = [0, 0], sizes = [1, 256], strides = [1, 1]} : vector<4x256xf32> to vector<1x256xf32>
    %404 = vector.broadcast %402 : vector<8x1xf32> to vector<8x256xf32>
    %405 = vector.broadcast %403 : vector<1x256xf32> to vector<8x256xf32>
    %406 = arith.mulf %404, %405 : vector<8x256xf32>
    %407 = arith.addf %395, %406 : vector<8x256xf32>
    %c0_183 = arith.constant 0 : index
    %c13_184 = arith.constant 13 : index
    %c0_185 = arith.constant 0 : index
    %c0_186 = arith.constant 0 : index
    %408 = vector.load %arg5[%c0_183, %c13_184, %c0_185, %c0_186] : memref<2x36x8x1xf32, #tpu.memory_space<vmem>>, vector<1x1x8x1xf32>
    %409 = vector.shape_cast %408 : vector<1x1x8x1xf32> to vector<8x1xf32>
    %410 = vector.extract_strided_slice %400 {offsets = [1, 0], sizes = [1, 256], strides = [1, 1]} : vector<4x256xf32> to vector<1x256xf32>
    %411 = vector.broadcast %409 : vector<8x1xf32> to vector<8x256xf32>
    %412 = vector.broadcast %410 : vector<1x256xf32> to vector<8x256xf32>
    %413 = arith.mulf %411, %412 : vector<8x256xf32>
    %414 = arith.addf %407, %413 : vector<8x256xf32>
    %c0_187 = arith.constant 0 : index
    %c14_188 = arith.constant 14 : index
    %c0_189 = arith.constant 0 : index
    %c0_190 = arith.constant 0 : index
    %415 = vector.load %arg5[%c0_187, %c14_188, %c0_189, %c0_190] : memref<2x36x8x1xf32, #tpu.memory_space<vmem>>, vector<1x1x8x1xf32>
    %416 = vector.shape_cast %415 : vector<1x1x8x1xf32> to vector<8x1xf32>
    %417 = vector.extract_strided_slice %400 {offsets = [2, 0], sizes = [1, 256], strides = [1, 1]} : vector<4x256xf32> to vector<1x256xf32>
    %418 = vector.broadcast %416 : vector<8x1xf32> to vector<8x256xf32>
    %419 = vector.broadcast %417 : vector<1x256xf32> to vector<8x256xf32>
    %420 = arith.mulf %418, %419 : vector<8x256xf32>
    %421 = arith.addf %414, %420 : vector<8x256xf32>
    %c0_191 = arith.constant 0 : index
    %c15_192 = arith.constant 15 : index
    %c0_193 = arith.constant 0 : index
    %c0_194 = arith.constant 0 : index
    %422 = vector.load %arg5[%c0_191, %c15_192, %c0_193, %c0_194] : memref<2x36x8x1xf32, #tpu.memory_space<vmem>>, vector<1x1x8x1xf32>
    %423 = vector.shape_cast %422 : vector<1x1x8x1xf32> to vector<8x1xf32>
    %424 = vector.extract_strided_slice %400 {offsets = [3, 0], sizes = [1, 256], strides = [1, 1]} : vector<4x256xf32> to vector<1x256xf32>
    %425 = vector.broadcast %423 : vector<8x1xf32> to vector<8x256xf32>
    %426 = vector.broadcast %424 : vector<1x256xf32> to vector<8x256xf32>
    %427 = arith.mulf %425, %426 : vector<8x256xf32>
    %428 = arith.addf %421, %427 : vector<8x256xf32>
    %c0_195 = arith.constant 0 : index
    %c16_196 = arith.constant 16 : index
    %c0_197 = arith.constant 0 : index
    %c0_198 = arith.constant 0 : index
    %429 = vector.load %arg5[%c0_195, %c16_196, %c0_197, %c0_198] : memref<2x36x8x1xf32, #tpu.memory_space<vmem>>, vector<1x1x8x1xf32>
    %430 = vector.shape_cast %429 : vector<1x1x8x1xf32> to vector<8x1xf32>
    %431 = vector.extract_strided_slice %299 {offsets = [0, 0], sizes = [1, 256], strides = [1, 1]} : vector<4x256xf32> to vector<1x256xf32>
    %432 = vector.broadcast %430 : vector<8x1xf32> to vector<8x256xf32>
    %433 = vector.broadcast %431 : vector<1x256xf32> to vector<8x256xf32>
    %434 = arith.mulf %432, %433 : vector<8x256xf32>
    %435 = arith.addf %428, %434 : vector<8x256xf32>
    %c0_199 = arith.constant 0 : index
    %c17_200 = arith.constant 17 : index
    %c0_201 = arith.constant 0 : index
    %c0_202 = arith.constant 0 : index
    %436 = vector.load %arg5[%c0_199, %c17_200, %c0_201, %c0_202] : memref<2x36x8x1xf32, #tpu.memory_space<vmem>>, vector<1x1x8x1xf32>
    %437 = vector.shape_cast %436 : vector<1x1x8x1xf32> to vector<8x1xf32>
    %438 = vector.extract_strided_slice %299 {offsets = [1, 0], sizes = [1, 256], strides = [1, 1]} : vector<4x256xf32> to vector<1x256xf32>
    %439 = vector.broadcast %437 : vector<8x1xf32> to vector<8x256xf32>
    %440 = vector.broadcast %438 : vector<1x256xf32> to vector<8x256xf32>
    %441 = arith.mulf %439, %440 : vector<8x256xf32>
    %442 = arith.addf %435, %441 : vector<8x256xf32>
    %c0_203 = arith.constant 0 : index
    %c18_204 = arith.constant 18 : index
    %c0_205 = arith.constant 0 : index
    %c0_206 = arith.constant 0 : index
    %443 = vector.load %arg5[%c0_203, %c18_204, %c0_205, %c0_206] : memref<2x36x8x1xf32, #tpu.memory_space<vmem>>, vector<1x1x8x1xf32>
    %444 = vector.shape_cast %443 : vector<1x1x8x1xf32> to vector<8x1xf32>
    %445 = vector.extract_strided_slice %299 {offsets = [2, 0], sizes = [1, 256], strides = [1, 1]} : vector<4x256xf32> to vector<1x256xf32>
    %446 = vector.broadcast %444 : vector<8x1xf32> to vector<8x256xf32>
    %447 = vector.broadcast %445 : vector<1x256xf32> to vector<8x256xf32>
    %448 = arith.mulf %446, %447 : vector<8x256xf32>
    %449 = arith.addf %442, %448 : vector<8x256xf32>
    %c0_207 = arith.constant 0 : index
    %c19_208 = arith.constant 19 : index
    %c0_209 = arith.constant 0 : index
    %c0_210 = arith.constant 0 : index
    %450 = vector.load %arg5[%c0_207, %c19_208, %c0_209, %c0_210] : memref<2x36x8x1xf32, #tpu.memory_space<vmem>>, vector<1x1x8x1xf32>
    %451 = vector.shape_cast %450 : vector<1x1x8x1xf32> to vector<8x1xf32>
    %452 = vector.extract_strided_slice %299 {offsets = [3, 0], sizes = [1, 256], strides = [1, 1]} : vector<4x256xf32> to vector<1x256xf32>
    %453 = vector.broadcast %451 : vector<8x1xf32> to vector<8x256xf32>
    %454 = vector.broadcast %452 : vector<1x256xf32> to vector<8x256xf32>
    %455 = arith.mulf %453, %454 : vector<8x256xf32>
    %456 = arith.addf %449, %455 : vector<8x256xf32>
    %cst_211 = arith.constant 0.000000e+00 : f32
    %457 = vector.broadcast %cst_211 : f32 to vector<4x1xf32>
    %458 = vector.extract_strided_slice %299 {offsets = [0, 1], sizes = [4, 255], strides = [1, 1]} : vector<4x256xf32> to vector<4x255xf32>
    %459 = tpu.concatenate %458, %457 in 1 : vector<4x255xf32>, vector<4x1xf32> -> vector<4x256xf32>
    %460 = vector.broadcast %3 : vector<1x256xf32> to vector<4x256xf32>
    %461 = arith.mulf %459, %460 : vector<4x256xf32>
    %c0_212 = arith.constant 0 : index
    %c20_213 = arith.constant 20 : index
    %c0_214 = arith.constant 0 : index
    %c0_215 = arith.constant 0 : index
    %462 = vector.load %arg5[%c0_212, %c20_213, %c0_214, %c0_215] : memref<2x36x8x1xf32, #tpu.memory_space<vmem>>, vector<1x1x8x1xf32>
    %463 = vector.shape_cast %462 : vector<1x1x8x1xf32> to vector<8x1xf32>
    %464 = vector.extract_strided_slice %461 {offsets = [0, 0], sizes = [1, 256], strides = [1, 1]} : vector<4x256xf32> to vector<1x256xf32>
    %465 = vector.broadcast %463 : vector<8x1xf32> to vector<8x256xf32>
    %466 = vector.broadcast %464 : vector<1x256xf32> to vector<8x256xf32>
    %467 = arith.mulf %465, %466 : vector<8x256xf32>
    %468 = arith.addf %456, %467 : vector<8x256xf32>
    %c0_216 = arith.constant 0 : index
    %c21_217 = arith.constant 21 : index
    %c0_218 = arith.constant 0 : index
    %c0_219 = arith.constant 0 : index
    %469 = vector.load %arg5[%c0_216, %c21_217, %c0_218, %c0_219] : memref<2x36x8x1xf32, #tpu.memory_space<vmem>>, vector<1x1x8x1xf32>
    %470 = vector.shape_cast %469 : vector<1x1x8x1xf32> to vector<8x1xf32>
    %471 = vector.extract_strided_slice %461 {offsets = [1, 0], sizes = [1, 256], strides = [1, 1]} : vector<4x256xf32> to vector<1x256xf32>
    %472 = vector.broadcast %470 : vector<8x1xf32> to vector<8x256xf32>
    %473 = vector.broadcast %471 : vector<1x256xf32> to vector<8x256xf32>
    %474 = arith.mulf %472, %473 : vector<8x256xf32>
    %475 = arith.addf %468, %474 : vector<8x256xf32>
    %c0_220 = arith.constant 0 : index
    %c22_221 = arith.constant 22 : index
    %c0_222 = arith.constant 0 : index
    %c0_223 = arith.constant 0 : index
    %476 = vector.load %arg5[%c0_220, %c22_221, %c0_222, %c0_223] : memref<2x36x8x1xf32, #tpu.memory_space<vmem>>, vector<1x1x8x1xf32>
    %477 = vector.shape_cast %476 : vector<1x1x8x1xf32> to vector<8x1xf32>
    %478 = vector.extract_strided_slice %461 {offsets = [2, 0], sizes = [1, 256], strides = [1, 1]} : vector<4x256xf32> to vector<1x256xf32>
    %479 = vector.broadcast %477 : vector<8x1xf32> to vector<8x256xf32>
    %480 = vector.broadcast %478 : vector<1x256xf32> to vector<8x256xf32>
    %481 = arith.mulf %479, %480 : vector<8x256xf32>
    %482 = arith.addf %475, %481 : vector<8x256xf32>
    %c0_224 = arith.constant 0 : index
    %c23_225 = arith.constant 23 : index
    %c0_226 = arith.constant 0 : index
    %c0_227 = arith.constant 0 : index
    %483 = vector.load %arg5[%c0_224, %c23_225, %c0_226, %c0_227] : memref<2x36x8x1xf32, #tpu.memory_space<vmem>>, vector<1x1x8x1xf32>
    %484 = vector.shape_cast %483 : vector<1x1x8x1xf32> to vector<8x1xf32>
    %485 = vector.extract_strided_slice %461 {offsets = [3, 0], sizes = [1, 256], strides = [1, 1]} : vector<4x256xf32> to vector<1x256xf32>
    %486 = vector.broadcast %484 : vector<8x1xf32> to vector<8x256xf32>
    %487 = vector.broadcast %485 : vector<1x256xf32> to vector<8x256xf32>
    %488 = arith.mulf %486, %487 : vector<8x256xf32>
    %489 = arith.addf %482, %488 : vector<8x256xf32>
    %cst_228 = arith.constant 0.000000e+00 : f32
    %490 = vector.broadcast %cst_228 : f32 to vector<4x15xf32>
    %491 = vector.extract_strided_slice %299 {offsets = [0, 15], sizes = [4, 241], strides = [1, 1]} : vector<4x256xf32> to vector<4x241xf32>
    %492 = tpu.concatenate %491, %490 in 1 : vector<4x241xf32>, vector<4x15xf32> -> vector<4x256xf32>
    %493 = vector.broadcast %1 : vector<1x256xf32> to vector<4x256xf32>
    %494 = arith.mulf %492, %493 : vector<4x256xf32>
    %c0_229 = arith.constant 0 : index
    %c24_230 = arith.constant 24 : index
    %c0_231 = arith.constant 0 : index
    %c0_232 = arith.constant 0 : index
    %495 = vector.load %arg5[%c0_229, %c24_230, %c0_231, %c0_232] : memref<2x36x8x1xf32, #tpu.memory_space<vmem>>, vector<1x1x8x1xf32>
    %496 = vector.shape_cast %495 : vector<1x1x8x1xf32> to vector<8x1xf32>
    %497 = vector.extract_strided_slice %494 {offsets = [0, 0], sizes = [1, 256], strides = [1, 1]} : vector<4x256xf32> to vector<1x256xf32>
    %498 = vector.broadcast %496 : vector<8x1xf32> to vector<8x256xf32>
    %499 = vector.broadcast %497 : vector<1x256xf32> to vector<8x256xf32>
    %500 = arith.mulf %498, %499 : vector<8x256xf32>
    %501 = arith.addf %489, %500 : vector<8x256xf32>
    %c0_233 = arith.constant 0 : index
    %c25_234 = arith.constant 25 : index
    %c0_235 = arith.constant 0 : index
    %c0_236 = arith.constant 0 : index
    %502 = vector.load %arg5[%c0_233, %c25_234, %c0_235, %c0_236] : memref<2x36x8x1xf32, #tpu.memory_space<vmem>>, vector<1x1x8x1xf32>
    %503 = vector.shape_cast %502 : vector<1x1x8x1xf32> to vector<8x1xf32>
    %504 = vector.extract_strided_slice %494 {offsets = [1, 0], sizes = [1, 256], strides = [1, 1]} : vector<4x256xf32> to vector<1x256xf32>
    %505 = vector.broadcast %503 : vector<8x1xf32> to vector<8x256xf32>
    %506 = vector.broadcast %504 : vector<1x256xf32> to vector<8x256xf32>
    %507 = arith.mulf %505, %506 : vector<8x256xf32>
    %508 = arith.addf %501, %507 : vector<8x256xf32>
    %c0_237 = arith.constant 0 : index
    %c26_238 = arith.constant 26 : index
    %c0_239 = arith.constant 0 : index
    %c0_240 = arith.constant 0 : index
    %509 = vector.load %arg5[%c0_237, %c26_238, %c0_239, %c0_240] : memref<2x36x8x1xf32, #tpu.memory_space<vmem>>, vector<1x1x8x1xf32>
    %510 = vector.shape_cast %509 : vector<1x1x8x1xf32> to vector<8x1xf32>
    %511 = vector.extract_strided_slice %494 {offsets = [2, 0], sizes = [1, 256], strides = [1, 1]} : vector<4x256xf32> to vector<1x256xf32>
    %512 = vector.broadcast %510 : vector<8x1xf32> to vector<8x256xf32>
    %513 = vector.broadcast %511 : vector<1x256xf32> to vector<8x256xf32>
    %514 = arith.mulf %512, %513 : vector<8x256xf32>
    %515 = arith.addf %508, %514 : vector<8x256xf32>
    %c0_241 = arith.constant 0 : index
    %c27_242 = arith.constant 27 : index
    %c0_243 = arith.constant 0 : index
    %c0_244 = arith.constant 0 : index
    %516 = vector.load %arg5[%c0_241, %c27_242, %c0_243, %c0_244] : memref<2x36x8x1xf32, #tpu.memory_space<vmem>>, vector<1x1x8x1xf32>
    %517 = vector.shape_cast %516 : vector<1x1x8x1xf32> to vector<8x1xf32>
    %518 = vector.extract_strided_slice %494 {offsets = [3, 0], sizes = [1, 256], strides = [1, 1]} : vector<4x256xf32> to vector<1x256xf32>
    %519 = vector.broadcast %517 : vector<8x1xf32> to vector<8x256xf32>
    %520 = vector.broadcast %518 : vector<1x256xf32> to vector<8x256xf32>
    %521 = arith.mulf %519, %520 : vector<8x256xf32>
    %522 = arith.addf %515, %521 : vector<8x256xf32>
    %cst_245 = arith.constant 0.000000e+00 : f32
    %523 = vector.broadcast %cst_245 : f32 to vector<4x16xf32>
    %524 = vector.extract_strided_slice %299 {offsets = [0, 16], sizes = [4, 240], strides = [1, 1]} : vector<4x256xf32> to vector<4x240xf32>
    %525 = tpu.concatenate %524, %523 in 1 : vector<4x240xf32>, vector<4x16xf32> -> vector<4x256xf32>
    %c0_246 = arith.constant 0 : index
    %c28_247 = arith.constant 28 : index
    %c0_248 = arith.constant 0 : index
    %c0_249 = arith.constant 0 : index
    %526 = vector.load %arg5[%c0_246, %c28_247, %c0_248, %c0_249] : memref<2x36x8x1xf32, #tpu.memory_space<vmem>>, vector<1x1x8x1xf32>
    %527 = vector.shape_cast %526 : vector<1x1x8x1xf32> to vector<8x1xf32>
    %528 = vector.extract_strided_slice %525 {offsets = [0, 0], sizes = [1, 256], strides = [1, 1]} : vector<4x256xf32> to vector<1x256xf32>
    %529 = vector.broadcast %527 : vector<8x1xf32> to vector<8x256xf32>
    %530 = vector.broadcast %528 : vector<1x256xf32> to vector<8x256xf32>
    %531 = arith.mulf %529, %530 : vector<8x256xf32>
    %532 = arith.addf %522, %531 : vector<8x256xf32>
    %c0_250 = arith.constant 0 : index
    %c29_251 = arith.constant 29 : index
    %c0_252 = arith.constant 0 : index
    %c0_253 = arith.constant 0 : index
    %533 = vector.load %arg5[%c0_250, %c29_251, %c0_252, %c0_253] : memref<2x36x8x1xf32, #tpu.memory_space<vmem>>, vector<1x1x8x1xf32>
    %534 = vector.shape_cast %533 : vector<1x1x8x1xf32> to vector<8x1xf32>
    %535 = vector.extract_strided_slice %525 {offsets = [1, 0], sizes = [1, 256], strides = [1, 1]} : vector<4x256xf32> to vector<1x256xf32>
    %536 = vector.broadcast %534 : vector<8x1xf32> to vector<8x256xf32>
    %537 = vector.broadcast %535 : vector<1x256xf32> to vector<8x256xf32>
    %538 = arith.mulf %536, %537 : vector<8x256xf32>
    %539 = arith.addf %532, %538 : vector<8x256xf32>
    %c0_254 = arith.constant 0 : index
    %c30_255 = arith.constant 30 : index
    %c0_256 = arith.constant 0 : index
    %c0_257 = arith.constant 0 : index
    %540 = vector.load %arg5[%c0_254, %c30_255, %c0_256, %c0_257] : memref<2x36x8x1xf32, #tpu.memory_space<vmem>>, vector<1x1x8x1xf32>
    %541 = vector.shape_cast %540 : vector<1x1x8x1xf32> to vector<8x1xf32>
    %542 = vector.extract_strided_slice %525 {offsets = [2, 0], sizes = [1, 256], strides = [1, 1]} : vector<4x256xf32> to vector<1x256xf32>
    %543 = vector.broadcast %541 : vector<8x1xf32> to vector<8x256xf32>
    %544 = vector.broadcast %542 : vector<1x256xf32> to vector<8x256xf32>
    %545 = arith.mulf %543, %544 : vector<8x256xf32>
    %546 = arith.addf %539, %545 : vector<8x256xf32>
    %c0_258 = arith.constant 0 : index
    %c31_259 = arith.constant 31 : index
    %c0_260 = arith.constant 0 : index
    %c0_261 = arith.constant 0 : index
    %547 = vector.load %arg5[%c0_258, %c31_259, %c0_260, %c0_261] : memref<2x36x8x1xf32, #tpu.memory_space<vmem>>, vector<1x1x8x1xf32>
    %548 = vector.shape_cast %547 : vector<1x1x8x1xf32> to vector<8x1xf32>
    %549 = vector.extract_strided_slice %525 {offsets = [3, 0], sizes = [1, 256], strides = [1, 1]} : vector<4x256xf32> to vector<1x256xf32>
    %550 = vector.broadcast %548 : vector<8x1xf32> to vector<8x256xf32>
    %551 = vector.broadcast %549 : vector<1x256xf32> to vector<8x256xf32>
    %552 = arith.mulf %550, %551 : vector<8x256xf32>
    %553 = arith.addf %546, %552 : vector<8x256xf32>
    %cst_262 = arith.constant 0.000000e+00 : f32
    %554 = vector.broadcast %cst_262 : f32 to vector<4x17xf32>
    %555 = vector.extract_strided_slice %299 {offsets = [0, 17], sizes = [4, 239], strides = [1, 1]} : vector<4x256xf32> to vector<4x239xf32>
    %556 = tpu.concatenate %555, %554 in 1 : vector<4x239xf32>, vector<4x17xf32> -> vector<4x256xf32>
    %557 = vector.broadcast %3 : vector<1x256xf32> to vector<4x256xf32>
    %558 = arith.mulf %556, %557 : vector<4x256xf32>
    %c0_263 = arith.constant 0 : index
    %c32_264 = arith.constant 32 : index
    %c0_265 = arith.constant 0 : index
    %c0_266 = arith.constant 0 : index
    %559 = vector.load %arg5[%c0_263, %c32_264, %c0_265, %c0_266] : memref<2x36x8x1xf32, #tpu.memory_space<vmem>>, vector<1x1x8x1xf32>
    %560 = vector.shape_cast %559 : vector<1x1x8x1xf32> to vector<8x1xf32>
    %561 = vector.extract_strided_slice %558 {offsets = [0, 0], sizes = [1, 256], strides = [1, 1]} : vector<4x256xf32> to vector<1x256xf32>
    %562 = vector.broadcast %560 : vector<8x1xf32> to vector<8x256xf32>
    %563 = vector.broadcast %561 : vector<1x256xf32> to vector<8x256xf32>
    %564 = arith.mulf %562, %563 : vector<8x256xf32>
    %565 = arith.addf %553, %564 : vector<8x256xf32>
    %c0_267 = arith.constant 0 : index
    %c33_268 = arith.constant 33 : index
    %c0_269 = arith.constant 0 : index
    %c0_270 = arith.constant 0 : index
    %566 = vector.load %arg5[%c0_267, %c33_268, %c0_269, %c0_270] : memref<2x36x8x1xf32, #tpu.memory_space<vmem>>, vector<1x1x8x1xf32>
    %567 = vector.shape_cast %566 : vector<1x1x8x1xf32> to vector<8x1xf32>
    %568 = vector.extract_strided_slice %558 {offsets = [1, 0], sizes = [1, 256], strides = [1, 1]} : vector<4x256xf32> to vector<1x256xf32>
    %569 = vector.broadcast %567 : vector<8x1xf32> to vector<8x256xf32>
    %570 = vector.broadcast %568 : vector<1x256xf32> to vector<8x256xf32>
    %571 = arith.mulf %569, %570 : vector<8x256xf32>
    %572 = arith.addf %565, %571 : vector<8x256xf32>
    %c0_271 = arith.constant 0 : index
    %c34_272 = arith.constant 34 : index
    %c0_273 = arith.constant 0 : index
    %c0_274 = arith.constant 0 : index
    %573 = vector.load %arg5[%c0_271, %c34_272, %c0_273, %c0_274] : memref<2x36x8x1xf32, #tpu.memory_space<vmem>>, vector<1x1x8x1xf32>
    %574 = vector.shape_cast %573 : vector<1x1x8x1xf32> to vector<8x1xf32>
    %575 = vector.extract_strided_slice %558 {offsets = [2, 0], sizes = [1, 256], strides = [1, 1]} : vector<4x256xf32> to vector<1x256xf32>
    %576 = vector.broadcast %574 : vector<8x1xf32> to vector<8x256xf32>
    %577 = vector.broadcast %575 : vector<1x256xf32> to vector<8x256xf32>
    %578 = arith.mulf %576, %577 : vector<8x256xf32>
    %579 = arith.addf %572, %578 : vector<8x256xf32>
    %c0_275 = arith.constant 0 : index
    %c35_276 = arith.constant 35 : index
    %c0_277 = arith.constant 0 : index
    %c0_278 = arith.constant 0 : index
    %580 = vector.load %arg5[%c0_275, %c35_276, %c0_277, %c0_278] : memref<2x36x8x1xf32, #tpu.memory_space<vmem>>, vector<1x1x8x1xf32>
    %581 = vector.shape_cast %580 : vector<1x1x8x1xf32> to vector<8x1xf32>
    %582 = vector.extract_strided_slice %558 {offsets = [3, 0], sizes = [1, 256], strides = [1, 1]} : vector<4x256xf32> to vector<1x256xf32>
    %583 = vector.broadcast %581 : vector<8x1xf32> to vector<8x256xf32>
    %584 = vector.broadcast %582 : vector<1x256xf32> to vector<8x256xf32>
    %585 = arith.mulf %583, %584 : vector<8x256xf32>
    %586 = arith.addf %579, %585 : vector<8x256xf32>
    %c0_279 = arith.constant 0 : index
    %c0_280 = arith.constant 0 : index
    %c0_281 = arith.constant 0 : index
    %587 = vector.load %arg6[%c0_279, %c0_280, %c0_281] : memref<2x8x1xf32, #tpu.memory_space<vmem>>, vector<1x8x1xf32>
    %588 = vector.shape_cast %587 : vector<1x8x1xf32> to vector<8x1xf32>
    %589 = vector.broadcast %588 : vector<8x1xf32> to vector<8x256xf32>
    %590 = arith.addf %586, %589 : vector<8x256xf32>
    %591 = vector.extract_strided_slice %590 {offsets = [0, 0], sizes = [4, 256], strides = [1, 1]} : vector<8x256xf32> to vector<4x256xf32>
    %cst_282 = arith.constant 5.000000e-01 : f32
    %592 = vector.broadcast %cst_282 : f32 to vector<4x256xf32>
    %593 = arith.mulf %592, %591 : vector<4x256xf32>
    %594 = math.tanh %593 : vector<4x256xf32>
    %cst_283 = arith.constant 1.000000e+00 : f32
    %595 = vector.broadcast %cst_283 : f32 to vector<4x256xf32>
    %596 = arith.mulf %595, %594 : vector<4x256xf32>
    %597 = math.exp %596 : vector<4x256xf32>
    %598 = arith.mulf %7, %597 : vector<4x256xf32>
    %599 = vector.extract_strided_slice %590 {offsets = [4, 0], sizes = [4, 256], strides = [1, 1]} : vector<8x256xf32> to vector<4x256xf32>
    %600 = arith.addf %598, %599 : vector<4x256xf32>
    %cst_284 = arith.constant 0.000000e+00 : f32
    %601 = vector.broadcast %cst_284 : f32 to vector<4x17xf32>
    %602 = vector.extract_strided_slice %600 {offsets = [0, 0], sizes = [4, 239], strides = [1, 1]} : vector<4x256xf32> to vector<4x239xf32>
    %603 = tpu.concatenate %601, %602 in 1 : vector<4x17xf32>, vector<4x239xf32> -> vector<4x256xf32>
    %604 = vector.broadcast %1 : vector<1x256xf32> to vector<4x256xf32>
    %605 = arith.mulf %603, %604 : vector<4x256xf32>
    %c1_285 = arith.constant 1 : index
    %c0_286 = arith.constant 0 : index
    %c0_287 = arith.constant 0 : index
    %c0_288 = arith.constant 0 : index
    %606 = vector.load %arg3[%c1_285, %c0_286, %c0_287, %c0_288] : memref<2x36x4x1xf32, #tpu.memory_space<vmem>>, vector<1x1x4x1xf32>
    %607 = vector.shape_cast %606 : vector<1x1x4x1xf32> to vector<4x1xf32>
    %608 = vector.extract_strided_slice %605 {offsets = [0, 0], sizes = [1, 256], strides = [1, 1]} : vector<4x256xf32> to vector<1x256xf32>
    %609 = vector.broadcast %607 : vector<4x1xf32> to vector<4x256xf32>
    %610 = vector.broadcast %608 : vector<1x256xf32> to vector<4x256xf32>
    %611 = arith.mulf %609, %610 : vector<4x256xf32>
    %c1_289 = arith.constant 1 : index
    %c1_290 = arith.constant 1 : index
    %c0_291 = arith.constant 0 : index
    %c0_292 = arith.constant 0 : index
    %612 = vector.load %arg3[%c1_289, %c1_290, %c0_291, %c0_292] : memref<2x36x4x1xf32, #tpu.memory_space<vmem>>, vector<1x1x4x1xf32>
    %613 = vector.shape_cast %612 : vector<1x1x4x1xf32> to vector<4x1xf32>
    %614 = vector.extract_strided_slice %605 {offsets = [1, 0], sizes = [1, 256], strides = [1, 1]} : vector<4x256xf32> to vector<1x256xf32>
    %615 = vector.broadcast %613 : vector<4x1xf32> to vector<4x256xf32>
    %616 = vector.broadcast %614 : vector<1x256xf32> to vector<4x256xf32>
    %617 = arith.mulf %615, %616 : vector<4x256xf32>
    %618 = arith.addf %611, %617 : vector<4x256xf32>
    %c1_293 = arith.constant 1 : index
    %c2_294 = arith.constant 2 : index
    %c0_295 = arith.constant 0 : index
    %c0_296 = arith.constant 0 : index
    %619 = vector.load %arg3[%c1_293, %c2_294, %c0_295, %c0_296] : memref<2x36x4x1xf32, #tpu.memory_space<vmem>>, vector<1x1x4x1xf32>
    %620 = vector.shape_cast %619 : vector<1x1x4x1xf32> to vector<4x1xf32>
    %621 = vector.extract_strided_slice %605 {offsets = [2, 0], sizes = [1, 256], strides = [1, 1]} : vector<4x256xf32> to vector<1x256xf32>
    %622 = vector.broadcast %620 : vector<4x1xf32> to vector<4x256xf32>
    %623 = vector.broadcast %621 : vector<1x256xf32> to vector<4x256xf32>
    %624 = arith.mulf %622, %623 : vector<4x256xf32>
    %625 = arith.addf %618, %624 : vector<4x256xf32>
    %c1_297 = arith.constant 1 : index
    %c3_298 = arith.constant 3 : index
    %c0_299 = arith.constant 0 : index
    %c0_300 = arith.constant 0 : index
    %626 = vector.load %arg3[%c1_297, %c3_298, %c0_299, %c0_300] : memref<2x36x4x1xf32, #tpu.memory_space<vmem>>, vector<1x1x4x1xf32>
    %627 = vector.shape_cast %626 : vector<1x1x4x1xf32> to vector<4x1xf32>
    %628 = vector.extract_strided_slice %605 {offsets = [3, 0], sizes = [1, 256], strides = [1, 1]} : vector<4x256xf32> to vector<1x256xf32>
    %629 = vector.broadcast %627 : vector<4x1xf32> to vector<4x256xf32>
    %630 = vector.broadcast %628 : vector<1x256xf32> to vector<4x256xf32>
    %631 = arith.mulf %629, %630 : vector<4x256xf32>
    %632 = arith.addf %625, %631 : vector<4x256xf32>
    %cst_301 = arith.constant 0.000000e+00 : f32
    %633 = vector.broadcast %cst_301 : f32 to vector<4x16xf32>
    %634 = vector.extract_strided_slice %600 {offsets = [0, 0], sizes = [4, 240], strides = [1, 1]} : vector<4x256xf32> to vector<4x240xf32>
    %635 = tpu.concatenate %633, %634 in 1 : vector<4x16xf32>, vector<4x240xf32> -> vector<4x256xf32>
    %c1_302 = arith.constant 1 : index
    %c4_303 = arith.constant 4 : index
    %c0_304 = arith.constant 0 : index
    %c0_305 = arith.constant 0 : index
    %636 = vector.load %arg3[%c1_302, %c4_303, %c0_304, %c0_305] : memref<2x36x4x1xf32, #tpu.memory_space<vmem>>, vector<1x1x4x1xf32>
    %637 = vector.shape_cast %636 : vector<1x1x4x1xf32> to vector<4x1xf32>
    %638 = vector.extract_strided_slice %635 {offsets = [0, 0], sizes = [1, 256], strides = [1, 1]} : vector<4x256xf32> to vector<1x256xf32>
    %639 = vector.broadcast %637 : vector<4x1xf32> to vector<4x256xf32>
    %640 = vector.broadcast %638 : vector<1x256xf32> to vector<4x256xf32>
    %641 = arith.mulf %639, %640 : vector<4x256xf32>
    %642 = arith.addf %632, %641 : vector<4x256xf32>
    %c1_306 = arith.constant 1 : index
    %c5_307 = arith.constant 5 : index
    %c0_308 = arith.constant 0 : index
    %c0_309 = arith.constant 0 : index
    %643 = vector.load %arg3[%c1_306, %c5_307, %c0_308, %c0_309] : memref<2x36x4x1xf32, #tpu.memory_space<vmem>>, vector<1x1x4x1xf32>
    %644 = vector.shape_cast %643 : vector<1x1x4x1xf32> to vector<4x1xf32>
    %645 = vector.extract_strided_slice %635 {offsets = [1, 0], sizes = [1, 256], strides = [1, 1]} : vector<4x256xf32> to vector<1x256xf32>
    %646 = vector.broadcast %644 : vector<4x1xf32> to vector<4x256xf32>
    %647 = vector.broadcast %645 : vector<1x256xf32> to vector<4x256xf32>
    %648 = arith.mulf %646, %647 : vector<4x256xf32>
    %649 = arith.addf %642, %648 : vector<4x256xf32>
    %c1_310 = arith.constant 1 : index
    %c6_311 = arith.constant 6 : index
    %c0_312 = arith.constant 0 : index
    %c0_313 = arith.constant 0 : index
    %650 = vector.load %arg3[%c1_310, %c6_311, %c0_312, %c0_313] : memref<2x36x4x1xf32, #tpu.memory_space<vmem>>, vector<1x1x4x1xf32>
    %651 = vector.shape_cast %650 : vector<1x1x4x1xf32> to vector<4x1xf32>
    %652 = vector.extract_strided_slice %635 {offsets = [2, 0], sizes = [1, 256], strides = [1, 1]} : vector<4x256xf32> to vector<1x256xf32>
    %653 = vector.broadcast %651 : vector<4x1xf32> to vector<4x256xf32>
    %654 = vector.broadcast %652 : vector<1x256xf32> to vector<4x256xf32>
    %655 = arith.mulf %653, %654 : vector<4x256xf32>
    %656 = arith.addf %649, %655 : vector<4x256xf32>
    %c1_314 = arith.constant 1 : index
    %c7_315 = arith.constant 7 : index
    %c0_316 = arith.constant 0 : index
    %c0_317 = arith.constant 0 : index
    %657 = vector.load %arg3[%c1_314, %c7_315, %c0_316, %c0_317] : memref<2x36x4x1xf32, #tpu.memory_space<vmem>>, vector<1x1x4x1xf32>
    %658 = vector.shape_cast %657 : vector<1x1x4x1xf32> to vector<4x1xf32>
    %659 = vector.extract_strided_slice %635 {offsets = [3, 0], sizes = [1, 256], strides = [1, 1]} : vector<4x256xf32> to vector<1x256xf32>
    %660 = vector.broadcast %658 : vector<4x1xf32> to vector<4x256xf32>
    %661 = vector.broadcast %659 : vector<1x256xf32> to vector<4x256xf32>
    %662 = arith.mulf %660, %661 : vector<4x256xf32>
    %663 = arith.addf %656, %662 : vector<4x256xf32>
    %cst_318 = arith.constant 0.000000e+00 : f32
    %664 = vector.broadcast %cst_318 : f32 to vector<4x15xf32>
    %665 = vector.extract_strided_slice %600 {offsets = [0, 0], sizes = [4, 241], strides = [1, 1]} : vector<4x256xf32> to vector<4x241xf32>
    %666 = tpu.concatenate %664, %665 in 1 : vector<4x15xf32>, vector<4x241xf32> -> vector<4x256xf32>
    %667 = vector.broadcast %3 : vector<1x256xf32> to vector<4x256xf32>
    %668 = arith.mulf %666, %667 : vector<4x256xf32>
    %c1_319 = arith.constant 1 : index
    %c8_320 = arith.constant 8 : index
    %c0_321 = arith.constant 0 : index
    %c0_322 = arith.constant 0 : index
    %669 = vector.load %arg3[%c1_319, %c8_320, %c0_321, %c0_322] : memref<2x36x4x1xf32, #tpu.memory_space<vmem>>, vector<1x1x4x1xf32>
    %670 = vector.shape_cast %669 : vector<1x1x4x1xf32> to vector<4x1xf32>
    %671 = vector.extract_strided_slice %668 {offsets = [0, 0], sizes = [1, 256], strides = [1, 1]} : vector<4x256xf32> to vector<1x256xf32>
    %672 = vector.broadcast %670 : vector<4x1xf32> to vector<4x256xf32>
    %673 = vector.broadcast %671 : vector<1x256xf32> to vector<4x256xf32>
    %674 = arith.mulf %672, %673 : vector<4x256xf32>
    %675 = arith.addf %663, %674 : vector<4x256xf32>
    %c1_323 = arith.constant 1 : index
    %c9_324 = arith.constant 9 : index
    %c0_325 = arith.constant 0 : index
    %c0_326 = arith.constant 0 : index
    %676 = vector.load %arg3[%c1_323, %c9_324, %c0_325, %c0_326] : memref<2x36x4x1xf32, #tpu.memory_space<vmem>>, vector<1x1x4x1xf32>
    %677 = vector.shape_cast %676 : vector<1x1x4x1xf32> to vector<4x1xf32>
    %678 = vector.extract_strided_slice %668 {offsets = [1, 0], sizes = [1, 256], strides = [1, 1]} : vector<4x256xf32> to vector<1x256xf32>
    %679 = vector.broadcast %677 : vector<4x1xf32> to vector<4x256xf32>
    %680 = vector.broadcast %678 : vector<1x256xf32> to vector<4x256xf32>
    %681 = arith.mulf %679, %680 : vector<4x256xf32>
    %682 = arith.addf %675, %681 : vector<4x256xf32>
    %c1_327 = arith.constant 1 : index
    %c10_328 = arith.constant 10 : index
    %c0_329 = arith.constant 0 : index
    %c0_330 = arith.constant 0 : index
    %683 = vector.load %arg3[%c1_327, %c10_328, %c0_329, %c0_330] : memref<2x36x4x1xf32, #tpu.memory_space<vmem>>, vector<1x1x4x1xf32>
    %684 = vector.shape_cast %683 : vector<1x1x4x1xf32> to vector<4x1xf32>
    %685 = vector.extract_strided_slice %668 {offsets = [2, 0], sizes = [1, 256], strides = [1, 1]} : vector<4x256xf32> to vector<1x256xf32>
    %686 = vector.broadcast %684 : vector<4x1xf32> to vector<4x256xf32>
    %687 = vector.broadcast %685 : vector<1x256xf32> to vector<4x256xf32>
    %688 = arith.mulf %686, %687 : vector<4x256xf32>
    %689 = arith.addf %682, %688 : vector<4x256xf32>
    %c1_331 = arith.constant 1 : index
    %c11_332 = arith.constant 11 : index
    %c0_333 = arith.constant 0 : index
    %c0_334 = arith.constant 0 : index
    %690 = vector.load %arg3[%c1_331, %c11_332, %c0_333, %c0_334] : memref<2x36x4x1xf32, #tpu.memory_space<vmem>>, vector<1x1x4x1xf32>
    %691 = vector.shape_cast %690 : vector<1x1x4x1xf32> to vector<4x1xf32>
    %692 = vector.extract_strided_slice %668 {offsets = [3, 0], sizes = [1, 256], strides = [1, 1]} : vector<4x256xf32> to vector<1x256xf32>
    %693 = vector.broadcast %691 : vector<4x1xf32> to vector<4x256xf32>
    %694 = vector.broadcast %692 : vector<1x256xf32> to vector<4x256xf32>
    %695 = arith.mulf %693, %694 : vector<4x256xf32>
    %696 = arith.addf %689, %695 : vector<4x256xf32>
    %cst_335 = arith.constant 0.000000e+00 : f32
    %697 = vector.broadcast %cst_335 : f32 to vector<4x1xf32>
    %698 = vector.extract_strided_slice %600 {offsets = [0, 0], sizes = [4, 255], strides = [1, 1]} : vector<4x256xf32> to vector<4x255xf32>
    %699 = tpu.concatenate %697, %698 in 1 : vector<4x1xf32>, vector<4x255xf32> -> vector<4x256xf32>
    %700 = vector.broadcast %1 : vector<1x256xf32> to vector<4x256xf32>
    %701 = arith.mulf %699, %700 : vector<4x256xf32>
    %c1_336 = arith.constant 1 : index
    %c12_337 = arith.constant 12 : index
    %c0_338 = arith.constant 0 : index
    %c0_339 = arith.constant 0 : index
    %702 = vector.load %arg3[%c1_336, %c12_337, %c0_338, %c0_339] : memref<2x36x4x1xf32, #tpu.memory_space<vmem>>, vector<1x1x4x1xf32>
    %703 = vector.shape_cast %702 : vector<1x1x4x1xf32> to vector<4x1xf32>
    %704 = vector.extract_strided_slice %701 {offsets = [0, 0], sizes = [1, 256], strides = [1, 1]} : vector<4x256xf32> to vector<1x256xf32>
    %705 = vector.broadcast %703 : vector<4x1xf32> to vector<4x256xf32>
    %706 = vector.broadcast %704 : vector<1x256xf32> to vector<4x256xf32>
    %707 = arith.mulf %705, %706 : vector<4x256xf32>
    %708 = arith.addf %696, %707 : vector<4x256xf32>
    %c1_340 = arith.constant 1 : index
    %c13_341 = arith.constant 13 : index
    %c0_342 = arith.constant 0 : index
    %c0_343 = arith.constant 0 : index
    %709 = vector.load %arg3[%c1_340, %c13_341, %c0_342, %c0_343] : memref<2x36x4x1xf32, #tpu.memory_space<vmem>>, vector<1x1x4x1xf32>
    %710 = vector.shape_cast %709 : vector<1x1x4x1xf32> to vector<4x1xf32>
    %711 = vector.extract_strided_slice %701 {offsets = [1, 0], sizes = [1, 256], strides = [1, 1]} : vector<4x256xf32> to vector<1x256xf32>
    %712 = vector.broadcast %710 : vector<4x1xf32> to vector<4x256xf32>
    %713 = vector.broadcast %711 : vector<1x256xf32> to vector<4x256xf32>
    %714 = arith.mulf %712, %713 : vector<4x256xf32>
    %715 = arith.addf %708, %714 : vector<4x256xf32>
    %c1_344 = arith.constant 1 : index
    %c14_345 = arith.constant 14 : index
    %c0_346 = arith.constant 0 : index
    %c0_347 = arith.constant 0 : index
    %716 = vector.load %arg3[%c1_344, %c14_345, %c0_346, %c0_347] : memref<2x36x4x1xf32, #tpu.memory_space<vmem>>, vector<1x1x4x1xf32>
    %717 = vector.shape_cast %716 : vector<1x1x4x1xf32> to vector<4x1xf32>
    %718 = vector.extract_strided_slice %701 {offsets = [2, 0], sizes = [1, 256], strides = [1, 1]} : vector<4x256xf32> to vector<1x256xf32>
    %719 = vector.broadcast %717 : vector<4x1xf32> to vector<4x256xf32>
    %720 = vector.broadcast %718 : vector<1x256xf32> to vector<4x256xf32>
    %721 = arith.mulf %719, %720 : vector<4x256xf32>
    %722 = arith.addf %715, %721 : vector<4x256xf32>
    %c1_348 = arith.constant 1 : index
    %c15_349 = arith.constant 15 : index
    %c0_350 = arith.constant 0 : index
    %c0_351 = arith.constant 0 : index
    %723 = vector.load %arg3[%c1_348, %c15_349, %c0_350, %c0_351] : memref<2x36x4x1xf32, #tpu.memory_space<vmem>>, vector<1x1x4x1xf32>
    %724 = vector.shape_cast %723 : vector<1x1x4x1xf32> to vector<4x1xf32>
    %725 = vector.extract_strided_slice %701 {offsets = [3, 0], sizes = [1, 256], strides = [1, 1]} : vector<4x256xf32> to vector<1x256xf32>
    %726 = vector.broadcast %724 : vector<4x1xf32> to vector<4x256xf32>
    %727 = vector.broadcast %725 : vector<1x256xf32> to vector<4x256xf32>
    %728 = arith.mulf %726, %727 : vector<4x256xf32>
    %729 = arith.addf %722, %728 : vector<4x256xf32>
    %c1_352 = arith.constant 1 : index
    %c16_353 = arith.constant 16 : index
    %c0_354 = arith.constant 0 : index
    %c0_355 = arith.constant 0 : index
    %730 = vector.load %arg3[%c1_352, %c16_353, %c0_354, %c0_355] : memref<2x36x4x1xf32, #tpu.memory_space<vmem>>, vector<1x1x4x1xf32>
    %731 = vector.shape_cast %730 : vector<1x1x4x1xf32> to vector<4x1xf32>
    %732 = vector.extract_strided_slice %600 {offsets = [0, 0], sizes = [1, 256], strides = [1, 1]} : vector<4x256xf32> to vector<1x256xf32>
    %733 = vector.broadcast %731 : vector<4x1xf32> to vector<4x256xf32>
    %734 = vector.broadcast %732 : vector<1x256xf32> to vector<4x256xf32>
    %735 = arith.mulf %733, %734 : vector<4x256xf32>
    %736 = arith.addf %729, %735 : vector<4x256xf32>
    %c1_356 = arith.constant 1 : index
    %c17_357 = arith.constant 17 : index
    %c0_358 = arith.constant 0 : index
    %c0_359 = arith.constant 0 : index
    %737 = vector.load %arg3[%c1_356, %c17_357, %c0_358, %c0_359] : memref<2x36x4x1xf32, #tpu.memory_space<vmem>>, vector<1x1x4x1xf32>
    %738 = vector.shape_cast %737 : vector<1x1x4x1xf32> to vector<4x1xf32>
    %739 = vector.extract_strided_slice %600 {offsets = [1, 0], sizes = [1, 256], strides = [1, 1]} : vector<4x256xf32> to vector<1x256xf32>
    %740 = vector.broadcast %738 : vector<4x1xf32> to vector<4x256xf32>
    %741 = vector.broadcast %739 : vector<1x256xf32> to vector<4x256xf32>
    %742 = arith.mulf %740, %741 : vector<4x256xf32>
    %743 = arith.addf %736, %742 : vector<4x256xf32>
    %c1_360 = arith.constant 1 : index
    %c18_361 = arith.constant 18 : index
    %c0_362 = arith.constant 0 : index
    %c0_363 = arith.constant 0 : index
    %744 = vector.load %arg3[%c1_360, %c18_361, %c0_362, %c0_363] : memref<2x36x4x1xf32, #tpu.memory_space<vmem>>, vector<1x1x4x1xf32>
    %745 = vector.shape_cast %744 : vector<1x1x4x1xf32> to vector<4x1xf32>
    %746 = vector.extract_strided_slice %600 {offsets = [2, 0], sizes = [1, 256], strides = [1, 1]} : vector<4x256xf32> to vector<1x256xf32>
    %747 = vector.broadcast %745 : vector<4x1xf32> to vector<4x256xf32>
    %748 = vector.broadcast %746 : vector<1x256xf32> to vector<4x256xf32>
    %749 = arith.mulf %747, %748 : vector<4x256xf32>
    %750 = arith.addf %743, %749 : vector<4x256xf32>
    %c1_364 = arith.constant 1 : index
    %c19_365 = arith.constant 19 : index
    %c0_366 = arith.constant 0 : index
    %c0_367 = arith.constant 0 : index
    %751 = vector.load %arg3[%c1_364, %c19_365, %c0_366, %c0_367] : memref<2x36x4x1xf32, #tpu.memory_space<vmem>>, vector<1x1x4x1xf32>
    %752 = vector.shape_cast %751 : vector<1x1x4x1xf32> to vector<4x1xf32>
    %753 = vector.extract_strided_slice %600 {offsets = [3, 0], sizes = [1, 256], strides = [1, 1]} : vector<4x256xf32> to vector<1x256xf32>
    %754 = vector.broadcast %752 : vector<4x1xf32> to vector<4x256xf32>
    %755 = vector.broadcast %753 : vector<1x256xf32> to vector<4x256xf32>
    %756 = arith.mulf %754, %755 : vector<4x256xf32>
    %757 = arith.addf %750, %756 : vector<4x256xf32>
    %cst_368 = arith.constant 0.000000e+00 : f32
    %758 = vector.broadcast %cst_368 : f32 to vector<4x1xf32>
    %759 = vector.extract_strided_slice %600 {offsets = [0, 1], sizes = [4, 255], strides = [1, 1]} : vector<4x256xf32> to vector<4x255xf32>
    %760 = tpu.concatenate %759, %758 in 1 : vector<4x255xf32>, vector<4x1xf32> -> vector<4x256xf32>
    %761 = vector.broadcast %3 : vector<1x256xf32> to vector<4x256xf32>
    %762 = arith.mulf %760, %761 : vector<4x256xf32>
    %c1_369 = arith.constant 1 : index
    %c20_370 = arith.constant 20 : index
    %c0_371 = arith.constant 0 : index
    %c0_372 = arith.constant 0 : index
    %763 = vector.load %arg3[%c1_369, %c20_370, %c0_371, %c0_372] : memref<2x36x4x1xf32, #tpu.memory_space<vmem>>, vector<1x1x4x1xf32>
    %764 = vector.shape_cast %763 : vector<1x1x4x1xf32> to vector<4x1xf32>
    %765 = vector.extract_strided_slice %762 {offsets = [0, 0], sizes = [1, 256], strides = [1, 1]} : vector<4x256xf32> to vector<1x256xf32>
    %766 = vector.broadcast %764 : vector<4x1xf32> to vector<4x256xf32>
    %767 = vector.broadcast %765 : vector<1x256xf32> to vector<4x256xf32>
    %768 = arith.mulf %766, %767 : vector<4x256xf32>
    %769 = arith.addf %757, %768 : vector<4x256xf32>
    %c1_373 = arith.constant 1 : index
    %c21_374 = arith.constant 21 : index
    %c0_375 = arith.constant 0 : index
    %c0_376 = arith.constant 0 : index
    %770 = vector.load %arg3[%c1_373, %c21_374, %c0_375, %c0_376] : memref<2x36x4x1xf32, #tpu.memory_space<vmem>>, vector<1x1x4x1xf32>
    %771 = vector.shape_cast %770 : vector<1x1x4x1xf32> to vector<4x1xf32>
    %772 = vector.extract_strided_slice %762 {offsets = [1, 0], sizes = [1, 256], strides = [1, 1]} : vector<4x256xf32> to vector<1x256xf32>
    %773 = vector.broadcast %771 : vector<4x1xf32> to vector<4x256xf32>
    %774 = vector.broadcast %772 : vector<1x256xf32> to vector<4x256xf32>
    %775 = arith.mulf %773, %774 : vector<4x256xf32>
    %776 = arith.addf %769, %775 : vector<4x256xf32>
    %c1_377 = arith.constant 1 : index
    %c22_378 = arith.constant 22 : index
    %c0_379 = arith.constant 0 : index
    %c0_380 = arith.constant 0 : index
    %777 = vector.load %arg3[%c1_377, %c22_378, %c0_379, %c0_380] : memref<2x36x4x1xf32, #tpu.memory_space<vmem>>, vector<1x1x4x1xf32>
    %778 = vector.shape_cast %777 : vector<1x1x4x1xf32> to vector<4x1xf32>
    %779 = vector.extract_strided_slice %762 {offsets = [2, 0], sizes = [1, 256], strides = [1, 1]} : vector<4x256xf32> to vector<1x256xf32>
    %780 = vector.broadcast %778 : vector<4x1xf32> to vector<4x256xf32>
    %781 = vector.broadcast %779 : vector<1x256xf32> to vector<4x256xf32>
    %782 = arith.mulf %780, %781 : vector<4x256xf32>
    %783 = arith.addf %776, %782 : vector<4x256xf32>
    %c1_381 = arith.constant 1 : index
    %c23_382 = arith.constant 23 : index
    %c0_383 = arith.constant 0 : index
    %c0_384 = arith.constant 0 : index
    %784 = vector.load %arg3[%c1_381, %c23_382, %c0_383, %c0_384] : memref<2x36x4x1xf32, #tpu.memory_space<vmem>>, vector<1x1x4x1xf32>
    %785 = vector.shape_cast %784 : vector<1x1x4x1xf32> to vector<4x1xf32>
    %786 = vector.extract_strided_slice %762 {offsets = [3, 0], sizes = [1, 256], strides = [1, 1]} : vector<4x256xf32> to vector<1x256xf32>
    %787 = vector.broadcast %785 : vector<4x1xf32> to vector<4x256xf32>
    %788 = vector.broadcast %786 : vector<1x256xf32> to vector<4x256xf32>
    %789 = arith.mulf %787, %788 : vector<4x256xf32>
    %790 = arith.addf %783, %789 : vector<4x256xf32>
    %cst_385 = arith.constant 0.000000e+00 : f32
    %791 = vector.broadcast %cst_385 : f32 to vector<4x15xf32>
    %792 = vector.extract_strided_slice %600 {offsets = [0, 15], sizes = [4, 241], strides = [1, 1]} : vector<4x256xf32> to vector<4x241xf32>
    %793 = tpu.concatenate %792, %791 in 1 : vector<4x241xf32>, vector<4x15xf32> -> vector<4x256xf32>
    %794 = vector.broadcast %1 : vector<1x256xf32> to vector<4x256xf32>
    %795 = arith.mulf %793, %794 : vector<4x256xf32>
    %c1_386 = arith.constant 1 : index
    %c24_387 = arith.constant 24 : index
    %c0_388 = arith.constant 0 : index
    %c0_389 = arith.constant 0 : index
    %796 = vector.load %arg3[%c1_386, %c24_387, %c0_388, %c0_389] : memref<2x36x4x1xf32, #tpu.memory_space<vmem>>, vector<1x1x4x1xf32>
    %797 = vector.shape_cast %796 : vector<1x1x4x1xf32> to vector<4x1xf32>
    %798 = vector.extract_strided_slice %795 {offsets = [0, 0], sizes = [1, 256], strides = [1, 1]} : vector<4x256xf32> to vector<1x256xf32>
    %799 = vector.broadcast %797 : vector<4x1xf32> to vector<4x256xf32>
    %800 = vector.broadcast %798 : vector<1x256xf32> to vector<4x256xf32>
    %801 = arith.mulf %799, %800 : vector<4x256xf32>
    %802 = arith.addf %790, %801 : vector<4x256xf32>
    %c1_390 = arith.constant 1 : index
    %c25_391 = arith.constant 25 : index
    %c0_392 = arith.constant 0 : index
    %c0_393 = arith.constant 0 : index
    %803 = vector.load %arg3[%c1_390, %c25_391, %c0_392, %c0_393] : memref<2x36x4x1xf32, #tpu.memory_space<vmem>>, vector<1x1x4x1xf32>
    %804 = vector.shape_cast %803 : vector<1x1x4x1xf32> to vector<4x1xf32>
    %805 = vector.extract_strided_slice %795 {offsets = [1, 0], sizes = [1, 256], strides = [1, 1]} : vector<4x256xf32> to vector<1x256xf32>
    %806 = vector.broadcast %804 : vector<4x1xf32> to vector<4x256xf32>
    %807 = vector.broadcast %805 : vector<1x256xf32> to vector<4x256xf32>
    %808 = arith.mulf %806, %807 : vector<4x256xf32>
    %809 = arith.addf %802, %808 : vector<4x256xf32>
    %c1_394 = arith.constant 1 : index
    %c26_395 = arith.constant 26 : index
    %c0_396 = arith.constant 0 : index
    %c0_397 = arith.constant 0 : index
    %810 = vector.load %arg3[%c1_394, %c26_395, %c0_396, %c0_397] : memref<2x36x4x1xf32, #tpu.memory_space<vmem>>, vector<1x1x4x1xf32>
    %811 = vector.shape_cast %810 : vector<1x1x4x1xf32> to vector<4x1xf32>
    %812 = vector.extract_strided_slice %795 {offsets = [2, 0], sizes = [1, 256], strides = [1, 1]} : vector<4x256xf32> to vector<1x256xf32>
    %813 = vector.broadcast %811 : vector<4x1xf32> to vector<4x256xf32>
    %814 = vector.broadcast %812 : vector<1x256xf32> to vector<4x256xf32>
    %815 = arith.mulf %813, %814 : vector<4x256xf32>
    %816 = arith.addf %809, %815 : vector<4x256xf32>
    %c1_398 = arith.constant 1 : index
    %c27_399 = arith.constant 27 : index
    %c0_400 = arith.constant 0 : index
    %c0_401 = arith.constant 0 : index
    %817 = vector.load %arg3[%c1_398, %c27_399, %c0_400, %c0_401] : memref<2x36x4x1xf32, #tpu.memory_space<vmem>>, vector<1x1x4x1xf32>
    %818 = vector.shape_cast %817 : vector<1x1x4x1xf32> to vector<4x1xf32>
    %819 = vector.extract_strided_slice %795 {offsets = [3, 0], sizes = [1, 256], strides = [1, 1]} : vector<4x256xf32> to vector<1x256xf32>
    %820 = vector.broadcast %818 : vector<4x1xf32> to vector<4x256xf32>
    %821 = vector.broadcast %819 : vector<1x256xf32> to vector<4x256xf32>
    %822 = arith.mulf %820, %821 : vector<4x256xf32>
    %823 = arith.addf %816, %822 : vector<4x256xf32>
    %cst_402 = arith.constant 0.000000e+00 : f32
    %824 = vector.broadcast %cst_402 : f32 to vector<4x16xf32>
    %825 = vector.extract_strided_slice %600 {offsets = [0, 16], sizes = [4, 240], strides = [1, 1]} : vector<4x256xf32> to vector<4x240xf32>
    %826 = tpu.concatenate %825, %824 in 1 : vector<4x240xf32>, vector<4x16xf32> -> vector<4x256xf32>
    %c1_403 = arith.constant 1 : index
    %c28_404 = arith.constant 28 : index
    %c0_405 = arith.constant 0 : index
    %c0_406 = arith.constant 0 : index
    %827 = vector.load %arg3[%c1_403, %c28_404, %c0_405, %c0_406] : memref<2x36x4x1xf32, #tpu.memory_space<vmem>>, vector<1x1x4x1xf32>
    %828 = vector.shape_cast %827 : vector<1x1x4x1xf32> to vector<4x1xf32>
    %829 = vector.extract_strided_slice %826 {offsets = [0, 0], sizes = [1, 256], strides = [1, 1]} : vector<4x256xf32> to vector<1x256xf32>
    %830 = vector.broadcast %828 : vector<4x1xf32> to vector<4x256xf32>
    %831 = vector.broadcast %829 : vector<1x256xf32> to vector<4x256xf32>
    %832 = arith.mulf %830, %831 : vector<4x256xf32>
    %833 = arith.addf %823, %832 : vector<4x256xf32>
    %c1_407 = arith.constant 1 : index
    %c29_408 = arith.constant 29 : index
    %c0_409 = arith.constant 0 : index
    %c0_410 = arith.constant 0 : index
    %834 = vector.load %arg3[%c1_407, %c29_408, %c0_409, %c0_410] : memref<2x36x4x1xf32, #tpu.memory_space<vmem>>, vector<1x1x4x1xf32>
    %835 = vector.shape_cast %834 : vector<1x1x4x1xf32> to vector<4x1xf32>
    %836 = vector.extract_strided_slice %826 {offsets = [1, 0], sizes = [1, 256], strides = [1, 1]} : vector<4x256xf32> to vector<1x256xf32>
    %837 = vector.broadcast %835 : vector<4x1xf32> to vector<4x256xf32>
    %838 = vector.broadcast %836 : vector<1x256xf32> to vector<4x256xf32>
    %839 = arith.mulf %837, %838 : vector<4x256xf32>
    %840 = arith.addf %833, %839 : vector<4x256xf32>
    %c1_411 = arith.constant 1 : index
    %c30_412 = arith.constant 30 : index
    %c0_413 = arith.constant 0 : index
    %c0_414 = arith.constant 0 : index
    %841 = vector.load %arg3[%c1_411, %c30_412, %c0_413, %c0_414] : memref<2x36x4x1xf32, #tpu.memory_space<vmem>>, vector<1x1x4x1xf32>
    %842 = vector.shape_cast %841 : vector<1x1x4x1xf32> to vector<4x1xf32>
    %843 = vector.extract_strided_slice %826 {offsets = [2, 0], sizes = [1, 256], strides = [1, 1]} : vector<4x256xf32> to vector<1x256xf32>
    %844 = vector.broadcast %842 : vector<4x1xf32> to vector<4x256xf32>
    %845 = vector.broadcast %843 : vector<1x256xf32> to vector<4x256xf32>
    %846 = arith.mulf %844, %845 : vector<4x256xf32>
    %847 = arith.addf %840, %846 : vector<4x256xf32>
    %c1_415 = arith.constant 1 : index
    %c31_416 = arith.constant 31 : index
    %c0_417 = arith.constant 0 : index
    %c0_418 = arith.constant 0 : index
    %848 = vector.load %arg3[%c1_415, %c31_416, %c0_417, %c0_418] : memref<2x36x4x1xf32, #tpu.memory_space<vmem>>, vector<1x1x4x1xf32>
    %849 = vector.shape_cast %848 : vector<1x1x4x1xf32> to vector<4x1xf32>
    %850 = vector.extract_strided_slice %826 {offsets = [3, 0], sizes = [1, 256], strides = [1, 1]} : vector<4x256xf32> to vector<1x256xf32>
    %851 = vector.broadcast %849 : vector<4x1xf32> to vector<4x256xf32>
    %852 = vector.broadcast %850 : vector<1x256xf32> to vector<4x256xf32>
    %853 = arith.mulf %851, %852 : vector<4x256xf32>
    %854 = arith.addf %847, %853 : vector<4x256xf32>
    %cst_419 = arith.constant 0.000000e+00 : f32
    %855 = vector.broadcast %cst_419 : f32 to vector<4x17xf32>
    %856 = vector.extract_strided_slice %600 {offsets = [0, 17], sizes = [4, 239], strides = [1, 1]} : vector<4x256xf32> to vector<4x239xf32>
    %857 = tpu.concatenate %856, %855 in 1 : vector<4x239xf32>, vector<4x17xf32> -> vector<4x256xf32>
    %858 = vector.broadcast %3 : vector<1x256xf32> to vector<4x256xf32>
    %859 = arith.mulf %857, %858 : vector<4x256xf32>
    %c1_420 = arith.constant 1 : index
    %c32_421 = arith.constant 32 : index
    %c0_422 = arith.constant 0 : index
    %c0_423 = arith.constant 0 : index
    %860 = vector.load %arg3[%c1_420, %c32_421, %c0_422, %c0_423] : memref<2x36x4x1xf32, #tpu.memory_space<vmem>>, vector<1x1x4x1xf32>
    %861 = vector.shape_cast %860 : vector<1x1x4x1xf32> to vector<4x1xf32>
    %862 = vector.extract_strided_slice %859 {offsets = [0, 0], sizes = [1, 256], strides = [1, 1]} : vector<4x256xf32> to vector<1x256xf32>
    %863 = vector.broadcast %861 : vector<4x1xf32> to vector<4x256xf32>
    %864 = vector.broadcast %862 : vector<1x256xf32> to vector<4x256xf32>
    %865 = arith.mulf %863, %864 : vector<4x256xf32>
    %866 = arith.addf %854, %865 : vector<4x256xf32>
    %c1_424 = arith.constant 1 : index
    %c33_425 = arith.constant 33 : index
    %c0_426 = arith.constant 0 : index
    %c0_427 = arith.constant 0 : index
    %867 = vector.load %arg3[%c1_424, %c33_425, %c0_426, %c0_427] : memref<2x36x4x1xf32, #tpu.memory_space<vmem>>, vector<1x1x4x1xf32>
    %868 = vector.shape_cast %867 : vector<1x1x4x1xf32> to vector<4x1xf32>
    %869 = vector.extract_strided_slice %859 {offsets = [1, 0], sizes = [1, 256], strides = [1, 1]} : vector<4x256xf32> to vector<1x256xf32>
    %870 = vector.broadcast %868 : vector<4x1xf32> to vector<4x256xf32>
    %871 = vector.broadcast %869 : vector<1x256xf32> to vector<4x256xf32>
    %872 = arith.mulf %870, %871 : vector<4x256xf32>
    %873 = arith.addf %866, %872 : vector<4x256xf32>
    %c1_428 = arith.constant 1 : index
    %c34_429 = arith.constant 34 : index
    %c0_430 = arith.constant 0 : index
    %c0_431 = arith.constant 0 : index
    %874 = vector.load %arg3[%c1_428, %c34_429, %c0_430, %c0_431] : memref<2x36x4x1xf32, #tpu.memory_space<vmem>>, vector<1x1x4x1xf32>
    %875 = vector.shape_cast %874 : vector<1x1x4x1xf32> to vector<4x1xf32>
    %876 = vector.extract_strided_slice %859 {offsets = [2, 0], sizes = [1, 256], strides = [1, 1]} : vector<4x256xf32> to vector<1x256xf32>
    %877 = vector.broadcast %875 : vector<4x1xf32> to vector<4x256xf32>
    %878 = vector.broadcast %876 : vector<1x256xf32> to vector<4x256xf32>
    %879 = arith.mulf %877, %878 : vector<4x256xf32>
    %880 = arith.addf %873, %879 : vector<4x256xf32>
    %c1_432 = arith.constant 1 : index
    %c35_433 = arith.constant 35 : index
    %c0_434 = arith.constant 0 : index
    %c0_435 = arith.constant 0 : index
    %881 = vector.load %arg3[%c1_432, %c35_433, %c0_434, %c0_435] : memref<2x36x4x1xf32, #tpu.memory_space<vmem>>, vector<1x1x4x1xf32>
    %882 = vector.shape_cast %881 : vector<1x1x4x1xf32> to vector<4x1xf32>
    %883 = vector.extract_strided_slice %859 {offsets = [3, 0], sizes = [1, 256], strides = [1, 1]} : vector<4x256xf32> to vector<1x256xf32>
    %884 = vector.broadcast %882 : vector<4x1xf32> to vector<4x256xf32>
    %885 = vector.broadcast %883 : vector<1x256xf32> to vector<4x256xf32>
    %886 = arith.mulf %884, %885 : vector<4x256xf32>
    %887 = arith.addf %880, %886 : vector<4x256xf32>
    %c1_436 = arith.constant 1 : index
    %c0_437 = arith.constant 0 : index
    %c0_438 = arith.constant 0 : index
    %888 = vector.load %arg4[%c1_436, %c0_437, %c0_438] : memref<2x4x1xf32, #tpu.memory_space<vmem>>, vector<1x4x1xf32>
    %889 = vector.shape_cast %888 : vector<1x4x1xf32> to vector<4x1xf32>
    %890 = vector.broadcast %889 : vector<4x1xf32> to vector<4x256xf32>
    %891 = arith.addf %887, %890 : vector<4x256xf32>
    %892 = arith.addf %299, %891 : vector<4x256xf32>
    %cst_439 = arith.constant 0.000000e+00 : f32
    %893 = vector.broadcast %cst_439 : f32 to vector<4x17xf32>
    %894 = vector.extract_strided_slice %892 {offsets = [0, 0], sizes = [4, 239], strides = [1, 1]} : vector<4x256xf32> to vector<4x239xf32>
    %895 = tpu.concatenate %893, %894 in 1 : vector<4x17xf32>, vector<4x239xf32> -> vector<4x256xf32>
    %896 = vector.broadcast %1 : vector<1x256xf32> to vector<4x256xf32>
    %897 = arith.mulf %895, %896 : vector<4x256xf32>
    %c1_440 = arith.constant 1 : index
    %c0_441 = arith.constant 0 : index
    %c0_442 = arith.constant 0 : index
    %c0_443 = arith.constant 0 : index
    %898 = vector.load %arg5[%c1_440, %c0_441, %c0_442, %c0_443] : memref<2x36x8x1xf32, #tpu.memory_space<vmem>>, vector<1x1x8x1xf32>
    %899 = vector.shape_cast %898 : vector<1x1x8x1xf32> to vector<8x1xf32>
    %900 = vector.extract_strided_slice %897 {offsets = [0, 0], sizes = [1, 256], strides = [1, 1]} : vector<4x256xf32> to vector<1x256xf32>
    %901 = vector.broadcast %899 : vector<8x1xf32> to vector<8x256xf32>
    %902 = vector.broadcast %900 : vector<1x256xf32> to vector<8x256xf32>
    %903 = arith.mulf %901, %902 : vector<8x256xf32>
    %c1_444 = arith.constant 1 : index
    %c1_445 = arith.constant 1 : index
    %c0_446 = arith.constant 0 : index
    %c0_447 = arith.constant 0 : index
    %904 = vector.load %arg5[%c1_444, %c1_445, %c0_446, %c0_447] : memref<2x36x8x1xf32, #tpu.memory_space<vmem>>, vector<1x1x8x1xf32>
    %905 = vector.shape_cast %904 : vector<1x1x8x1xf32> to vector<8x1xf32>
    %906 = vector.extract_strided_slice %897 {offsets = [1, 0], sizes = [1, 256], strides = [1, 1]} : vector<4x256xf32> to vector<1x256xf32>
    %907 = vector.broadcast %905 : vector<8x1xf32> to vector<8x256xf32>
    %908 = vector.broadcast %906 : vector<1x256xf32> to vector<8x256xf32>
    %909 = arith.mulf %907, %908 : vector<8x256xf32>
    %910 = arith.addf %903, %909 : vector<8x256xf32>
    %c1_448 = arith.constant 1 : index
    %c2_449 = arith.constant 2 : index
    %c0_450 = arith.constant 0 : index
    %c0_451 = arith.constant 0 : index
    %911 = vector.load %arg5[%c1_448, %c2_449, %c0_450, %c0_451] : memref<2x36x8x1xf32, #tpu.memory_space<vmem>>, vector<1x1x8x1xf32>
    %912 = vector.shape_cast %911 : vector<1x1x8x1xf32> to vector<8x1xf32>
    %913 = vector.extract_strided_slice %897 {offsets = [2, 0], sizes = [1, 256], strides = [1, 1]} : vector<4x256xf32> to vector<1x256xf32>
    %914 = vector.broadcast %912 : vector<8x1xf32> to vector<8x256xf32>
    %915 = vector.broadcast %913 : vector<1x256xf32> to vector<8x256xf32>
    %916 = arith.mulf %914, %915 : vector<8x256xf32>
    %917 = arith.addf %910, %916 : vector<8x256xf32>
    %c1_452 = arith.constant 1 : index
    %c3_453 = arith.constant 3 : index
    %c0_454 = arith.constant 0 : index
    %c0_455 = arith.constant 0 : index
    %918 = vector.load %arg5[%c1_452, %c3_453, %c0_454, %c0_455] : memref<2x36x8x1xf32, #tpu.memory_space<vmem>>, vector<1x1x8x1xf32>
    %919 = vector.shape_cast %918 : vector<1x1x8x1xf32> to vector<8x1xf32>
    %920 = vector.extract_strided_slice %897 {offsets = [3, 0], sizes = [1, 256], strides = [1, 1]} : vector<4x256xf32> to vector<1x256xf32>
    %921 = vector.broadcast %919 : vector<8x1xf32> to vector<8x256xf32>
    %922 = vector.broadcast %920 : vector<1x256xf32> to vector<8x256xf32>
    %923 = arith.mulf %921, %922 : vector<8x256xf32>
    %924 = arith.addf %917, %923 : vector<8x256xf32>
    %cst_456 = arith.constant 0.000000e+00 : f32
    %925 = vector.broadcast %cst_456 : f32 to vector<4x16xf32>
    %926 = vector.extract_strided_slice %892 {offsets = [0, 0], sizes = [4, 240], strides = [1, 1]} : vector<4x256xf32> to vector<4x240xf32>
    %927 = tpu.concatenate %925, %926 in 1 : vector<4x16xf32>, vector<4x240xf32> -> vector<4x256xf32>
    %c1_457 = arith.constant 1 : index
    %c4_458 = arith.constant 4 : index
    %c0_459 = arith.constant 0 : index
    %c0_460 = arith.constant 0 : index
    %928 = vector.load %arg5[%c1_457, %c4_458, %c0_459, %c0_460] : memref<2x36x8x1xf32, #tpu.memory_space<vmem>>, vector<1x1x8x1xf32>
    %929 = vector.shape_cast %928 : vector<1x1x8x1xf32> to vector<8x1xf32>
    %930 = vector.extract_strided_slice %927 {offsets = [0, 0], sizes = [1, 256], strides = [1, 1]} : vector<4x256xf32> to vector<1x256xf32>
    %931 = vector.broadcast %929 : vector<8x1xf32> to vector<8x256xf32>
    %932 = vector.broadcast %930 : vector<1x256xf32> to vector<8x256xf32>
    %933 = arith.mulf %931, %932 : vector<8x256xf32>
    %934 = arith.addf %924, %933 : vector<8x256xf32>
    %c1_461 = arith.constant 1 : index
    %c5_462 = arith.constant 5 : index
    %c0_463 = arith.constant 0 : index
    %c0_464 = arith.constant 0 : index
    %935 = vector.load %arg5[%c1_461, %c5_462, %c0_463, %c0_464] : memref<2x36x8x1xf32, #tpu.memory_space<vmem>>, vector<1x1x8x1xf32>
    %936 = vector.shape_cast %935 : vector<1x1x8x1xf32> to vector<8x1xf32>
    %937 = vector.extract_strided_slice %927 {offsets = [1, 0], sizes = [1, 256], strides = [1, 1]} : vector<4x256xf32> to vector<1x256xf32>
    %938 = vector.broadcast %936 : vector<8x1xf32> to vector<8x256xf32>
    %939 = vector.broadcast %937 : vector<1x256xf32> to vector<8x256xf32>
    %940 = arith.mulf %938, %939 : vector<8x256xf32>
    %941 = arith.addf %934, %940 : vector<8x256xf32>
    %c1_465 = arith.constant 1 : index
    %c6_466 = arith.constant 6 : index
    %c0_467 = arith.constant 0 : index
    %c0_468 = arith.constant 0 : index
    %942 = vector.load %arg5[%c1_465, %c6_466, %c0_467, %c0_468] : memref<2x36x8x1xf32, #tpu.memory_space<vmem>>, vector<1x1x8x1xf32>
    %943 = vector.shape_cast %942 : vector<1x1x8x1xf32> to vector<8x1xf32>
    %944 = vector.extract_strided_slice %927 {offsets = [2, 0], sizes = [1, 256], strides = [1, 1]} : vector<4x256xf32> to vector<1x256xf32>
    %945 = vector.broadcast %943 : vector<8x1xf32> to vector<8x256xf32>
    %946 = vector.broadcast %944 : vector<1x256xf32> to vector<8x256xf32>
    %947 = arith.mulf %945, %946 : vector<8x256xf32>
    %948 = arith.addf %941, %947 : vector<8x256xf32>
    %c1_469 = arith.constant 1 : index
    %c7_470 = arith.constant 7 : index
    %c0_471 = arith.constant 0 : index
    %c0_472 = arith.constant 0 : index
    %949 = vector.load %arg5[%c1_469, %c7_470, %c0_471, %c0_472] : memref<2x36x8x1xf32, #tpu.memory_space<vmem>>, vector<1x1x8x1xf32>
    %950 = vector.shape_cast %949 : vector<1x1x8x1xf32> to vector<8x1xf32>
    %951 = vector.extract_strided_slice %927 {offsets = [3, 0], sizes = [1, 256], strides = [1, 1]} : vector<4x256xf32> to vector<1x256xf32>
    %952 = vector.broadcast %950 : vector<8x1xf32> to vector<8x256xf32>
    %953 = vector.broadcast %951 : vector<1x256xf32> to vector<8x256xf32>
    %954 = arith.mulf %952, %953 : vector<8x256xf32>
    %955 = arith.addf %948, %954 : vector<8x256xf32>
    %cst_473 = arith.constant 0.000000e+00 : f32
    %956 = vector.broadcast %cst_473 : f32 to vector<4x15xf32>
    %957 = vector.extract_strided_slice %892 {offsets = [0, 0], sizes = [4, 241], strides = [1, 1]} : vector<4x256xf32> to vector<4x241xf32>
    %958 = tpu.concatenate %956, %957 in 1 : vector<4x15xf32>, vector<4x241xf32> -> vector<4x256xf32>
    %959 = vector.broadcast %3 : vector<1x256xf32> to vector<4x256xf32>
    %960 = arith.mulf %958, %959 : vector<4x256xf32>
    %c1_474 = arith.constant 1 : index
    %c8_475 = arith.constant 8 : index
    %c0_476 = arith.constant 0 : index
    %c0_477 = arith.constant 0 : index
    %961 = vector.load %arg5[%c1_474, %c8_475, %c0_476, %c0_477] : memref<2x36x8x1xf32, #tpu.memory_space<vmem>>, vector<1x1x8x1xf32>
    %962 = vector.shape_cast %961 : vector<1x1x8x1xf32> to vector<8x1xf32>
    %963 = vector.extract_strided_slice %960 {offsets = [0, 0], sizes = [1, 256], strides = [1, 1]} : vector<4x256xf32> to vector<1x256xf32>
    %964 = vector.broadcast %962 : vector<8x1xf32> to vector<8x256xf32>
    %965 = vector.broadcast %963 : vector<1x256xf32> to vector<8x256xf32>
    %966 = arith.mulf %964, %965 : vector<8x256xf32>
    %967 = arith.addf %955, %966 : vector<8x256xf32>
    %c1_478 = arith.constant 1 : index
    %c9_479 = arith.constant 9 : index
    %c0_480 = arith.constant 0 : index
    %c0_481 = arith.constant 0 : index
    %968 = vector.load %arg5[%c1_478, %c9_479, %c0_480, %c0_481] : memref<2x36x8x1xf32, #tpu.memory_space<vmem>>, vector<1x1x8x1xf32>
    %969 = vector.shape_cast %968 : vector<1x1x8x1xf32> to vector<8x1xf32>
    %970 = vector.extract_strided_slice %960 {offsets = [1, 0], sizes = [1, 256], strides = [1, 1]} : vector<4x256xf32> to vector<1x256xf32>
    %971 = vector.broadcast %969 : vector<8x1xf32> to vector<8x256xf32>
    %972 = vector.broadcast %970 : vector<1x256xf32> to vector<8x256xf32>
    %973 = arith.mulf %971, %972 : vector<8x256xf32>
    %974 = arith.addf %967, %973 : vector<8x256xf32>
    %c1_482 = arith.constant 1 : index
    %c10_483 = arith.constant 10 : index
    %c0_484 = arith.constant 0 : index
    %c0_485 = arith.constant 0 : index
    %975 = vector.load %arg5[%c1_482, %c10_483, %c0_484, %c0_485] : memref<2x36x8x1xf32, #tpu.memory_space<vmem>>, vector<1x1x8x1xf32>
    %976 = vector.shape_cast %975 : vector<1x1x8x1xf32> to vector<8x1xf32>
    %977 = vector.extract_strided_slice %960 {offsets = [2, 0], sizes = [1, 256], strides = [1, 1]} : vector<4x256xf32> to vector<1x256xf32>
    %978 = vector.broadcast %976 : vector<8x1xf32> to vector<8x256xf32>
    %979 = vector.broadcast %977 : vector<1x256xf32> to vector<8x256xf32>
    %980 = arith.mulf %978, %979 : vector<8x256xf32>
    %981 = arith.addf %974, %980 : vector<8x256xf32>
    %c1_486 = arith.constant 1 : index
    %c11_487 = arith.constant 11 : index
    %c0_488 = arith.constant 0 : index
    %c0_489 = arith.constant 0 : index
    %982 = vector.load %arg5[%c1_486, %c11_487, %c0_488, %c0_489] : memref<2x36x8x1xf32, #tpu.memory_space<vmem>>, vector<1x1x8x1xf32>
    %983 = vector.shape_cast %982 : vector<1x1x8x1xf32> to vector<8x1xf32>
    %984 = vector.extract_strided_slice %960 {offsets = [3, 0], sizes = [1, 256], strides = [1, 1]} : vector<4x256xf32> to vector<1x256xf32>
    %985 = vector.broadcast %983 : vector<8x1xf32> to vector<8x256xf32>
    %986 = vector.broadcast %984 : vector<1x256xf32> to vector<8x256xf32>
    %987 = arith.mulf %985, %986 : vector<8x256xf32>
    %988 = arith.addf %981, %987 : vector<8x256xf32>
    %cst_490 = arith.constant 0.000000e+00 : f32
    %989 = vector.broadcast %cst_490 : f32 to vector<4x1xf32>
    %990 = vector.extract_strided_slice %892 {offsets = [0, 0], sizes = [4, 255], strides = [1, 1]} : vector<4x256xf32> to vector<4x255xf32>
    %991 = tpu.concatenate %989, %990 in 1 : vector<4x1xf32>, vector<4x255xf32> -> vector<4x256xf32>
    %992 = vector.broadcast %1 : vector<1x256xf32> to vector<4x256xf32>
    %993 = arith.mulf %991, %992 : vector<4x256xf32>
    %c1_491 = arith.constant 1 : index
    %c12_492 = arith.constant 12 : index
    %c0_493 = arith.constant 0 : index
    %c0_494 = arith.constant 0 : index
    %994 = vector.load %arg5[%c1_491, %c12_492, %c0_493, %c0_494] : memref<2x36x8x1xf32, #tpu.memory_space<vmem>>, vector<1x1x8x1xf32>
    %995 = vector.shape_cast %994 : vector<1x1x8x1xf32> to vector<8x1xf32>
    %996 = vector.extract_strided_slice %993 {offsets = [0, 0], sizes = [1, 256], strides = [1, 1]} : vector<4x256xf32> to vector<1x256xf32>
    %997 = vector.broadcast %995 : vector<8x1xf32> to vector<8x256xf32>
    %998 = vector.broadcast %996 : vector<1x256xf32> to vector<8x256xf32>
    %999 = arith.mulf %997, %998 : vector<8x256xf32>
    %1000 = arith.addf %988, %999 : vector<8x256xf32>
    %c1_495 = arith.constant 1 : index
    %c13_496 = arith.constant 13 : index
    %c0_497 = arith.constant 0 : index
    %c0_498 = arith.constant 0 : index
    %1001 = vector.load %arg5[%c1_495, %c13_496, %c0_497, %c0_498] : memref<2x36x8x1xf32, #tpu.memory_space<vmem>>, vector<1x1x8x1xf32>
    %1002 = vector.shape_cast %1001 : vector<1x1x8x1xf32> to vector<8x1xf32>
    %1003 = vector.extract_strided_slice %993 {offsets = [1, 0], sizes = [1, 256], strides = [1, 1]} : vector<4x256xf32> to vector<1x256xf32>
    %1004 = vector.broadcast %1002 : vector<8x1xf32> to vector<8x256xf32>
    %1005 = vector.broadcast %1003 : vector<1x256xf32> to vector<8x256xf32>
    %1006 = arith.mulf %1004, %1005 : vector<8x256xf32>
    %1007 = arith.addf %1000, %1006 : vector<8x256xf32>
    %c1_499 = arith.constant 1 : index
    %c14_500 = arith.constant 14 : index
    %c0_501 = arith.constant 0 : index
    %c0_502 = arith.constant 0 : index
    %1008 = vector.load %arg5[%c1_499, %c14_500, %c0_501, %c0_502] : memref<2x36x8x1xf32, #tpu.memory_space<vmem>>, vector<1x1x8x1xf32>
    %1009 = vector.shape_cast %1008 : vector<1x1x8x1xf32> to vector<8x1xf32>
    %1010 = vector.extract_strided_slice %993 {offsets = [2, 0], sizes = [1, 256], strides = [1, 1]} : vector<4x256xf32> to vector<1x256xf32>
    %1011 = vector.broadcast %1009 : vector<8x1xf32> to vector<8x256xf32>
    %1012 = vector.broadcast %1010 : vector<1x256xf32> to vector<8x256xf32>
    %1013 = arith.mulf %1011, %1012 : vector<8x256xf32>
    %1014 = arith.addf %1007, %1013 : vector<8x256xf32>
    %c1_503 = arith.constant 1 : index
    %c15_504 = arith.constant 15 : index
    %c0_505 = arith.constant 0 : index
    %c0_506 = arith.constant 0 : index
    %1015 = vector.load %arg5[%c1_503, %c15_504, %c0_505, %c0_506] : memref<2x36x8x1xf32, #tpu.memory_space<vmem>>, vector<1x1x8x1xf32>
    %1016 = vector.shape_cast %1015 : vector<1x1x8x1xf32> to vector<8x1xf32>
    %1017 = vector.extract_strided_slice %993 {offsets = [3, 0], sizes = [1, 256], strides = [1, 1]} : vector<4x256xf32> to vector<1x256xf32>
    %1018 = vector.broadcast %1016 : vector<8x1xf32> to vector<8x256xf32>
    %1019 = vector.broadcast %1017 : vector<1x256xf32> to vector<8x256xf32>
    %1020 = arith.mulf %1018, %1019 : vector<8x256xf32>
    %1021 = arith.addf %1014, %1020 : vector<8x256xf32>
    %c1_507 = arith.constant 1 : index
    %c16_508 = arith.constant 16 : index
    %c0_509 = arith.constant 0 : index
    %c0_510 = arith.constant 0 : index
    %1022 = vector.load %arg5[%c1_507, %c16_508, %c0_509, %c0_510] : memref<2x36x8x1xf32, #tpu.memory_space<vmem>>, vector<1x1x8x1xf32>
    %1023 = vector.shape_cast %1022 : vector<1x1x8x1xf32> to vector<8x1xf32>
    %1024 = vector.extract_strided_slice %892 {offsets = [0, 0], sizes = [1, 256], strides = [1, 1]} : vector<4x256xf32> to vector<1x256xf32>
    %1025 = vector.broadcast %1023 : vector<8x1xf32> to vector<8x256xf32>
    %1026 = vector.broadcast %1024 : vector<1x256xf32> to vector<8x256xf32>
    %1027 = arith.mulf %1025, %1026 : vector<8x256xf32>
    %1028 = arith.addf %1021, %1027 : vector<8x256xf32>
    %c1_511 = arith.constant 1 : index
    %c17_512 = arith.constant 17 : index
    %c0_513 = arith.constant 0 : index
    %c0_514 = arith.constant 0 : index
    %1029 = vector.load %arg5[%c1_511, %c17_512, %c0_513, %c0_514] : memref<2x36x8x1xf32, #tpu.memory_space<vmem>>, vector<1x1x8x1xf32>
    %1030 = vector.shape_cast %1029 : vector<1x1x8x1xf32> to vector<8x1xf32>
    %1031 = vector.extract_strided_slice %892 {offsets = [1, 0], sizes = [1, 256], strides = [1, 1]} : vector<4x256xf32> to vector<1x256xf32>
    %1032 = vector.broadcast %1030 : vector<8x1xf32> to vector<8x256xf32>
    %1033 = vector.broadcast %1031 : vector<1x256xf32> to vector<8x256xf32>
    %1034 = arith.mulf %1032, %1033 : vector<8x256xf32>
    %1035 = arith.addf %1028, %1034 : vector<8x256xf32>
    %c1_515 = arith.constant 1 : index
    %c18_516 = arith.constant 18 : index
    %c0_517 = arith.constant 0 : index
    %c0_518 = arith.constant 0 : index
    %1036 = vector.load %arg5[%c1_515, %c18_516, %c0_517, %c0_518] : memref<2x36x8x1xf32, #tpu.memory_space<vmem>>, vector<1x1x8x1xf32>
    %1037 = vector.shape_cast %1036 : vector<1x1x8x1xf32> to vector<8x1xf32>
    %1038 = vector.extract_strided_slice %892 {offsets = [2, 0], sizes = [1, 256], strides = [1, 1]} : vector<4x256xf32> to vector<1x256xf32>
    %1039 = vector.broadcast %1037 : vector<8x1xf32> to vector<8x256xf32>
    %1040 = vector.broadcast %1038 : vector<1x256xf32> to vector<8x256xf32>
    %1041 = arith.mulf %1039, %1040 : vector<8x256xf32>
    %1042 = arith.addf %1035, %1041 : vector<8x256xf32>
    %c1_519 = arith.constant 1 : index
    %c19_520 = arith.constant 19 : index
    %c0_521 = arith.constant 0 : index
    %c0_522 = arith.constant 0 : index
    %1043 = vector.load %arg5[%c1_519, %c19_520, %c0_521, %c0_522] : memref<2x36x8x1xf32, #tpu.memory_space<vmem>>, vector<1x1x8x1xf32>
    %1044 = vector.shape_cast %1043 : vector<1x1x8x1xf32> to vector<8x1xf32>
    %1045 = vector.extract_strided_slice %892 {offsets = [3, 0], sizes = [1, 256], strides = [1, 1]} : vector<4x256xf32> to vector<1x256xf32>
    %1046 = vector.broadcast %1044 : vector<8x1xf32> to vector<8x256xf32>
    %1047 = vector.broadcast %1045 : vector<1x256xf32> to vector<8x256xf32>
    %1048 = arith.mulf %1046, %1047 : vector<8x256xf32>
    %1049 = arith.addf %1042, %1048 : vector<8x256xf32>
    %cst_523 = arith.constant 0.000000e+00 : f32
    %1050 = vector.broadcast %cst_523 : f32 to vector<4x1xf32>
    %1051 = vector.extract_strided_slice %892 {offsets = [0, 1], sizes = [4, 255], strides = [1, 1]} : vector<4x256xf32> to vector<4x255xf32>
    %1052 = tpu.concatenate %1051, %1050 in 1 : vector<4x255xf32>, vector<4x1xf32> -> vector<4x256xf32>
    %1053 = vector.broadcast %3 : vector<1x256xf32> to vector<4x256xf32>
    %1054 = arith.mulf %1052, %1053 : vector<4x256xf32>
    %c1_524 = arith.constant 1 : index
    %c20_525 = arith.constant 20 : index
    %c0_526 = arith.constant 0 : index
    %c0_527 = arith.constant 0 : index
    %1055 = vector.load %arg5[%c1_524, %c20_525, %c0_526, %c0_527] : memref<2x36x8x1xf32, #tpu.memory_space<vmem>>, vector<1x1x8x1xf32>
    %1056 = vector.shape_cast %1055 : vector<1x1x8x1xf32> to vector<8x1xf32>
    %1057 = vector.extract_strided_slice %1054 {offsets = [0, 0], sizes = [1, 256], strides = [1, 1]} : vector<4x256xf32> to vector<1x256xf32>
    %1058 = vector.broadcast %1056 : vector<8x1xf32> to vector<8x256xf32>
    %1059 = vector.broadcast %1057 : vector<1x256xf32> to vector<8x256xf32>
    %1060 = arith.mulf %1058, %1059 : vector<8x256xf32>
    %1061 = arith.addf %1049, %1060 : vector<8x256xf32>
    %c1_528 = arith.constant 1 : index
    %c21_529 = arith.constant 21 : index
    %c0_530 = arith.constant 0 : index
    %c0_531 = arith.constant 0 : index
    %1062 = vector.load %arg5[%c1_528, %c21_529, %c0_530, %c0_531] : memref<2x36x8x1xf32, #tpu.memory_space<vmem>>, vector<1x1x8x1xf32>
    %1063 = vector.shape_cast %1062 : vector<1x1x8x1xf32> to vector<8x1xf32>
    %1064 = vector.extract_strided_slice %1054 {offsets = [1, 0], sizes = [1, 256], strides = [1, 1]} : vector<4x256xf32> to vector<1x256xf32>
    %1065 = vector.broadcast %1063 : vector<8x1xf32> to vector<8x256xf32>
    %1066 = vector.broadcast %1064 : vector<1x256xf32> to vector<8x256xf32>
    %1067 = arith.mulf %1065, %1066 : vector<8x256xf32>
    %1068 = arith.addf %1061, %1067 : vector<8x256xf32>
    %c1_532 = arith.constant 1 : index
    %c22_533 = arith.constant 22 : index
    %c0_534 = arith.constant 0 : index
    %c0_535 = arith.constant 0 : index
    %1069 = vector.load %arg5[%c1_532, %c22_533, %c0_534, %c0_535] : memref<2x36x8x1xf32, #tpu.memory_space<vmem>>, vector<1x1x8x1xf32>
    %1070 = vector.shape_cast %1069 : vector<1x1x8x1xf32> to vector<8x1xf32>
    %1071 = vector.extract_strided_slice %1054 {offsets = [2, 0], sizes = [1, 256], strides = [1, 1]} : vector<4x256xf32> to vector<1x256xf32>
    %1072 = vector.broadcast %1070 : vector<8x1xf32> to vector<8x256xf32>
    %1073 = vector.broadcast %1071 : vector<1x256xf32> to vector<8x256xf32>
    %1074 = arith.mulf %1072, %1073 : vector<8x256xf32>
    %1075 = arith.addf %1068, %1074 : vector<8x256xf32>
    %c1_536 = arith.constant 1 : index
    %c23_537 = arith.constant 23 : index
    %c0_538 = arith.constant 0 : index
    %c0_539 = arith.constant 0 : index
    %1076 = vector.load %arg5[%c1_536, %c23_537, %c0_538, %c0_539] : memref<2x36x8x1xf32, #tpu.memory_space<vmem>>, vector<1x1x8x1xf32>
    %1077 = vector.shape_cast %1076 : vector<1x1x8x1xf32> to vector<8x1xf32>
    %1078 = vector.extract_strided_slice %1054 {offsets = [3, 0], sizes = [1, 256], strides = [1, 1]} : vector<4x256xf32> to vector<1x256xf32>
    %1079 = vector.broadcast %1077 : vector<8x1xf32> to vector<8x256xf32>
    %1080 = vector.broadcast %1078 : vector<1x256xf32> to vector<8x256xf32>
    %1081 = arith.mulf %1079, %1080 : vector<8x256xf32>
    %1082 = arith.addf %1075, %1081 : vector<8x256xf32>
    %cst_540 = arith.constant 0.000000e+00 : f32
    %1083 = vector.broadcast %cst_540 : f32 to vector<4x15xf32>
    %1084 = vector.extract_strided_slice %892 {offsets = [0, 15], sizes = [4, 241], strides = [1, 1]} : vector<4x256xf32> to vector<4x241xf32>
    %1085 = tpu.concatenate %1084, %1083 in 1 : vector<4x241xf32>, vector<4x15xf32> -> vector<4x256xf32>
    %1086 = vector.broadcast %1 : vector<1x256xf32> to vector<4x256xf32>
    %1087 = arith.mulf %1085, %1086 : vector<4x256xf32>
    %c1_541 = arith.constant 1 : index
    %c24_542 = arith.constant 24 : index
    %c0_543 = arith.constant 0 : index
    %c0_544 = arith.constant 0 : index
    %1088 = vector.load %arg5[%c1_541, %c24_542, %c0_543, %c0_544] : memref<2x36x8x1xf32, #tpu.memory_space<vmem>>, vector<1x1x8x1xf32>
    %1089 = vector.shape_cast %1088 : vector<1x1x8x1xf32> to vector<8x1xf32>
    %1090 = vector.extract_strided_slice %1087 {offsets = [0, 0], sizes = [1, 256], strides = [1, 1]} : vector<4x256xf32> to vector<1x256xf32>
    %1091 = vector.broadcast %1089 : vector<8x1xf32> to vector<8x256xf32>
    %1092 = vector.broadcast %1090 : vector<1x256xf32> to vector<8x256xf32>
    %1093 = arith.mulf %1091, %1092 : vector<8x256xf32>
    %1094 = arith.addf %1082, %1093 : vector<8x256xf32>
    %c1_545 = arith.constant 1 : index
    %c25_546 = arith.constant 25 : index
    %c0_547 = arith.constant 0 : index
    %c0_548 = arith.constant 0 : index
    %1095 = vector.load %arg5[%c1_545, %c25_546, %c0_547, %c0_548] : memref<2x36x8x1xf32, #tpu.memory_space<vmem>>, vector<1x1x8x1xf32>
    %1096 = vector.shape_cast %1095 : vector<1x1x8x1xf32> to vector<8x1xf32>
    %1097 = vector.extract_strided_slice %1087 {offsets = [1, 0], sizes = [1, 256], strides = [1, 1]} : vector<4x256xf32> to vector<1x256xf32>
    %1098 = vector.broadcast %1096 : vector<8x1xf32> to vector<8x256xf32>
    %1099 = vector.broadcast %1097 : vector<1x256xf32> to vector<8x256xf32>
    %1100 = arith.mulf %1098, %1099 : vector<8x256xf32>
    %1101 = arith.addf %1094, %1100 : vector<8x256xf32>
    %c1_549 = arith.constant 1 : index
    %c26_550 = arith.constant 26 : index
    %c0_551 = arith.constant 0 : index
    %c0_552 = arith.constant 0 : index
    %1102 = vector.load %arg5[%c1_549, %c26_550, %c0_551, %c0_552] : memref<2x36x8x1xf32, #tpu.memory_space<vmem>>, vector<1x1x8x1xf32>
    %1103 = vector.shape_cast %1102 : vector<1x1x8x1xf32> to vector<8x1xf32>
    %1104 = vector.extract_strided_slice %1087 {offsets = [2, 0], sizes = [1, 256], strides = [1, 1]} : vector<4x256xf32> to vector<1x256xf32>
    %1105 = vector.broadcast %1103 : vector<8x1xf32> to vector<8x256xf32>
    %1106 = vector.broadcast %1104 : vector<1x256xf32> to vector<8x256xf32>
    %1107 = arith.mulf %1105, %1106 : vector<8x256xf32>
    %1108 = arith.addf %1101, %1107 : vector<8x256xf32>
    %c1_553 = arith.constant 1 : index
    %c27_554 = arith.constant 27 : index
    %c0_555 = arith.constant 0 : index
    %c0_556 = arith.constant 0 : index
    %1109 = vector.load %arg5[%c1_553, %c27_554, %c0_555, %c0_556] : memref<2x36x8x1xf32, #tpu.memory_space<vmem>>, vector<1x1x8x1xf32>
    %1110 = vector.shape_cast %1109 : vector<1x1x8x1xf32> to vector<8x1xf32>
    %1111 = vector.extract_strided_slice %1087 {offsets = [3, 0], sizes = [1, 256], strides = [1, 1]} : vector<4x256xf32> to vector<1x256xf32>
    %1112 = vector.broadcast %1110 : vector<8x1xf32> to vector<8x256xf32>
    %1113 = vector.broadcast %1111 : vector<1x256xf32> to vector<8x256xf32>
    %1114 = arith.mulf %1112, %1113 : vector<8x256xf32>
    %1115 = arith.addf %1108, %1114 : vector<8x256xf32>
    %cst_557 = arith.constant 0.000000e+00 : f32
    %1116 = vector.broadcast %cst_557 : f32 to vector<4x16xf32>
    %1117 = vector.extract_strided_slice %892 {offsets = [0, 16], sizes = [4, 240], strides = [1, 1]} : vector<4x256xf32> to vector<4x240xf32>
    %1118 = tpu.concatenate %1117, %1116 in 1 : vector<4x240xf32>, vector<4x16xf32> -> vector<4x256xf32>
    %c1_558 = arith.constant 1 : index
    %c28_559 = arith.constant 28 : index
    %c0_560 = arith.constant 0 : index
    %c0_561 = arith.constant 0 : index
    %1119 = vector.load %arg5[%c1_558, %c28_559, %c0_560, %c0_561] : memref<2x36x8x1xf32, #tpu.memory_space<vmem>>, vector<1x1x8x1xf32>
    %1120 = vector.shape_cast %1119 : vector<1x1x8x1xf32> to vector<8x1xf32>
    %1121 = vector.extract_strided_slice %1118 {offsets = [0, 0], sizes = [1, 256], strides = [1, 1]} : vector<4x256xf32> to vector<1x256xf32>
    %1122 = vector.broadcast %1120 : vector<8x1xf32> to vector<8x256xf32>
    %1123 = vector.broadcast %1121 : vector<1x256xf32> to vector<8x256xf32>
    %1124 = arith.mulf %1122, %1123 : vector<8x256xf32>
    %1125 = arith.addf %1115, %1124 : vector<8x256xf32>
    %c1_562 = arith.constant 1 : index
    %c29_563 = arith.constant 29 : index
    %c0_564 = arith.constant 0 : index
    %c0_565 = arith.constant 0 : index
    %1126 = vector.load %arg5[%c1_562, %c29_563, %c0_564, %c0_565] : memref<2x36x8x1xf32, #tpu.memory_space<vmem>>, vector<1x1x8x1xf32>
    %1127 = vector.shape_cast %1126 : vector<1x1x8x1xf32> to vector<8x1xf32>
    %1128 = vector.extract_strided_slice %1118 {offsets = [1, 0], sizes = [1, 256], strides = [1, 1]} : vector<4x256xf32> to vector<1x256xf32>
    %1129 = vector.broadcast %1127 : vector<8x1xf32> to vector<8x256xf32>
    %1130 = vector.broadcast %1128 : vector<1x256xf32> to vector<8x256xf32>
    %1131 = arith.mulf %1129, %1130 : vector<8x256xf32>
    %1132 = arith.addf %1125, %1131 : vector<8x256xf32>
    %c1_566 = arith.constant 1 : index
    %c30_567 = arith.constant 30 : index
    %c0_568 = arith.constant 0 : index
    %c0_569 = arith.constant 0 : index
    %1133 = vector.load %arg5[%c1_566, %c30_567, %c0_568, %c0_569] : memref<2x36x8x1xf32, #tpu.memory_space<vmem>>, vector<1x1x8x1xf32>
    %1134 = vector.shape_cast %1133 : vector<1x1x8x1xf32> to vector<8x1xf32>
    %1135 = vector.extract_strided_slice %1118 {offsets = [2, 0], sizes = [1, 256], strides = [1, 1]} : vector<4x256xf32> to vector<1x256xf32>
    %1136 = vector.broadcast %1134 : vector<8x1xf32> to vector<8x256xf32>
    %1137 = vector.broadcast %1135 : vector<1x256xf32> to vector<8x256xf32>
    %1138 = arith.mulf %1136, %1137 : vector<8x256xf32>
    %1139 = arith.addf %1132, %1138 : vector<8x256xf32>
    %c1_570 = arith.constant 1 : index
    %c31_571 = arith.constant 31 : index
    %c0_572 = arith.constant 0 : index
    %c0_573 = arith.constant 0 : index
    %1140 = vector.load %arg5[%c1_570, %c31_571, %c0_572, %c0_573] : memref<2x36x8x1xf32, #tpu.memory_space<vmem>>, vector<1x1x8x1xf32>
    %1141 = vector.shape_cast %1140 : vector<1x1x8x1xf32> to vector<8x1xf32>
    %1142 = vector.extract_strided_slice %1118 {offsets = [3, 0], sizes = [1, 256], strides = [1, 1]} : vector<4x256xf32> to vector<1x256xf32>
    %1143 = vector.broadcast %1141 : vector<8x1xf32> to vector<8x256xf32>
    %1144 = vector.broadcast %1142 : vector<1x256xf32> to vector<8x256xf32>
    %1145 = arith.mulf %1143, %1144 : vector<8x256xf32>
    %1146 = arith.addf %1139, %1145 : vector<8x256xf32>
    %cst_574 = arith.constant 0.000000e+00 : f32
    %1147 = vector.broadcast %cst_574 : f32 to vector<4x17xf32>
    %1148 = vector.extract_strided_slice %892 {offsets = [0, 17], sizes = [4, 239], strides = [1, 1]} : vector<4x256xf32> to vector<4x239xf32>
    %1149 = tpu.concatenate %1148, %1147 in 1 : vector<4x239xf32>, vector<4x17xf32> -> vector<4x256xf32>
    %1150 = vector.broadcast %3 : vector<1x256xf32> to vector<4x256xf32>
    %1151 = arith.mulf %1149, %1150 : vector<4x256xf32>
    %c1_575 = arith.constant 1 : index
    %c32_576 = arith.constant 32 : index
    %c0_577 = arith.constant 0 : index
    %c0_578 = arith.constant 0 : index
    %1152 = vector.load %arg5[%c1_575, %c32_576, %c0_577, %c0_578] : memref<2x36x8x1xf32, #tpu.memory_space<vmem>>, vector<1x1x8x1xf32>
    %1153 = vector.shape_cast %1152 : vector<1x1x8x1xf32> to vector<8x1xf32>
    %1154 = vector.extract_strided_slice %1151 {offsets = [0, 0], sizes = [1, 256], strides = [1, 1]} : vector<4x256xf32> to vector<1x256xf32>
    %1155 = vector.broadcast %1153 : vector<8x1xf32> to vector<8x256xf32>
    %1156 = vector.broadcast %1154 : vector<1x256xf32> to vector<8x256xf32>
    %1157 = arith.mulf %1155, %1156 : vector<8x256xf32>
    %1158 = arith.addf %1146, %1157 : vector<8x256xf32>
    %c1_579 = arith.constant 1 : index
    %c33_580 = arith.constant 33 : index
    %c0_581 = arith.constant 0 : index
    %c0_582 = arith.constant 0 : index
    %1159 = vector.load %arg5[%c1_579, %c33_580, %c0_581, %c0_582] : memref<2x36x8x1xf32, #tpu.memory_space<vmem>>, vector<1x1x8x1xf32>
    %1160 = vector.shape_cast %1159 : vector<1x1x8x1xf32> to vector<8x1xf32>
    %1161 = vector.extract_strided_slice %1151 {offsets = [1, 0], sizes = [1, 256], strides = [1, 1]} : vector<4x256xf32> to vector<1x256xf32>
    %1162 = vector.broadcast %1160 : vector<8x1xf32> to vector<8x256xf32>
    %1163 = vector.broadcast %1161 : vector<1x256xf32> to vector<8x256xf32>
    %1164 = arith.mulf %1162, %1163 : vector<8x256xf32>
    %1165 = arith.addf %1158, %1164 : vector<8x256xf32>
    %c1_583 = arith.constant 1 : index
    %c34_584 = arith.constant 34 : index
    %c0_585 = arith.constant 0 : index
    %c0_586 = arith.constant 0 : index
    %1166 = vector.load %arg5[%c1_583, %c34_584, %c0_585, %c0_586] : memref<2x36x8x1xf32, #tpu.memory_space<vmem>>, vector<1x1x8x1xf32>
    %1167 = vector.shape_cast %1166 : vector<1x1x8x1xf32> to vector<8x1xf32>
    %1168 = vector.extract_strided_slice %1151 {offsets = [2, 0], sizes = [1, 256], strides = [1, 1]} : vector<4x256xf32> to vector<1x256xf32>
    %1169 = vector.broadcast %1167 : vector<8x1xf32> to vector<8x256xf32>
    %1170 = vector.broadcast %1168 : vector<1x256xf32> to vector<8x256xf32>
    %1171 = arith.mulf %1169, %1170 : vector<8x256xf32>
    %1172 = arith.addf %1165, %1171 : vector<8x256xf32>
    %c1_587 = arith.constant 1 : index
    %c35_588 = arith.constant 35 : index
    %c0_589 = arith.constant 0 : index
    %c0_590 = arith.constant 0 : index
    %1173 = vector.load %arg5[%c1_587, %c35_588, %c0_589, %c0_590] : memref<2x36x8x1xf32, #tpu.memory_space<vmem>>, vector<1x1x8x1xf32>
    %1174 = vector.shape_cast %1173 : vector<1x1x8x1xf32> to vector<8x1xf32>
    %1175 = vector.extract_strided_slice %1151 {offsets = [3, 0], sizes = [1, 256], strides = [1, 1]} : vector<4x256xf32> to vector<1x256xf32>
    %1176 = vector.broadcast %1174 : vector<8x1xf32> to vector<8x256xf32>
    %1177 = vector.broadcast %1175 : vector<1x256xf32> to vector<8x256xf32>
    %1178 = arith.mulf %1176, %1177 : vector<8x256xf32>
    %1179 = arith.addf %1172, %1178 : vector<8x256xf32>
    %c1_591 = arith.constant 1 : index
    %c0_592 = arith.constant 0 : index
    %c0_593 = arith.constant 0 : index
    %1180 = vector.load %arg6[%c1_591, %c0_592, %c0_593] : memref<2x8x1xf32, #tpu.memory_space<vmem>>, vector<1x8x1xf32>
    %1181 = vector.shape_cast %1180 : vector<1x8x1xf32> to vector<8x1xf32>
    %1182 = vector.broadcast %1181 : vector<8x1xf32> to vector<8x256xf32>
    %1183 = arith.addf %1179, %1182 : vector<8x256xf32>
    %1184 = vector.extract_strided_slice %1183 {offsets = [0, 0], sizes = [4, 256], strides = [1, 1]} : vector<8x256xf32> to vector<4x256xf32>
    %cst_594 = arith.constant 5.000000e-01 : f32
    %1185 = vector.broadcast %cst_594 : f32 to vector<4x256xf32>
    %1186 = arith.mulf %1185, %1184 : vector<4x256xf32>
    %1187 = math.tanh %1186 : vector<4x256xf32>
    %cst_595 = arith.constant 1.000000e+00 : f32
    %1188 = vector.broadcast %cst_595 : f32 to vector<4x256xf32>
    %1189 = arith.mulf %1188, %1187 : vector<4x256xf32>
    %1190 = math.exp %1189 : vector<4x256xf32>
    %1191 = arith.mulf %600, %1190 : vector<4x256xf32>
    %1192 = vector.extract_strided_slice %1183 {offsets = [4, 0], sizes = [4, 256], strides = [1, 1]} : vector<8x256xf32> to vector<4x256xf32>
    %1193 = arith.addf %1191, %1192 : vector<4x256xf32>
    %c0_596 = arith.constant 0 : index
    %c0_597 = arith.constant 0 : index
    %c0_598 = arith.constant 0 : index
    %1194 = vector.load %arg7[%c0_596, %c0_597, %c0_598] : memref<1x8x256xf32, #tpu.memory_space<vmem>>, vector<1x4x256xf32>
    %1195 = vector.shape_cast %1194 : vector<1x4x256xf32> to vector<4x256xf32>
    %1196 = vector.shape_cast %892 : vector<4x256xf32> to vector<1x4x256xf32>
    tpu.vector_store %arg7[%c0_596, %c0_597, %c0_598], %1196 {strides = array<i32>} : memref<1x8x256xf32, #tpu.memory_space<vmem>>, vector<1x4x256xf32>,
    %c0_599 = arith.constant 0 : index
    %c4_600 = arith.constant 4 : index
    %c0_601 = arith.constant 0 : index
    %1197 = vector.load %arg7[%c0_599, %c4_600, %c0_601] : memref<1x8x256xf32, #tpu.memory_space<vmem>>, vector<1x4x256xf32>
    %1198 = vector.shape_cast %1197 : vector<1x4x256xf32> to vector<4x256xf32>
    %1199 = vector.shape_cast %1193 : vector<4x256xf32> to vector<1x4x256xf32>
    tpu.vector_store %arg7[%c0_599, %c4_600, %c0_601], %1199 {strides = array<i32>} : memref<1x8x256xf32, #tpu.memory_space<vmem>>, vector<1x4x256xf32>,
    return
  }
  func.func @transform_0(%arg0: i32) -> (i32, i32, i32) {
    %c0_i32 = arith.constant 0 : i32
    %c0_i32_0 = arith.constant 0 : i32
    %c0_i32_1 = arith.constant 0 : i32
    %c0_i32_2 = arith.constant 0 : i32
    return %c0_i32, %c0_i32_0, %c0_i32_1 : i32, i32, i32
  }
  func.func @transform_1(%arg0: i32) -> (i32, i32, i32) {
    %c0_i32 = arith.constant 0 : i32
    %c0_i32_0 = arith.constant 0 : i32
    %c0_i32_1 = arith.constant 0 : i32
    return %arg0, %c0_i32, %c0_i32_0 : i32, i32, i32
  }
  func.func @transform_2(%arg0: i32) -> (i32, i32, i32, i32) {
    %c0_i32 = arith.constant 0 : i32
    %c0_i32_0 = arith.constant 0 : i32
    %c0_i32_1 = arith.constant 0 : i32
    %c0_i32_2 = arith.constant 0 : i32
    %c0_i32_3 = arith.constant 0 : i32
    return %c0_i32, %c0_i32_0, %c0_i32_1, %c0_i32_2 : i32, i32, i32, i32
  }
  func.func @transform_3(%arg0: i32) -> (i32, i32, i32) {
    %c0_i32 = arith.constant 0 : i32
    %c0_i32_0 = arith.constant 0 : i32
    %c0_i32_1 = arith.constant 0 : i32
    %c0_i32_2 = arith.constant 0 : i32
    return %c0_i32, %c0_i32_0, %c0_i32_1 : i32, i32, i32
  }
  func.func @transform_4(%arg0: i32) -> (i32, i32, i32, i32) {
    %c0_i32 = arith.constant 0 : i32
    %c0_i32_0 = arith.constant 0 : i32
    %c0_i32_1 = arith.constant 0 : i32
    %c0_i32_2 = arith.constant 0 : i32
    %c0_i32_3 = arith.constant 0 : i32
    return %c0_i32, %c0_i32_0, %c0_i32_1, %c0_i32_2 : i32, i32, i32, i32
  }
  func.func @transform_5(%arg0: i32) -> (i32, i32, i32) {
    %c0_i32 = arith.constant 0 : i32
    %c0_i32_0 = arith.constant 0 : i32
    %c0_i32_1 = arith.constant 0 : i32
    %c0_i32_2 = arith.constant 0 : i32
    return %c0_i32, %c0_i32_0, %c0_i32_1 : i32, i32, i32
  }
  func.func @transform_6(%arg0: i32) -> (i32, i32, i32) {
    %c0_i32 = arith.constant 0 : i32
    %c0_i32_0 = arith.constant 0 : i32
    %c0_i32_1 = arith.constant 0 : i32
    return %arg0, %c0_i32, %c0_i32_0 : i32, i32, i32
  }
}

</mosaic_0001>

<bundles_post_ra>
// kernel: invnet_forward.1
= control target key start
LH: loop header
LB: loop body
LE: loop exit
PB: predicated region body
PF: predicated region fallthrough
CT: control target
= control target key end

     0   :  { %s3709_s21 = smov 0   ;;  %s5161_s0 = inlined_call_operand.vmem [shape: f32[2,1,256], index: 0, kind: input, shape index: {}]   ;;  %s5162_s1 = inlined_call_operand.vmem [shape: f32[2,8,256], index: 1, kind: input, shape index: {}]   ;;  %s5163_s2 = inlined_call_operand.vmem [shape: f32[2,36,4,1], index: 2, kind: input, shape index: {}]   ;;  %s5164_s3 = inlined_call_operand.vmem [shape: f32[2,4,1], index: 3, kind: input, shape index: {}]   ;;  %s5165_s4 = inlined_call_operand.vmem [shape: f32[2,36,8,1], index: 4, kind: input, shape index: {}]   ;;  %s5166_s5 = inlined_call_operand.vmem [shape: f32[2,8,1], index: 5, kind: input, shape index: {}]   ;;  %s5167_s6 = inlined_call_operand.vmem [shape: f32[2,8,256], index: 6, kind: output, shape index: {}]  }
   0x1 LB: > { %s3462_s22 = sadd.s32 4294967295, %s3663_s21   ;;  %p3466_p0 = scmp.ge.s32.totalorder %s3663_s21, 1  ;;  %s3663_s21 = sphi %s3709_s21, %s16_s21  }
   0x2   : > { %p212_p1 = scmp.lt.s32.totalorder %s3663_s21, 3 }
   0x4   : > { %p213_p2 = pnand %p3466_p0, %p212_p1 }
   0x5   : > { %v283_v0 = vld [vmem:[%s5163_s2] sm:$0xf] (!%p213_p2)  ;;  %p242_p3 = scmp.lt.s32.totalorder (!%p213_p2), %s3462_s22, 1  ;;  %v3665_v1 = vmov (!%p213_p2), 0   ;;  %v3472_v2 = vld [vmem:[%s5163_s2 + $0x4] sm:$0xf] (!%p213_p2)  ;;  %v271_v49 = vlaneseq (!%p213_p2) }
   0x6   : > { %216 = sbr.rel (%p213_p2) target bundleno = 956 (0x3bc), region = 44  ;;  %3637 = vset.pattern.permute.xlu1 (!%p213_p2), %v3665_v1  ;;  %3638 = vset.pattern.permute.xlu0 (!%p213_p2), %v3665_v1  ;;  %v3474_v6 = vld [vmem:[%s5163_s2 + $0xc] sm:$0xf] (!%p213_p2)  ;;  %s3666_s9 = smov (!%p213_p2), 17   ;;  %v3473_v8 = vld [vmem:[%s5163_s2 + $0x8] sm:$0xf] (!%p213_p2) }
   0x7   : > { %286 = vperm.xlu1 (!%p213_p2), %3637, %v283_v0   ;;  %s3667_s10 = smov (!%p213_p2), 16   ;;  %v3475_v9 = vld [vmem:[%s5163_s2 + $0x10] sm:$0xf] (!%p213_p2)  ;;  %v3477_v10 = vld [vmem:[%s5163_s2 + $0x18] sm:$0xf] (!%p213_p2)  ;;  %s3668_s19 = smov (!%p213_p2), 15  }
   0x8   : > { %v3476_v11 = vld [vmem:[%s5163_s2 + $0x14] sm:$0xf] (!%p213_p2)  ;;  %v3478_v12 = vld [vmem:[%s5163_s2 + $0x1c] sm:$0xf] (!%p213_p2)  ;;  %v3479_v13 = vld [vmem:[%s5163_s2 + $0x20] sm:$0xf] (!%p213_p2) }
   0x9   : > { %v3481_v14 = vld [vmem:[%s5163_s2 + $0x28] sm:$0xf] (!%p213_p2)  ;;  %v3480_v15 = vld [vmem:[%s5163_s2 + $0x24] sm:$0xf] (!%p213_p2)  ;;  %s3669_s8 = smov (!%p213_p2), 1   ;;  %s3670_s11 = smov (!%p213_p2), 127  }
   0xa   : > { %v3482_v16 = vld [vmem:[%s5163_s2 + $0x2c] sm:$0xf] (!%p213_p2)  ;;  %v3483_v17 = vld [vmem:[%s5163_s2 + $0x30] sm:$0xf] (!%p213_p2)  ;;  %v3485_v18 = vld [vmem:[%s5163_s2 + $0x38] sm:$0xf] (!%p213_p2) }
   0xb   : > { %303 = vperm.xlu1 (!%p213_p2), %3637, %v3472_v2   ;;  %v3484_v19 = vld [vmem:[%s5163_s2 + $0x34] sm:$0xf] (!%p213_p2)  ;;  %v3487_v20 = vld [vmem:[%s5163_s2 + $0x40] sm:$0xf] (!%p213_p2)  ;;  %v3486_v21 = vld [vmem:[%s5163_s2 + $0x3c] sm:$0xf] (!%p213_p2) }
   0xc   : > { %v3489_v22 = vld [vmem:[%s5163_s2 + $0x48] sm:$0xf] (!%p213_p2)  ;;  %v3488_v23 = vld [vmem:[%s5163_s2 + $0x44] sm:$0xf] (!%p213_p2)  ;;  %v3490_v24 = vld [vmem:[%s5163_s2 + $0x4c] sm:$0xf] (!%p213_p2) }
   0xd   : > { %s5169_s22 = smov (!%p242_p3, %s3462_s22), 1  ;;  %v3491_v25 = vld [vmem:[%s5163_s2 + $0x50] sm:$0xf]  ;;  %v3493_v26 = vld [vmem:[%s5163_s2 + $0x58] sm:$0xf]  ;;  %s3671_s23 = smov 113  }
   0xe   : > { %s3618_s27 = sshll.u32 %s5169_s22, 4  ;;  %v3492_v27 = vld [vmem:[%s5163_s2 + $0x54] sm:$0xf]  ;;  %v3494_v28 = vld [vmem:[%s5163_s2 + $0x5c] sm:$0xf]  ;;  %s3672_s14 = smov 112  }
   0xf   : > { %s3731_s30 = scalar_lea.vmem %s5162_s1, %s3618_s27  ;;  %341 = vperm.xlu1 %3637, %v3474_v6   ;;  %v3495_v29 = vld [vmem:[%s5163_s2 + $0x60] sm:$0xf]  ;;  %v3497_v30 = vld [vmem:[%s5163_s2 + $0x68] sm:$0xf]  ;;  %v3496_v31 = vld [vmem:[%s5163_s2 + $0x64] sm:$0xf]  ;;  %s4838_s12 = scalar_lea.vmem %s5167_s6, %s3618_s27 }
  0x10   : > { %v3734_v3 = vld [vmem:[%s3731_s30] sm:$0xff]  ;;  %v3737_v4 = vld [vmem:[%s3731_s30 + $0x8] sm:$0xff]  ;;  %v3499_v33 = vld [vmem:[%s5163_s2 + $0x70] sm:$0xf]  ;;  %s3673_s28 = smov 111   ;;  %v3894_v51 = vshrl.u32 %v271_v49, 7 }
  0x11   : > { %v259_v5 = vrot.slane %v3734_v3, 4  ;;  %v260_v7 = vrot.slane %v3737_v4, 4  ;;  %v3498_v32 = vld [vmem:[%s5163_s2 + $0x6c] sm:$0xf]  ;;  %v3501_v34 = vld [vmem:[%s5163_s2 + $0x78] sm:$0xf] }
  0x12   : > { %v3500_v35 = vld [vmem:[%s5163_s2 + $0x74] sm:$0xf]  ;;  %v3502_v36 = vld [vmem:[%s5163_s2 + $0x7c] sm:$0xf]  ;;  %v3503_v37 = vld [vmem:[%s5163_s2 + $0x80] sm:$0xf] }
  0x13   : > { %261 = vrot.lane.b32.xlu0 %v259_v5, %s3666_s9  ;;  %356 = vrot.lane.b32.xlu1 %v259_v5, %s3667_s10  ;;  %v3505_v38 = vld [vmem:[%s5163_s2 + $0x88] sm:$0xf]  ;;  %v3504_v39 = vld [vmem:[%s5163_s2 + $0x84] sm:$0xf]  ;;  %v3900_v54 = vsub.s32 1, %v3894_v51  ;;  %v3906_v56 = vsub.s32 0, %v3894_v51 }
  0x14   : > { %v1048_v40 = vld [vmem:[%s5164_s3] sm:$0xf]  ;;  %v3506_v41 = vld [vmem:[%s5163_s2 + $0x8c] sm:$0xf]  ;;  %v3509_v44 = vld [vmem:[%s5165_s4 + $0x18] sm:$0xff]  ;;  %vm265_vm0 = vcmask 138240  }
  0x15   : > { %v3507_v42 = vld [vmem:[%s5165_s4 + $0x8] sm:$0xff]  ;;  %v1070_v43 = vld [vmem:[%s5165_s4] sm:$0xff]  ;;  %v3508_v45 = vld [vmem:[%s5165_s4 + $0x10] sm:$0xff]  ;;  %vm360_vm1 = vcmask 130048   ;;  %vm445_vm2 = vcmask 121856   ;;  %vm543_vm3 = vcmask 7168  }
  0x16   : > { %v3511_v46 = vld [vmem:[%s5165_s4 + $0x28] sm:$0xff]  ;;  %v3510_v47 = vld [vmem:[%s5165_s4 + $0x20] sm:$0xff]  ;;  %v3513_v48 = vld [vmem:[%s5165_s4 + $0x38] sm:$0xff]  ;;  %vm706_vm4 = vcmask 1039360   ;;  %vm793_vm5 = vcmask 924672   ;;  %vm880_vm6 = vcmask 916480  }
  0x17   : > { %263 = vrot.lane.b32.xlu0 %v260_v7, %s3666_s9  ;;  %369 = vperm.xlu1 %3637, %v3475_v9   ;;  %v3512_v50 = vld [vmem:[%s5165_s4 + $0x30] sm:$0xff]  ;;  %v3515_v53 = vld [vmem:[%s5165_s4 + $0x48] sm:$0xff]  ;;  %v3514_v55 = vld [vmem:[%s5165_s4 + $0x40] sm:$0xff]  ;;  %vm965_vm7 = vcmask 908288  }
  0x18   : > { %v3517_v57 = vld [vmem:[%s5165_s4 + $0x58] sm:$0xff]  ;;  %v252_v58 = vld [vmem:[%s5161_s0] sm:$0x3]  ;;  %v3516_v62 = vld [vmem:[%s5165_s4 + $0x50] sm:$0xff] }
  0x19   : > { %v3915_v61 = vrot.slane %v252_v58, %v3900_v54  ;;  %v3921_v63 = vrot.slane %v252_v58, %v3906_v56  ;;  %v3519_v1 = vld [vmem:[%s5165_s4 + $0x68] sm:$0xff]  ;;  %v3521_v9 = vld [vmem:[%s5165_s4 + $0x78] sm:$0xff] }
  0x1b   : > { %322 = vperm.xlu0 %3638, %v3473_v8   ;;  %407 = vperm.xlu1 %3637, %v3477_v10  }
  0x1f   : > { %358 = vrot.lane.b32.xlu0 %v260_v7, %s3667_s10  ;;  %441 = vrot.lane.b32.xlu1 %v259_v5, %s3668_s19 }
  0x23   : > { %388 = vperm.xlu0 %3638, %v3476_v11   ;;  %467 = vperm.xlu1 %3637, %v3479_v13   ;;  %v3520_v13 = vld [vmem:[%s5165_s4 + $0x70] sm:$0xff] }
  0x27   : > { %426 = vperm.xlu0 %3638, %v3478_v12   ;;  %505 = vperm.xlu1 %3637, %v3481_v14  }
  0x2b   : > { %443 = vrot.lane.b32.xlu0 %v260_v7, %s3668_s19  ;;  %539 = vrot.lane.b32.xlu1 %v259_v5, %s3669_s8 }
  0x2f   : > { %486 = vperm.xlu0 %3638, %v3480_v15   ;;  %554 = vperm.xlu1 %3637, %v3483_v17  }
  0x33   : > { %524 = vperm.xlu0 %3638, %v3482_v16   ;;  %592 = vperm.xlu1 %3637, %v3485_v18   ;;  %v3944_v16 = vsub.s32 2, %v3894_v51  ;;  %v3947_v18 = vsub.s32 3, %v3894_v51 }
  0x37   : > { %541 = vrot.lane.b32.xlu0 %v260_v7, %s3669_s8  ;;  %630 = vperm.xlu1 %3637, %v3487_v20   ;;  %v3518_v7 = vld [vmem:[%s5165_s4 + $0x60] sm:$0xff] }
  0x3b   : > { %573 = vperm.xlu0 %3638, %v3484_v19   ;;  %668 = vperm.xlu1 %3637, %v3489_v22   ;;  %v3522_v22 = vld [vmem:[%s5165_s4 + $0x80] sm:$0xff] }
  0x3f   : > { %611 = vperm.xlu0 %3638, %v3486_v21   ;;  %702 = vrot.lane.b32.xlu1 %v3734_v3, %s3670_s11 }
  0x43   : > { %649 = vperm.xlu0 %3638, %v3488_v23   ;;  %717 = vperm.xlu1 %3637, %v3491_v25  }
  0x47   : > { %687 = vperm.xlu0 %3638, %v3490_v24   ;;  %755 = vperm.xlu1 %3637, %v3493_v26  }
  0x4b   : > { %704 = vrot.lane.b32.xlu0 %v3737_v4, %s3670_s11  ;;  %789 = vrot.lane.b32.xlu1 %v3734_v3, %s3671_s23 }
  0x4f   : > { %736 = vperm.xlu0 %3638, %v3492_v27   ;;  %804 = vperm.xlu1 %3637, %v3495_v29  }
  0x53   : > { %774 = vperm.xlu0 %3638, %v3494_v28   ;;  %842 = vperm.xlu1 %3637, %v3497_v30  }
  0x57   : > { %791 = vrot.lane.b32.xlu0 %v3737_v4, %s3671_s23  ;;  %876 = vrot.lane.b32.xlu1 %v3734_v3, %s3672_s14 }
  0x5b   : > { %823 = vperm.xlu0 %3638, %v3496_v31   ;;  %889 = vperm.xlu1 %3637, %v3499_v33  }
  0x5f   : > { %861 = vperm.xlu0 %3638, %v3498_v32   ;;  %927 = vperm.xlu1 %3637, %v3501_v34  }
  0x63   : > { %878 = vrot.lane.b32.xlu0 %v3737_v4, %s3672_s14  ;;  %961 = vrot.lane.b32.xlu1 %v3734_v3, %s3673_s28 }
  0x67   : > { %908 = vperm.xlu0 %3638, %v3500_v35   ;;  %976 = vperm.xlu1 %3637, %v3503_v37  }
  0x6b   : > { %946 = vperm.xlu0 %3638, %v3502_v36   ;;  %1014 = vperm.xlu1 %3637, %v3505_v38  }
  0x6f   : > { %963 = vrot.lane.b32.xlu0 %v3737_v4, %s3673_s28  ;;  %1051 = vperm.xlu1 %3637, %v1048_v40   ;;  %v3471_v40 = vld [vmem:[%s5161_s0 + $0x2] sm:$0x3] }
  0x70   : > { %v3966_v49 = vrot.slane %v3471_v40, %v3906_v56 }
  0x73   : > { %995 = vperm.xlu0 %3638, %v3504_v39   ;;  %1090 = vperm.xlu1 %3637, %v3507_v42  }
  0x77   : > { %1033 = vperm.xlu0 %3638, %v3506_v41   ;;  %1128 = vperm.xlu1 %3637, %v3509_v44  }
  0x7b   : > { %1073 = vperm.xlu0 %3638, %v1070_v43   ;;  %1174 = vperm.xlu1 %3637, %v3511_v46  }
  0x7f   : > { %1109 = vperm.xlu0 %3638, %v3508_v45   ;;  %1212 = vperm.xlu1 %3637, %v3513_v48  }
  0x83   : > { %1155 = vperm.xlu0 %3638, %v3510_v47   ;;  %1260 = vperm.xlu1 %3637, %v3515_v53  }
  0x85   : > { %v262_v52 = vpop.permute.xlu0 %261 }
  0x86   : > { %v287_v60 = vpop.permute.xlu1 %286  ;;  %v269_v2 = vsel %vm265_vm0, 0.0, %v262_v52 }
  0x87   : > { %1193 = vperm.xlu0 %3638, %v3512_v50   ;;  %1298 = vperm.xlu1 %3637, %v3517_v57   ;;  %v281_v8 = vmul.f32 %v3921_v63, %v269_v2 }
  0x89   : > { %v264_v59 = vpop.permute.xlu0 %263  ;;  %v292_v14 = vrot.slane %v281_v8, %v3906_v56  ;;  %v309_v15 = vrot.slane %v281_v8, %v3900_v54  ;;  %v328_v24 = vrot.slane %v281_v8, %v3944_v16  ;;  %v347_v29 = vrot.slane %v281_v8, %v3947_v18 }
  0x8a   : > { %v266_v0 = vsel %vm265_vm0, %v262_v52, %v264_v59  ;;  %v304_v5 = vpop.permute.xlu1 %303 }
  0x8b   : > { %1241 = vperm.xlu0 %3638, %v3514_v55   ;;  %v282_v6 = vmul.f32 %v3915_v61, %v266_v0  ;;  %1346 = vperm.xlu1 %3637, %v3519_v1   ;;  %v314_v17 = vmul.f32 %v309_v15, %v304_v5  ;;  %v297_v23 = vmul.f32 %v292_v14, %v287_v60 }
  0x8c   : > { %v3975_v14 = vrot.slane %v3471_v40, %v3900_v54 }
  0x8d   : > { %v296_v11 = vrot.slane %v282_v6, %v3906_v56  ;;  %v313_v12 = vrot.slane %v282_v6, %v3900_v54  ;;  %v332_v25 = vrot.slane %v282_v6, %v3944_v16  ;;  %v316_v28 = vadd.f32 %v314_v17, %v297_v23 }
  0x8e   : > { %v342_v10 = vpop.permute.xlu1 %341  ;;  %v351_v37 = vrot.slane %v282_v6, %v3947_v18 }
  0x8f   : > { %1279 = vperm.xlu0 %3638, %v3516_v62   ;;  %1384 = vperm.xlu1 %3637, %v3521_v9   ;;  %v298_v20 = vmul.f32 %v296_v11, %v287_v60  ;;  %v315_v21 = vmul.f32 %v313_v12, %v304_v5  ;;  %v352_v34 = vmul.f32 %v347_v29, %v342_v10 }
  0x90   : > { %v353_v44 = vmul.f32 %v351_v37, %v342_v10 }
  0x91   : > { %v317_v33 = vadd.f32 %v315_v21, %v298_v20 }
  0x92   : > { %v357_v19 = vpop.permute.xlu1 %356 }
  0x93   : > { %1327 = vperm.xlu0 %3638, %v3518_v7   ;;  %v364_v26 = vsel %vm360_vm1, 0.0, %v357_v19 }
  0x94   : > { %v375_v36 = vrot.slane %v364_v26, %v3906_v56  ;;  %v394_v48 = vrot.slane %v364_v26, %v3900_v54  ;;  %v413_v57 = vrot.slane %v364_v26, %v3944_v16  ;;  %v432_v6 = vrot.slane %v364_v26, %v3947_v18 }
  0x96   : > { %v370_v32 = vpop.permute.xlu1 %369 }
  0x97   : > { %1365 = vperm.xlu0 %3638, %v3520_v13   ;;  %v380_v47 = vmul.f32 %v375_v36, %v370_v32 }
  0x9a   : > { %v323_v27 = vpop.permute.xlu0 %322  ;;  %v408_v43 = vpop.permute.xlu1 %407 }
  0x9b   : > { %v333_v30 = vmul.f32 %v328_v24, %v323_v27  ;;  %v334_v31 = vmul.f32 %v332_v25, %v323_v27  ;;  %1403 = vperm.xlu0 %3638, %v3522_v22   ;;  %v418_v1 = vmul.f32 %v413_v57, %v408_v43 }
  0x9d   : > { %v335_v35 = vadd.f32 %v333_v30, %v316_v28  ;;  %v336_v38 = vadd.f32 %v334_v31, %v317_v33 }
  0x9e   : > { %v359_v39 = vpop.permute.xlu0 %358  ;;  %v442_v59 = vpop.permute.xlu1 %441 }
  0x9f   : > { %v354_v41 = vadd.f32 %v352_v34, %v335_v35  ;;  %v361_v42 = vsel %vm360_vm1, %v357_v19, %v359_v39  ;;  %v355_v50 = vadd.f32 %v353_v44, %v336_v38  ;;  %v449_v0 = vsel %vm445_vm2, 0.0, %v442_v59 }
  0xa0   : > { %v379_v45 = vrot.slane %v361_v42, %v3906_v56  ;;  %v398_v46 = vrot.slane %v361_v42, %v3900_v54  ;;  %v461_v5 = vmul.f32 %v3966_v49, %v449_v0  ;;  %v417_v7 = vrot.slane %v361_v42, %v3944_v16 }
  0xa1   : > { %v382_v55 = vadd.f32 %v380_v47, %v354_v41  ;;  %v436_v17 = vrot.slane %v361_v42, %v3947_v18 }
  0xa2   : > { %v381_v52 = vmul.f32 %v379_v45, %v370_v32  ;;  %v389_v53 = vpop.permute.xlu0 %388  ;;  %v473_v11 = vrot.slane %v461_v5, %v3906_v56  ;;  %v468_v12 = vpop.permute.xlu1 %467  ;;  %v419_v15 = vmul.f32 %v417_v7, %v408_v43  ;;  %v492_v27 = vrot.slane %v461_v5, %v3900_v54 }
  0xa3   : > { %v399_v58 = vmul.f32 %v394_v48, %v389_v53  ;;  %v400_v62 = vmul.f32 %v398_v46, %v389_v53  ;;  %v511_v32 = vrot.slane %v461_v5, %v3944_v16  ;;  %v530_v41 = vrot.slane %v461_v5, %v3947_v18 }
  0xa4   : > { %v383_v60 = vadd.f32 %v381_v52, %v355_v50  ;;  %v478_v21 = vmul.f32 %v473_v11, %v468_v12  ;;  %v3994_v5 = vsub.s32 4, %v3894_v51 }
  0xa5   : > { %v401_v2 = vadd.f32 %v399_v58, %v382_v55 }
  0xa6   : > { %v427_v8 = vpop.permute.xlu0 %426  ;;  %v402_v13 = vadd.f32 %v400_v62, %v383_v60  ;;  %v506_v23 = vpop.permute.xlu1 %505 }
  0xa7   : > { %v420_v9 = vadd.f32 %v418_v1, %v401_v2  ;;  %v437_v10 = vmul.f32 %v432_v6, %v427_v8  ;;  %v438_v25 = vmul.f32 %v436_v17, %v427_v8  ;;  %v516_v38 = vmul.f32 %v511_v32, %v506_v23 }
  0xa8   : > { %v421_v24 = vadd.f32 %v419_v15, %v402_v13  ;;  %v4000_v15 = vsub.s32 5, %v3894_v51 }
  0xa9   : > { %v439_v20 = vadd.f32 %v437_v10, %v420_v9 }
  0xaa   : > { %v444_v19 = vpop.permute.xlu0 %443  ;;  %v540_v34 = vpop.permute.xlu1 %539  ;;  %v440_v35 = vadd.f32 %v438_v25, %v421_v24 }
  0xab   : > { %v446_v22 = vsel %vm445_vm2, %v442_v59, %v444_v19  ;;  %v480_v31 = vadd.f32 %v478_v21, %v439_v20  ;;  %v547_v37 = vsel %vm543_vm3, 0.0, %v540_v34 }
  0xac   : > { %v462_v26 = vmul.f32 %v3975_v14, %v446_v22  ;;  %v548_v40 = vmul.f32 %v547_v37, %v3921_v63 }
  0xae   : > { %v477_v28 = vrot.slane %v462_v26, %v3906_v56  ;;  %v496_v29 = vrot.slane %v462_v26, %v3900_v54  ;;  %v487_v30 = vpop.permute.xlu0 %486  ;;  %v515_v42 = vrot.slane %v462_v26, %v3944_v16  ;;  %v560_v48 = vrot.slane %v548_v40, %v3906_v56  ;;  %v555_v50 = vpop.permute.xlu1 %554 }
  0xaf   : > { %v497_v33 = vmul.f32 %v492_v27, %v487_v30  ;;  %v534_v0 = vrot.slane %v462_v26, %v3947_v18  ;;  %v579_v2 = vrot.slane %v548_v40, %v3900_v54  ;;  %v598_v11 = vrot.slane %v548_v40, %v3944_v16 }
  0xb0   : > { %v479_v36 = vmul.f32 %v477_v28, %v468_v12  ;;  %v498_v44 = vmul.f32 %v496_v29, %v487_v30  ;;  %v517_v53 = vmul.f32 %v515_v42, %v506_v23  ;;  %v565_v58 = vmul.f32 %v560_v48, %v555_v50 }
  0xb1   : > { %v499_v39 = vadd.f32 %v497_v33, %v480_v31  ;;  %v636_v23 = vrot.slane %v3734_v3, %v3994_v5  ;;  %v617_v24 = vrot.slane %v548_v40, %v3947_v18  ;;  %v655_v31 = vrot.slane %v3734_v3, %v4000_v15 }
  0xb2   : > { %v481_v43 = vadd.f32 %v479_v36, %v440_v35  ;;  %v525_v45 = vpop.permute.xlu0 %524  ;;  %v593_v60 = vpop.permute.xlu1 %592  ;;  %v4017_v48 = vsub.s32 7, %v3894_v51 }
  0xb3   : > { %v518_v46 = vadd.f32 %v516_v38, %v499_v39  ;;  %v535_v47 = vmul.f32 %v530_v41, %v525_v45  ;;  %v536_v6 = vmul.f32 %v534_v0, %v525_v45  ;;  %v603_v21 = vmul.f32 %v598_v11, %v593_v60 }
  0xb4   : > { %v500_v52 = vadd.f32 %v498_v44, %v481_v43  ;;  %v4012_v38 = vsub.s32 6, %v3894_v51  ;;  %v659_v41 = vrot.slane %v3737_v4, %v4000_v15  ;;  %v697_v51 = vrot.slane %v3737_v4, %v4017_v48 }
  0xb5   : > { %v537_v57 = vadd.f32 %v535_v47, %v518_v46 }
  0xb6   : > { %v542_v55 = vpop.permute.xlu0 %541  ;;  %v519_v62 = vadd.f32 %v517_v53, %v500_v52  ;;  %v631_v13 = vpop.permute.xlu1 %630  ;;  %v678_v52 = vrot.slane %v3737_v4, %v4012_v38 }
  0xb7   : > { %v544_v59 = vsel %vm543_vm3, %v540_v34, %v542_v55  ;;  %v567_v10 = vadd.f32 %v565_v58, %v537_v57  ;;  %v640_v34 = vrot.slane %v3737_v4, %v3994_v5  ;;  %v641_v36 = vmul.f32 %v636_v23, %v631_v13 }
  0xb8   : > { %v549_v1 = vmul.f32 %v544_v59, %v3915_v61  ;;  %v538_v17 = vadd.f32 %v536_v6, %v519_v62  ;;  %v693_v62 = vrot.slane %v3734_v3, %v4017_v48 }
  0xb9   : > { %v642_v46 = vmul.f32 %v640_v34, %v631_v13 }
  0xba   : > { %v564_v7 = vrot.slane %v549_v1, %v3906_v56  ;;  %v583_v8 = vrot.slane %v549_v1, %v3900_v54  ;;  %v574_v9 = vpop.permute.xlu0 %573  ;;  %v602_v19 = vrot.slane %v549_v1, %v3944_v16  ;;  %v669_v30 = vpop.permute.xlu1 %668  ;;  %v621_v35 = vrot.slane %v549_v1, %v3947_v18 }
  0xbb   : > { %v584_v12 = vmul.f32 %v579_v2, %v574_v9  ;;  %v680_v1 = vmul.f32 %v678_v52, %v669_v30 }
  0xbc   : > { %v566_v20 = vmul.f32 %v564_v7, %v555_v50  ;;  %v585_v26 = vmul.f32 %v583_v8, %v574_v9  ;;  %v604_v32 = vmul.f32 %v602_v19, %v593_v60  ;;  %v674_v50 = vrot.slane %v3734_v3, %v4012_v38 }
  0xbd   : > { %v586_v22 = vadd.f32 %v584_v12, %v567_v10 }
  0xbe   : > { %v568_v25 = vadd.f32 %v566_v20, %v538_v17  ;;  %v612_v27 = vpop.permute.xlu0 %611  ;;  %v703_v45 = vpop.permute.xlu1 %702  ;;  %v679_v0 = vmul.f32 %v674_v50, %v669_v30 }
  0xbf   : > { %v605_v28 = vadd.f32 %v603_v21, %v586_v22  ;;  %v622_v29 = vmul.f32 %v617_v24, %v612_v27  ;;  %v623_v40 = vmul.f32 %v621_v35, %v612_v27 }
  0xc0   : > { %v587_v33 = vadd.f32 %v585_v26, %v568_v25 }
  0xc1   : > { %v624_v37 = vadd.f32 %v622_v29, %v605_v28 }
  0xc2   : > { %v606_v39 = vadd.f32 %v604_v32, %v587_v33  ;;  %v650_v42 = vpop.permute.xlu0 %649  ;;  %v718_v59 = vpop.permute.xlu1 %717 }
  0xc3   : > { %v643_v43 = vadd.f32 %v641_v36, %v624_v37  ;;  %v660_v44 = vmul.f32 %v655_v31, %v650_v42  ;;  %v661_v55 = vmul.f32 %v659_v41, %v650_v42 }
  0xc4   : > { %v625_v47 = vadd.f32 %v623_v40, %v606_v39 }
  0xc5   : > { %v662_v58 = vadd.f32 %v660_v44, %v643_v43 }
  0xc6   : > { %v644_v53 = vadd.f32 %v642_v46, %v625_v47  ;;  %v688_v57 = vpop.permute.xlu0 %687  ;;  %v756_v9 = vpop.permute.xlu1 %755 }
  0xc7   : > { %v681_v6 = vadd.f32 %v679_v0, %v662_v58  ;;  %v698_v11 = vmul.f32 %v693_v62, %v688_v57  ;;  %v699_v17 = vmul.f32 %v697_v51, %v688_v57 }
  0xc8   : > { %v663_v60 = vadd.f32 %v661_v55, %v644_v53 }
  0xc9   : > { %v700_v25 = vadd.f32 %v698_v11, %v681_v6 }
  0xca   : > { %v705_v2 = vpop.permute.xlu0 %704  ;;  %v682_v10 = vadd.f32 %v680_v1, %v663_v60  ;;  %v790_v24 = vpop.permute.xlu1 %789 }
  0xcb   : > { %v707_v7 = vsel %vm706_vm4, %v703_v45, %v705_v2  ;;  %v710_v8 = vsel %vm706_vm4, %v705_v2, 0.0 }
  0xcc   : > { %v711_v12 = vmul.f32 %v707_v7, %v3966_v49  ;;  %v712_v13 = vmul.f32 %v710_v8, %v3975_v14  ;;  %v701_v26 = vadd.f32 %v699_v17, %v682_v10 }
  0xce   : > { %v723_v19 = vrot.slane %v711_v12, %v3994_v5  ;;  %v727_v20 = vrot.slane %v712_v13, %v3994_v5  ;;  %v737_v21 = vpop.permute.xlu0 %736  ;;  %v742_v22 = vrot.slane %v711_v12, %v4000_v15  ;;  %v746_v23 = vrot.slane %v712_v13, %v4000_v15  ;;  %v805_v36 = vpop.permute.xlu1 %804 }
  0xcf   : > { %v761_v29 = vrot.slane %v711_v12, %v4012_v38  ;;  %v765_v30 = vrot.slane %v712_v13, %v4012_v38  ;;  %v780_v42 = vrot.slane %v711_v12, %v4017_v48  ;;  %v784_v43 = vrot.slane %v712_v13, %v4017_v48 }
  0xd0   : > { %v728_v27 = vmul.f32 %v723_v19, %v718_v59  ;;  %v729_v28 = vmul.f32 %v727_v20, %v718_v59  ;;  %v747_v33 = vmul.f32 %v742_v22, %v737_v21  ;;  %v748_v34 = vmul.f32 %v746_v23, %v737_v21 }
  0xd1   : > { %v766_v40 = vmul.f32 %v761_v29, %v756_v9  ;;  %v767_v41 = vmul.f32 %v765_v30, %v756_v9 }
  0xd2   : > { %v730_v31 = vadd.f32 %v728_v27, %v700_v25  ;;  %v731_v32 = vadd.f32 %v729_v28, %v701_v26  ;;  %v775_v35 = vpop.permute.xlu0 %774  ;;  %v843_v52 = vpop.permute.xlu1 %842 }
  0xd3   : > { %v785_v57 = vmul.f32 %v780_v42, %v775_v35  ;;  %v786_v58 = vmul.f32 %v784_v43, %v775_v35 }
  0xd4   : > { %v749_v37 = vadd.f32 %v747_v33, %v730_v31  ;;  %v750_v39 = vadd.f32 %v748_v34, %v731_v32 }
  0xd6   : > { %v792_v44 = vpop.permute.xlu0 %791  ;;  %v768_v45 = vadd.f32 %v766_v40, %v749_v37  ;;  %v769_v46 = vadd.f32 %v767_v41, %v750_v39  ;;  %v877_v6 = vpop.permute.xlu1 %876 }
  0xd7   : > { %v794_v47 = vsel %vm793_vm5, %v790_v24, %v792_v44  ;;  %v797_v50 = vsel %vm793_vm5, %v792_v44, 0.0 }
  0xd8   : > { %v798_v53 = vmul.f32 %v794_v47, %v3921_v63  ;;  %v799_v55 = vmul.f32 %v797_v50, %v3915_v61  ;;  %v787_v0 = vadd.f32 %v785_v57, %v768_v45  ;;  %v788_v1 = vadd.f32 %v786_v58, %v769_v46 }
  0xda   : > { %v810_v59 = vrot.slane %v798_v53, %v3994_v5  ;;  %v814_v60 = vrot.slane %v799_v55, %v3994_v5  ;;  %v824_v62 = vpop.permute.xlu0 %823  ;;  %v829_v51 = vrot.slane %v798_v53, %v4000_v15  ;;  %v833_v2 = vrot.slane %v799_v55, %v4000_v15  ;;  %v890_v20 = vpop.permute.xlu1 %889 }
  0xdb   : > { %v848_v7 = vrot.slane %v798_v53, %v4012_v38  ;;  %v852_v8 = vrot.slane %v799_v55, %v4012_v38  ;;  %v867_v27 = vrot.slane %v798_v53, %v4017_v48  ;;  %v871_v28 = vrot.slane %v799_v55, %v4017_v48 }
  0xdc   : > { %v815_v9 = vmul.f32 %v810_v59, %v805_v36  ;;  %v816_v10 = vmul.f32 %v814_v60, %v805_v36  ;;  %v834_v13 = vmul.f32 %v829_v51, %v824_v62  ;;  %v835_v17 = vmul.f32 %v833_v2, %v824_v62 }
  0xdd   : > { %v853_v21 = vmul.f32 %v848_v7, %v843_v52  ;;  %v854_v22 = vmul.f32 %v852_v8, %v843_v52 }
  0xde   : > { %v817_v11 = vadd.f32 %v815_v9, %v787_v0  ;;  %v818_v12 = vadd.f32 %v816_v10, %v788_v1  ;;  %v862_v19 = vpop.permute.xlu0 %861  ;;  %v928_v36 = vpop.permute.xlu1 %927 }
  0xdf   : > { %v872_v32 = vmul.f32 %v867_v27, %v862_v19  ;;  %v873_v33 = vmul.f32 %v871_v28, %v862_v19 }
  0xe0   : > { %v836_v23 = vadd.f32 %v834_v13, %v817_v11  ;;  %v837_v24 = vadd.f32 %v835_v17, %v818_v12 }
  0xe2   : > { %v855_v25 = vadd.f32 %v853_v21, %v836_v23  ;;  %v856_v26 = vadd.f32 %v854_v22, %v837_v24  ;;  %v879_v29 = vpop.permute.xlu0 %878  ;;  %v962_v59 = vpop.permute.xlu1 %961 }
  0xe3   : > { %v881_v30 = vsel %vm880_vm6, %v877_v6, %v879_v29  ;;  %v884_v31 = vsel %vm880_vm6, %v879_v29, 0.0 }
  0xe4   : > { %v895_v34 = vrot.slane %v881_v30, %v3994_v5  ;;  %v899_v35 = vrot.slane %v884_v31, %v3994_v5  ;;  %v914_v37 = vrot.slane %v881_v30, %v4000_v15  ;;  %v918_v39 = vrot.slane %v884_v31, %v4000_v15 }
  0xe5   : > { %v874_v40 = vadd.f32 %v872_v32, %v855_v25  ;;  %v875_v41 = vadd.f32 %v873_v33, %v856_v26  ;;  %v933_v52 = vrot.slane %v881_v30, %v4012_v38  ;;  %v937_v53 = vrot.slane %v884_v31, %v4012_v38 }
  0xe6   : > { %v900_v42 = vmul.f32 %v895_v34, %v890_v20  ;;  %v901_v43 = vmul.f32 %v899_v35, %v890_v20  ;;  %v909_v44 = vpop.permute.xlu0 %908  ;;  %v952_v60 = vrot.slane %v881_v30, %v4017_v48  ;;  %v956_v62 = vrot.slane %v884_v31, %v4017_v48  ;;  %v977_v13 = vpop.permute.xlu1 %976 }
  0xe7   : > { %v919_v45 = vmul.f32 %v914_v37, %v909_v44  ;;  %v920_v46 = vmul.f32 %v918_v39, %v909_v44  ;;  %v938_v0 = vmul.f32 %v933_v52, %v928_v36  ;;  %v939_v1 = vmul.f32 %v937_v53, %v928_v36 }
  0xe8   : > { %v902_v47 = vadd.f32 %v900_v42, %v874_v40  ;;  %v903_v50 = vadd.f32 %v901_v43, %v875_v41 }
  0xea   : > { %v947_v55 = vpop.permute.xlu0 %946  ;;  %v921_v57 = vadd.f32 %v919_v45, %v902_v47  ;;  %v922_v58 = vadd.f32 %v920_v46, %v903_v50  ;;  %v1015_v33 = vpop.permute.xlu1 %1014 }
  0xeb   : > { %v957_v51 = vmul.f32 %v952_v60, %v947_v55  ;;  %v958_v2 = vmul.f32 %v956_v62, %v947_v55  ;;  %v3528_v60 = vld [vmem:[%s5165_s4 + $0xb0] sm:$0xff]  ;;  %v3530_v62 = vld [vmem:[%s5165_s4 + $0xc0] sm:$0xff] }
  0xec   : > { %v940_v7 = vadd.f32 %v938_v0, %v921_v57  ;;  %v941_v8 = vadd.f32 %v939_v1, %v922_v58  ;;  %v3523_v58 = vld [vmem:[%s5165_s4 + $0x88] sm:$0xff]  ;;  %v3532_v1 = vld [vmem:[%s5165_s4 + $0xd0] sm:$0xff] }
  0xed   : > { %v3527_v0 = vld [vmem:[%s5165_s4 + $0xa8] sm:$0xff] }
  0xee   : > { %v964_v6 = vpop.permute.xlu0 %963  ;;  %v959_v21 = vadd.f32 %v957_v51, %v940_v7  ;;  %v960_v22 = vadd.f32 %v958_v2, %v941_v8  ;;  %v1052_v50 = vpop.permute.xlu1 %1051  ;;  %v3529_v51 = vld [vmem:[%s5165_s4 + $0xb8] sm:$0xff]  ;;  %v3531_v2 = vld [vmem:[%s5165_s4 + $0xc8] sm:$0xff]  ;;  %v3534_v7 = vld [vmem:[%s5165_s4 + $0xe0] sm:$0xff] }
  0xef   : > { %v966_v9 = vsel %vm965_vm7, %v962_v59, %v964_v6  ;;  %v969_v10 = vsel %vm965_vm7, %v964_v6, 0.0  ;;  %v3524_v59 = vld [vmem:[%s5165_s4 + $0x90] sm:$0xff]  ;;  %v3533_v6 = vld [vmem:[%s5165_s4 + $0xd8] sm:$0xff]  ;;  %v3535_v8 = vld [vmem:[%s5165_s4 + $0xe8] sm:$0xff] }
  0xf0   : > { %v970_v11 = vmul.f32 %v966_v9, %v3966_v49  ;;  %v971_v12 = vmul.f32 %v969_v10, %v3975_v14  ;;  %v3536_v9 = vld [vmem:[%s5165_s4 + $0xf0] sm:$0xff]  ;;  %v3537_v10 = vld [vmem:[%s5165_s4 + $0xf8] sm:$0xff] }
  0xf2   : > { %v982_v17 = vrot.slane %v970_v11, %v3994_v5  ;;  %v986_v19 = vrot.slane %v971_v12, %v3994_v5  ;;  %v996_v20 = vpop.permute.xlu0 %995  ;;  %v1001_v23 = vrot.slane %v970_v11, %v4000_v15  ;;  %v1005_v24 = vrot.slane %v971_v12, %v4000_v15 }
  0xf3   : > { %v1020_v25 = vrot.slane %v970_v11, %v4012_v38  ;;  %v1024_v26 = vrot.slane %v971_v12, %v4012_v38  ;;  %v1039_v34 = vrot.slane %v970_v11, %v4017_v48  ;;  %v1043_v35 = vrot.slane %v971_v12, %v4017_v48  ;;  %v3538_v11 = vld [vmem:[%s5165_s4 + $0x100] sm:$0xff]  ;;  %v3539_v12 = vld [vmem:[%s5165_s4 + $0x108] sm:$0xff] }
  0xf4   : > { %v987_v27 = vmul.f32 %v982_v17, %v977_v13  ;;  %v988_v28 = vmul.f32 %v986_v19, %v977_v13  ;;  %v1006_v31 = vmul.f32 %v1001_v23, %v996_v20  ;;  %v1007_v32 = vmul.f32 %v1005_v24, %v996_v20  ;;  %v3540_v13 = vld [vmem:[%s5165_s4 + $0x110] sm:$0xff]  ;;  %v3541_v19 = vld [vmem:[%s5165_s4 + $0x118] sm:$0xff]  ;;  %v1817_v20 = vld [vmem:[%s5166_s5] sm:$0xff] }
  0xf5   : > { %v1025_v37 = vmul.f32 %v1020_v25, %v1015_v33  ;;  %v1026_v39 = vmul.f32 %v1024_v26, %v1015_v33  ;;  %v3542_v23 = vld [vmem:[%s5163_s2 + $0x90] sm:$0xf]  ;;  %v3543_v24 = vld [vmem:[%s5163_s2 + $0x94] sm:$0xf]  ;;  %v3544_v25 = vld [vmem:[%s5163_s2 + $0x98] sm:$0xf] }
  0xf6   : > { %v989_v29 = vadd.f32 %v987_v27, %v959_v21  ;;  %v990_v30 = vadd.f32 %v988_v28, %v960_v22  ;;  %v1034_v36 = vpop.permute.xlu0 %1033  ;;  %v4173_v21 = vpop.permute.xlu1 %1090  ;;  %v3545_v26 = vld [vmem:[%s5163_s2 + $0x9c] sm:$0xf]  ;;  %v3548_v33 = vld [vmem:[%s5163_s2 + $0xa8] sm:$0xf] }
  0xf7   : > { %v1044_v44 = vmul.f32 %v1039_v34, %v1034_v36  ;;  %v1045_v45 = vmul.f32 %v1043_v35, %v1034_v36  ;;  %v3549_v34 = vld [vmem:[%s5163_s2 + $0xac] sm:$0xf]  ;;  %v3550_v35 = vld [vmem:[%s5163_s2 + $0xb0] sm:$0xf]  ;;  %v3551_v36 = vld [vmem:[%s5163_s2 + $0xb4] sm:$0xf] }
  0xf8   : > { %v1008_v40 = vadd.f32 %v1006_v31, %v989_v29  ;;  %v1009_v41 = vadd.f32 %v1007_v32, %v990_v30  ;;  %v3546_v29 = vld [vmem:[%s5163_s2 + $0xa0] sm:$0xf]  ;;  %v3547_v30 = vld [vmem:[%s5163_s2 + $0xa4] sm:$0xf] }
  0xfa   : > { %v1027_v42 = vadd.f32 %v1025_v37, %v1008_v40  ;;  %v1028_v43 = vadd.f32 %v1026_v39, %v1009_v41  ;;  %v4163_v17 = vpop.permute.xlu0 %1073  ;;  %v4189_v27 = vpop.permute.xlu1 %1128  ;;  %v3552_v40 = vld [vmem:[%s5163_s2 + $0xb8] sm:$0xf]  ;;  %v3553_v41 = vld [vmem:[%s5163_s2 + $0xbc] sm:$0xf] }
  0xfc   : > { %v1046_v46 = vadd.f32 %v1044_v44, %v1027_v42  ;;  %v1047_v47 = vadd.f32 %v1045_v45, %v1028_v43  ;;  %v3554_v44 = vld [vmem:[%s5163_s2 + $0xc0] sm:$0xf]  ;;  %v3555_v45 = vld [vmem:[%s5163_s2 + $0xc4] sm:$0xf] }
  0xfe   : > { %v1054_v52 = vadd.f32 %v1052_v50, %v1046_v46  ;;  %v1055_v53 = vadd.f32 %v1052_v50, %v1047_v47  ;;  %v4175_v22 = vpop.permute.xlu0 %1109  ;;  %v4199_v31 = vpop.permute.xlu1 %1174  ;;  %v3556_v46 = vld [vmem:[%s5163_s2 + $0xc8] sm:$0xf]  ;;  %v3557_v47 = vld [vmem:[%s5163_s2 + $0xcc] sm:$0xf] }
 0x100   : > { %v4074_v55 = vadd.f32 %v1054_v52, %v3734_v3  ;;  %v4077_v57 = vadd.f32 %v1055_v53, %v3737_v4  ;;  %v3525_v3 = vld [vmem:[%s5165_s4 + $0x98] sm:$0xff]  ;;  %v3526_v4 = vld [vmem:[%s5165_s4 + $0xa0] sm:$0xff]  ;;  %v3558_v53 = vld [vmem:[%s5163_s2 + $0xd0] sm:$0xf] }
 0x102   : > { %1062 = vrot.lane.b32.xlu1 %v4077_v57, %s3666_s9  ;;  %1060 = vrot.lane.b32.xlu0 %v4074_v55, %s3666_s9  ;;  %v4191_v28 = vpop.permute.xlu0 %1155  ;;  %v4215_v37 = vpop.permute.xlu1 %1212 }
 0x106   : > { %1422 = vperm.xlu1 %3637, %v3523_v58   ;;  %1441 = vperm.xlu0 %3638, %v3524_v59   ;;  %v4201_v32 = vpop.permute.xlu0 %1193  ;;  %v4225_v42 = vpop.permute.xlu1 %1260 }
 0x10a   : > { %1145 = vrot.lane.b32.xlu1 %v4077_v57, %s3667_s10  ;;  %1143 = vrot.lane.b32.xlu0 %v4074_v55, %s3667_s10  ;;  %v4217_v39 = vpop.permute.xlu0 %1241  ;;  %v4241_v50 = vpop.permute.xlu1 %1298 }
 0x10e   : > { %1460 = vperm.xlu1 %3637, %v3525_v3   ;;  %1227 = vrot.lane.b32.xlu0 %v4074_v55, %s3668_s19  ;;  %v4227_v43 = vpop.permute.xlu0 %1279  ;;  %v4248_v58 = vpop.permute.xlu1 %1346 }
 0x112   : > { %1229 = vrot.lane.b32.xlu1 %v4077_v57, %s3668_s19  ;;  %1313 = vrot.lane.b32.xlu0 %v4074_v55, %s3669_s8  ;;  %v4243_v52 = vpop.permute.xlu0 %1327  ;;  %v4252_v3 = vpop.permute.xlu1 %1384 }
 0x116   : > { %1489 = vperm.xlu1 %3637, %v3526_v4   ;;  %1527 = vperm.xlu0 %3638, %v3528_v60   ;;  %v4250_v59 = vpop.permute.xlu0 %1365 }
 0x11a   : > { %1315 = vrot.lane.b32.xlu1 %v4077_v57, %s3669_s8  ;;  %1575 = vperm.xlu0 %3638, %v3530_v62   ;;  %v4254_v4 = vpop.permute.xlu0 %1403 }
 0x11e   : > { %1508 = vperm.xlu1 %3637, %v3527_v0   ;;  %1613 = vperm.xlu0 %3638, %v3532_v1  }
 0x122   : > { %1546 = vperm.xlu1 %3637, %v3529_v51   ;;  %1475 = vrot.lane.b32.xlu0 %v4074_v55, %s3670_s11 }
 0x126   : > { %1594 = vperm.xlu1 %3637, %v3531_v2   ;;  %1477 = vrot.lane.b32.xlu0 %v4077_v57, %s3670_s11 }
 0x12a   : > { %1632 = vperm.xlu1 %3637, %v3533_v6   ;;  %1659 = vperm.xlu0 %3638, %v3534_v7  }
 0x12e   : > { %1678 = vperm.xlu1 %3637, %v3535_v8   ;;  %1563 = vrot.lane.b32.xlu0 %v4077_v57, %s3671_s23 }
 0x132   : > { %1561 = vrot.lane.b32.xlu1 %v4074_v55, %s3671_s23  ;;  %1697 = vperm.xlu0 %3638, %v3536_v9  }
 0x136   : > { %1716 = vperm.xlu1 %3637, %v3537_v10   ;;  %1745 = vperm.xlu0 %3638, %v3538_v11  }
 0x13a   : > { %1649 = vrot.lane.b32.xlu1 %v4077_v57, %s3672_s14  ;;  %1647 = vrot.lane.b32.xlu0 %v4074_v55, %s3672_s14 }
 0x13e   : > { %1764 = vperm.xlu1 %3637, %v3539_v12   ;;  %1733 = vrot.lane.b32.xlu0 %v4077_v57, %s3673_s28 }
 0x142   : > { %1731 = vrot.lane.b32.xlu1 %v4074_v55, %s3673_s28  ;;  %1783 = vperm.xlu0 %3638, %v3540_v13  }
 0x146   : > { %1802 = vperm.xlu1 %3637, %v3541_v19   ;;  %1820 = vperm.xlu0 %3638, %v1817_v20  }
 0x14a   : > { %1861 = vperm.xlu1 %3637, %v3542_v23   ;;  %1878 = vperm.xlu0 %3638, %v3543_v24  }
 0x14e   : > { %1897 = vperm.xlu1 %3637, %v3544_v25   ;;  %1916 = vperm.xlu0 %3638, %v3545_v26  }
 0x152   : > { %1943 = vperm.xlu1 %3637, %v3546_v29   ;;  %1962 = vperm.xlu0 %3638, %v3547_v30  }
 0x156   : > { %1981 = vperm.xlu1 %3637, %v3548_v33   ;;  %2000 = vperm.xlu0 %3638, %v3549_v34  }
 0x15a   : > { %2029 = vperm.xlu1 %3637, %v3550_v35   ;;  %2048 = vperm.xlu0 %3638, %v3551_v36  }
 0x15e   : > { %2067 = vperm.xlu1 %3637, %v3552_v40   ;;  %2086 = vperm.xlu0 %3638, %v3553_v41  }
 0x162   : > { %2115 = vperm.xlu1 %3637, %v3554_v44   ;;  %2134 = vperm.xlu0 %3638, %v3555_v45  }
 0x166   : > { %2153 = vperm.xlu1 %3637, %v3556_v46   ;;  %2172 = vperm.xlu0 %3638, %v3557_v47  }
 0x16a   : > { %2191 = vperm.xlu1 %3637, %v3558_v53  }
 0x174   : > { %v1063_v60 = vpop.permute.xlu1 %1062  ;;  %v1061_v62 = vpop.permute.xlu0 %1060 }
 0x175   : > { %v1067_v0 = vsel %vm265_vm0, 0.0, %v1061_v62  ;;  %v1064_v1 = vsel %vm265_vm0, %v1061_v62, %v1063_v60 }
 0x176   : > { %v1068_v51 = vmul.f32 %v1067_v0, %v3921_v63  ;;  %v1069_v2 = vmul.f32 %v1064_v1, %v3915_v61 }
 0x178   : > { %v1079_v6 = vrot.slane %v1068_v51, %v3906_v56  ;;  %v1096_v7 = vrot.slane %v1068_v51, %v3900_v54  ;;  %v1083_v8 = vrot.slane %v1069_v2, %v3906_v56  ;;  %v1100_v9 = vrot.slane %v1069_v2, %v3900_v54 }
 0x179   : > { %v1115_v19 = vrot.slane %v1068_v51, %v3944_v16  ;;  %v1119_v20 = vrot.slane %v1069_v2, %v3944_v16  ;;  %v1134_v30 = vrot.slane %v1068_v51, %v3947_v18  ;;  %v1138_v33 = vrot.slane %v1069_v2, %v3947_v18 }
 0x17a   : > { %v1084_v10 = vmul.f32 %v1079_v6, %v4163_v17  ;;  %v1101_v11 = vmul.f32 %v1096_v7, %v4173_v21  ;;  %v1085_v12 = vmul.f32 %v1083_v8, %v4163_v17  ;;  %v1102_v13 = vmul.f32 %v1100_v9, %v4173_v21 }
 0x17b   : > { %v1120_v29 = vmul.f32 %v1115_v19, %v4175_v22  ;;  %v1121_v17 = vmul.f32 %v1119_v20, %v4175_v22  ;;  %v1139_v40 = vmul.f32 %v1134_v30, %v4189_v27  ;;  %v1140_v41 = vmul.f32 %v1138_v33, %v4189_v27 }
 0x17c   : > { %v1103_v23 = vadd.f32 %v1101_v11, %v1084_v10  ;;  %v1104_v24 = vadd.f32 %v1102_v13, %v1085_v12 }
 0x17e   : > { %v1122_v34 = vadd.f32 %v1120_v29, %v1103_v23  ;;  %v1123_v35 = vadd.f32 %v1121_v17, %v1104_v24 }
 0x180   : > { %v1141_v60 = vadd.f32 %v1139_v40, %v1122_v34  ;;  %v1142_v62 = vadd.f32 %v1140_v41, %v1123_v35 }
 0x185   : > { %v4270_v25 = vpop.permute.xlu1 %1422  ;;  %v4272_v26 = vpop.permute.xlu0 %1441 }
 0x189   : > { %v1146_v21 = vpop.permute.xlu1 %1145  ;;  %v1144_v36 = vpop.permute.xlu0 %1143 }
 0x18a   : > { %v1147_v44 = vsel %vm360_vm1, %v1144_v36, %v1146_v21  ;;  %v1150_v45 = vsel %vm360_vm1, 0.0, %v1144_v36 }
 0x18b   : > { %v1161_v46 = vrot.slane %v1150_v45, %v3906_v56  ;;  %v1165_v47 = vrot.slane %v1147_v44, %v3906_v56  ;;  %v1180_v53 = vrot.slane %v1150_v45, %v3900_v54  ;;  %v1184_v22 = vrot.slane %v1147_v44, %v3900_v54 }
 0x18c   : > { %v1199_v27 = vrot.slane %v1150_v45, %v3944_v16  ;;  %v1203_v6 = vrot.slane %v1147_v44, %v3944_v16  ;;  %v1218_v7 = vrot.slane %v1150_v45, %v3947_v18  ;;  %v1222_v30 = vrot.slane %v1147_v44, %v3947_v18 }
 0x18d   : > { %v1166_v0 = vmul.f32 %v1161_v46, %v4191_v28  ;;  %v1167_v1 = vmul.f32 %v1165_v47, %v4191_v28  ;;  %v4289_v51 = vpop.permute.xlu1 %1460  ;;  %v1228_v2 = vpop.permute.xlu0 %1227  ;;  %v1185_v10 = vmul.f32 %v1180_v53, %v4199_v31  ;;  %v1186_v11 = vmul.f32 %v1184_v22, %v4199_v31 }
 0x18e   : > { %v1234_v12 = vsel %vm445_vm2, 0.0, %v1228_v2  ;;  %v1204_v28 = vmul.f32 %v1199_v27, %v4201_v32  ;;  %v1205_v29 = vmul.f32 %v1203_v6, %v4201_v32  ;;  %v1223_v31 = vmul.f32 %v1218_v7, %v4215_v37 }
 0x18f   : > { %v1168_v8 = vadd.f32 %v1166_v0, %v1141_v60  ;;  %v1169_v9 = vadd.f32 %v1167_v1, %v1142_v62  ;;  %v1235_v20 = vmul.f32 %v1234_v12, %v3966_v49  ;;  %v1224_v53 = vmul.f32 %v1222_v30, %v4215_v37 }
 0x191   : > { %v1187_v13 = vadd.f32 %v1185_v10, %v1168_v8  ;;  %v1188_v19 = vadd.f32 %v1186_v11, %v1169_v9  ;;  %v1230_v23 = vpop.permute.xlu1 %1229  ;;  %v1314_v24 = vpop.permute.xlu0 %1313  ;;  %v1247_v21 = vrot.slane %v1235_v20, %v3906_v56  ;;  %v1266_v35 = vrot.slane %v1235_v20, %v3900_v54 }
 0x192   : > { %v1231_v33 = vsel %vm445_vm2, %v1228_v2, %v1230_v23  ;;  %v1320_v17 = vsel %vm543_vm3, 0.0, %v1314_v24  ;;  %v1285_v32 = vrot.slane %v1235_v20, %v3944_v16  ;;  %v1304_v1 = vrot.slane %v1235_v20, %v3947_v18 }
 0x193   : > { %v1206_v34 = vadd.f32 %v1204_v28, %v1187_v13  ;;  %v1207_v36 = vadd.f32 %v1205_v29, %v1188_v19  ;;  %v1236_v40 = vmul.f32 %v1231_v33, %v3975_v14  ;;  %v1252_v45 = vmul.f32 %v1247_v21, %v4217_v39 }
 0x194   : > { %v1321_v44 = vmul.f32 %v1320_v17, %v3921_v63  ;;  %v1271_v0 = vmul.f32 %v1266_v35, %v4225_v42  ;;  %v1290_v8 = vmul.f32 %v1285_v32, %v4227_v43  ;;  %v1309_v28 = vmul.f32 %v1304_v1, %v4241_v50 }
 0x195   : > { %v1225_v41 = vadd.f32 %v1223_v31, %v1206_v34  ;;  %v4309_v46 = vpop.permute.xlu1 %1489  ;;  %v4311_v47 = vpop.permute.xlu0 %1527  ;;  %v1251_v22 = vrot.slane %v1236_v40, %v3906_v56  ;;  %v1270_v60 = vrot.slane %v1236_v40, %v3900_v54  ;;  %v1226_v27 = vadd.f32 %v1224_v53, %v1207_v36 }
 0x196   : > { %v1289_v6 = vrot.slane %v1236_v40, %v3944_v16  ;;  %v1333_v9 = vrot.slane %v1321_v44, %v3906_v56  ;;  %v1308_v13 = vrot.slane %v1236_v40, %v3947_v18  ;;  %v1371_v34 = vrot.slane %v1321_v44, %v3944_v16 }
 0x197   : > { %v1254_v62 = vadd.f32 %v1252_v45, %v1225_v41  ;;  %v1253_v2 = vmul.f32 %v1251_v22, %v4217_v39  ;;  %v1272_v12 = vmul.f32 %v1270_v60, %v4225_v42  ;;  %v1352_v39 = vrot.slane %v1321_v44, %v3900_v54 }
 0x198   : > { %v1291_v29 = vmul.f32 %v1289_v6, %v4227_v43  ;;  %v1338_v17 = vmul.f32 %v1333_v9, %v4243_v52  ;;  %v1310_v35 = vmul.f32 %v1308_v13, %v4241_v50  ;;  %v1390_v41 = vrot.slane %v1321_v44, %v3947_v18 }
 0x199   : > { %v1273_v7 = vadd.f32 %v1271_v0, %v1254_v62  ;;  %v1316_v37 = vpop.permute.xlu1 %1315  ;;  %v4322_v10 = vpop.permute.xlu0 %1575  ;;  %v1255_v11 = vadd.f32 %v1253_v2, %v1226_v27  ;;  %v1357_v43 = vmul.f32 %v1352_v39, %v4248_v58  ;;  %v1376_v60 = vmul.f32 %v1371_v34, %v4250_v59 }
 0x19a   : > { %v1317_v20 = vsel %vm543_vm3, %v1314_v24, %v1316_v37  ;;  %v1409_v2 = vrot.slane %v4074_v55, %v3906_v56  ;;  %v1395_v6 = vmul.f32 %v1390_v41, %v4252_v3  ;;  %v1428_v37 = vrot.slane %v4074_v55, %v3900_v54 }
 0x19b   : > { %v1292_v19 = vadd.f32 %v1290_v8, %v1273_v7  ;;  %v1274_v23 = vadd.f32 %v1272_v12, %v1255_v11  ;;  %v1322_v30 = vmul.f32 %v1317_v20, %v3915_v61  ;;  %v1413_v8 = vrot.slane %v4077_v57, %v3906_v56 }
 0x19c   : > { %v1414_v9 = vmul.f32 %v1409_v2, %v4254_v4  ;;  %v1447_v20 = vrot.slane %v4074_v55, %v3944_v16 }
 0x19d   : > { %v1311_v33 = vadd.f32 %v1309_v28, %v1292_v19  ;;  %v4333_v42 = vpop.permute.xlu1 %1508  ;;  %v4335_v31 = vpop.permute.xlu0 %1613  ;;  %v1293_v21 = vadd.f32 %v1291_v29, %v1274_v23  ;;  %v1337_v36 = vrot.slane %v1322_v30, %v3906_v56  ;;  %v1356_v24 = vrot.slane %v1322_v30, %v3900_v54 }
 0x19e   : > { %v1375_v53 = vrot.slane %v1322_v30, %v3944_v16  ;;  %v1394_v27 = vrot.slane %v1322_v30, %v3947_v18  ;;  %v1415_v30 = vmul.f32 %v1413_v8, %v4254_v4  ;;  %v1452_v34 = vmul.f32 %v1447_v20, %v4272_v26 }
 0x19f   : > { %v1340_v40 = vadd.f32 %v1338_v17, %v1311_v33  ;;  %v1312_v45 = vadd.f32 %v1310_v35, %v1293_v21  ;;  %v1339_v32 = vmul.f32 %v1337_v36, %v4243_v52  ;;  %v1358_v1 = vmul.f32 %v1356_v24, %v4248_v58 }
 0x1a0   : > { %v1377_v7 = vmul.f32 %v1375_v53, %v4250_v59  ;;  %v1396_v19 = vmul.f32 %v1394_v27, %v4252_v3  ;;  %v1433_v59 = vmul.f32 %v1428_v37, %v4270_v25  ;;  %v1432_v33 = vrot.slane %v4077_v57, %v3900_v54 }
 0x1a1   : > { %v1359_v22 = vadd.f32 %v1357_v43, %v1340_v40  ;;  %v4345_v62 = vpop.permute.xlu1 %1546  ;;  %v1476_v50 = vpop.permute.xlu0 %1475  ;;  %v1341_v0 = vadd.f32 %v1339_v32, %v1312_v45  ;;  %v1466_v21 = vrot.slane %v4074_v55, %v3947_v18  ;;  %v1451_v43 = vrot.slane %v4077_v57, %v3944_v16 }
 0x1a2   : > { %v1434_v4 = vmul.f32 %v1432_v33, %v4270_v25 }
 0x1a3   : > { %v1378_v44 = vadd.f32 %v1376_v60, %v1359_v22  ;;  %v1360_v52 = vadd.f32 %v1358_v1, %v1341_v0  ;;  %v1471_v45 = vmul.f32 %v1466_v21, %v4289_v51  ;;  %v1453_v22 = vmul.f32 %v1451_v43, %v4272_v26 }
 0x1a4   : > { %v1470_v60 = vrot.slane %v4077_v57, %v3947_v18 }
 0x1a5   : > { %v1397_v58 = vadd.f32 %v1395_v6, %v1378_v44  ;;  %v4358_v11 = vpop.permute.xlu1 %1594  ;;  %v1478_v12 = vpop.permute.xlu0 %1477  ;;  %v1379_v13 = vadd.f32 %v1377_v7, %v1360_v52 }
 0x1a6   : > { %v1479_v28 = vsel %vm706_vm4, %v1476_v50, %v1478_v12  ;;  %v1482_v39 = vsel %vm706_vm4, %v1478_v12, 0.0  ;;  %v1472_v6 = vmul.f32 %v1470_v60, %v4289_v51 }
 0x1a7   : > { %v1416_v23 = vadd.f32 %v1414_v9, %v1397_v58  ;;  %v1483_v29 = vmul.f32 %v1479_v28, %v3966_v49  ;;  %v1398_v17 = vadd.f32 %v1396_v19, %v1379_v13  ;;  %v1484_v3 = vmul.f32 %v1482_v39, %v3975_v14 }
 0x1a9   : > { %v1435_v35 = vadd.f32 %v1433_v59, %v1416_v23  ;;  %v1495_v36 = vrot.slane %v1483_v29, %v3906_v56  ;;  %v4375_v24 = vpop.permute.xlu1 %1632  ;;  %v4377_v40 = vpop.permute.xlu0 %1659  ;;  %v1417_v41 = vadd.f32 %v1415_v30, %v1398_v17  ;;  %v1514_v53 = vrot.slane %v1483_v29, %v3900_v54 }
 0x1aa   : > { %v1499_v0 = vrot.slane %v1484_v3, %v3906_v56  ;;  %v1518_v27 = vrot.slane %v1484_v3, %v3900_v54  ;;  %v1533_v7 = vrot.slane %v1483_v29, %v3944_v16  ;;  %v1537_v13 = vrot.slane %v1484_v3, %v3944_v16 }
 0x1ab   : > { %v1454_v32 = vadd.f32 %v1452_v34, %v1435_v35  ;;  %v1436_v50 = vadd.f32 %v1434_v4, %v1417_v41  ;;  %v1500_v25 = vmul.f32 %v1495_v36, %v4309_v46  ;;  %v1519_v9 = vmul.f32 %v1514_v53, %v4333_v42 }
 0x1ac   : > { %v1501_v12 = vmul.f32 %v1499_v0, %v4309_v46  ;;  %v1520_v19 = vmul.f32 %v1518_v27, %v4333_v42  ;;  %v1552_v51 = vrot.slane %v1483_v29, %v3947_v18  ;;  %v1538_v23 = vmul.f32 %v1533_v7, %v4311_v47 }
 0x1ad   : > { %v1473_v1 = vadd.f32 %v1471_v45, %v1454_v32  ;;  %v4390_v2 = vpop.permute.xlu1 %1678  ;;  %v1564_v44 = vpop.permute.xlu0 %1563  ;;  %v1455_v52 = vadd.f32 %v1453_v22, %v1436_v50  ;;  %v1556_v30 = vrot.slane %v1484_v3, %v3947_v18  ;;  %v1539_v34 = vmul.f32 %v1537_v13, %v4311_v47 }
 0x1ae   : > { %v1568_v26 = vsel %vm793_vm5, %v1564_v44, 0.0  ;;  %v1557_v29 = vmul.f32 %v1552_v51, %v4345_v62 }
 0x1af   : > { %v1502_v8 = vadd.f32 %v1500_v25, %v1473_v1  ;;  %v1570_v37 = vmul.f32 %v1568_v26, %v3915_v61  ;;  %v1474_v58 = vadd.f32 %v1472_v6, %v1455_v52  ;;  %v1558_v3 = vmul.f32 %v1556_v30, %v4345_v62 }
 0x1b1   : > { %v1521_v28 = vadd.f32 %v1519_v9, %v1502_v8  ;;  %v1562_v39 = vpop.permute.xlu1 %1561  ;;  %v4401_v59 = vpop.permute.xlu0 %1697  ;;  %v1503_v20 = vadd.f32 %v1501_v12, %v1474_v58  ;;  %v1585_v17 = vrot.slane %v1570_v37, %v3906_v56  ;;  %v1604_v35 = vrot.slane %v1570_v37, %v3900_v54 }
 0x1b2   : > { %v1565_v33 = vsel %vm793_vm5, %v1562_v39, %v1564_v44  ;;  %v1623_v32 = vrot.slane %v1570_v37, %v3944_v16  ;;  %v1642_v1 = vrot.slane %v1570_v37, %v3947_v18 }
 0x1b3   : > { %v1522_v46 = vadd.f32 %v1520_v19, %v1503_v20  ;;  %v1540_v21 = vadd.f32 %v1538_v23, %v1521_v28  ;;  %v1569_v42 = vmul.f32 %v1565_v33, %v3921_v63  ;;  %v1587_v47 = vmul.f32 %v1585_v17, %v4322_v10 }
 0x1b4   : > { %v1606_v0 = vmul.f32 %v1604_v35, %v4358_v11  ;;  %v1644_v51 = vmul.f32 %v1642_v1, %v4375_v24 }
 0x1b5   : > { %v4411_v36 = vpop.permute.xlu1 %1716  ;;  %v4413_v4 = vpop.permute.xlu0 %1745  ;;  %v1541_v43 = vadd.f32 %v1539_v34, %v1522_v46  ;;  %v1581_v41 = vrot.slane %v1569_v42, %v3906_v56  ;;  %v1600_v45 = vrot.slane %v1569_v42, %v3900_v54  ;;  %v1559_v53 = vadd.f32 %v1557_v29, %v1540_v21 }
 0x1b6   : > { %v1619_v50 = vrot.slane %v1569_v42, %v3944_v16  ;;  %v1638_v25 = vrot.slane %v1569_v42, %v3947_v18 }
 0x1b7   : > { %v1560_v22 = vadd.f32 %v1558_v3, %v1541_v43  ;;  %v1586_v60 = vmul.f32 %v1581_v41, %v4322_v10  ;;  %v1605_v62 = vmul.f32 %v1600_v45, %v4358_v11  ;;  %v1625_v10 = vmul.f32 %v1623_v32, %v4335_v31 }
 0x1b8   : > { %v1624_v37 = vmul.f32 %v1619_v50, %v4335_v31  ;;  %v1643_v39 = vmul.f32 %v1638_v25, %v4375_v24 }
 0x1b9   : > { %v1650_v27 = vpop.permute.xlu1 %1649  ;;  %v1648_v44 = vpop.permute.xlu0 %1647  ;;  %v1589_v6 = vadd.f32 %v1587_v47, %v1560_v22  ;;  %v1588_v52 = vadd.f32 %v1586_v60, %v1559_v53 }
 0x1ba   : > { %v1654_v7 = vsel %vm880_vm6, %v1650_v27, 0.0  ;;  %v1651_v26 = vsel %vm880_vm6, %v1648_v44, %v1650_v27 }
 0x1bb   : > { %v1669_v8 = vrot.slane %v1654_v7, %v3906_v56  ;;  %v1608_v9 = vadd.f32 %v1606_v0, %v1589_v6  ;;  %v1607_v58 = vadd.f32 %v1605_v62, %v1588_v52  ;;  %v1665_v11 = vrot.slane %v1651_v26, %v3906_v56 }
 0x1bc   : > { %v1688_v12 = vrot.slane %v1654_v7, %v3900_v54  ;;  %v1684_v13 = vrot.slane %v1651_v26, %v3900_v54  ;;  %v1707_v33 = vrot.slane %v1654_v7, %v3944_v16  ;;  %v1703_v21 = vrot.slane %v1651_v26, %v3944_v16 }
 0x1bd   : > { %v1765_v19 = vpop.permute.xlu1 %1764  ;;  %v1734_v28 = vpop.permute.xlu0 %1733  ;;  %v1627_v20 = vadd.f32 %v1625_v10, %v1608_v9  ;;  %v1626_v23 = vadd.f32 %v1624_v37, %v1607_v58  ;;  %v1671_v30 = vmul.f32 %v1669_v8, %v4377_v40  ;;  %v1670_v31 = vmul.f32 %v1665_v11, %v4377_v40 }
 0x1be   : > { %v1738_v17 = vsel %vm965_vm7, %v1734_v28, 0.0  ;;  %v1690_v29 = vmul.f32 %v1688_v12, %v4390_v2  ;;  %v1726_v24 = vrot.slane %v1654_v7, %v3947_v18  ;;  %v1689_v35 = vmul.f32 %v1684_v13, %v4390_v2 }
 0x1bf   : > { %v1646_v46 = vadd.f32 %v1644_v51, %v1627_v20  ;;  %v1645_v34 = vadd.f32 %v1643_v39, %v1626_v23  ;;  %v1740_v42 = vmul.f32 %v1738_v17, %v3975_v14  ;;  %v1722_v45 = vrot.slane %v1651_v26, %v3947_v18 }
 0x1c0   : > { %v1709_v47 = vmul.f32 %v1707_v33, %v4401_v59  ;;  %v1708_v60 = vmul.f32 %v1703_v21, %v4401_v59  ;;  %v1728_v0 = vmul.f32 %v1726_v24, %v4411_v36 }
 0x1c1   : > { %v1732_v43 = vpop.permute.xlu1 %1731  ;;  %v1673_v3 = vadd.f32 %v1671_v30, %v1646_v46  ;;  %v1672_v41 = vadd.f32 %v1670_v31, %v1645_v34  ;;  %v1755_v50 = vrot.slane %v1740_v42, %v3906_v56  ;;  %v1774_v1 = vrot.slane %v1740_v42, %v3900_v54  ;;  %v1784_v9 = vpop.permute.xlu0 %1783 }
 0x1c2   : > { %v1735_v40 = vsel %vm965_vm7, %v1732_v43, %v1734_v28  ;;  %v1727_v27 = vmul.f32 %v1722_v45, %v4411_v36  ;;  %v1793_v52 = vrot.slane %v1740_v42, %v3944_v16  ;;  %v1812_v13 = vrot.slane %v1740_v42, %v3947_v18 }
 0x1c3   : > { %v1739_v32 = vmul.f32 %v1735_v40, %v3966_v49  ;;  %v1692_v53 = vadd.f32 %v1690_v29, %v1673_v3  ;;  %v1691_v22 = vadd.f32 %v1689_v35, %v1672_v41  ;;  %v1757_v26 = vmul.f32 %v1755_v50, %v4413_v4 }
 0x1c4   : > { %v1776_v8 = vmul.f32 %v1774_v1, %v1765_v19  ;;  %v1795_v20 = vmul.f32 %v1793_v52, %v1784_v9  ;;  %v3560_v1 = vld [vmem:[%s5163_s2 + $0xd8] sm:$0xf]  ;;  %v3566_v52 = vld [vmem:[%s5163_s2 + $0xf0] sm:$0xf] }
 0x1c5   : > { %v1751_v2 = vrot.slane %v1739_v32, %v3906_v56  ;;  %v1711_v62 = vadd.f32 %v1709_v47, %v1692_v53  ;;  %v1710_v25 = vadd.f32 %v1708_v60, %v1691_v22  ;;  %v1770_v44 = vrot.slane %v1739_v32, %v3900_v54  ;;  %v1803_v36 = vpop.permute.xlu1 %1802  ;;  %v1821_v46 = vpop.permute.xlu0 %1820  ;;  %v3655_v47 = vld [vmem:[%s3731_s30] sm:$0xff]  ;;  %v3656_v53 = vld [vmem:[%s3731_s30 + $0x8] sm:$0xff] }
 0x1c6   : > { %v1789_v10 = vrot.slane %v1739_v32, %v3944_v16  ;;  %v1808_v12 = vrot.slane %v1739_v32, %v3947_v18 }
 0x1c7   : > { %v1756_v6 = vmul.f32 %v1751_v2, %v4413_v4  ;;  %v1729_v7 = vadd.f32 %v1727_v27, %v1710_v25  ;;  %v1730_v59 = vadd.f32 %v1728_v0, %v1711_v62  ;;  %v1775_v11 = vmul.f32 %v1770_v44, %v1765_v19  ;;  %v3559_v62 = vld [vmem:[%s5163_s2 + $0xd4] sm:$0xf]  ;;  %v3561_v25 = vld [vmem:[%s5163_s2 + $0xdc] sm:$0xf]  ;;  %v3562_v27 = vld [vmem:[%s5163_s2 + $0xe0] sm:$0xf] }
 0x1c8   : > { %v1794_v39 = vmul.f32 %v1789_v10, %v1784_v9  ;;  %v1813_v33 = vmul.f32 %v1808_v12, %v1803_v36  ;;  %v1814_v4 = vmul.f32 %v1812_v13, %v1803_v36  ;;  %v3564_v44 = vld [vmem:[%s5163_s2 + $0xe8] sm:$0xf]  ;;  %v3570_v10 = vld [vmem:[%s5163_s2 + $0x100] sm:$0xf]  ;;  %v3571_v9 = vld [vmem:[%s5163_s2 + $0x104] sm:$0xf] }
 0x1c9   : > { %v1758_v58 = vadd.f32 %v1756_v6, %v1729_v7  ;;  %v1759_v37 = vadd.f32 %v1757_v26, %v1730_v59  ;;  %v3563_v6 = vld [vmem:[%s5163_s2 + $0xe4] sm:$0xf]  ;;  %v3565_v7 = vld [vmem:[%s5163_s2 + $0xec] sm:$0xf]  ;;  %v3568_v59 = vld [vmem:[%s5163_s2 + $0xf8] sm:$0xf]  ;;  %v4545_v36 = vpop.permute.xlu1 %1861 }
 0x1ca   : > { %v3567_v26 = vld [vmem:[%s5163_s2 + $0xf4] sm:$0xf]  ;;  %v3576_v12 = vld [vmem:[%s5163_s2 + $0x118] sm:$0xf] }
 0x1cb   : > { %v1777_v28 = vadd.f32 %v1775_v11, %v1758_v58  ;;  %v1778_v51 = vadd.f32 %v1776_v8, %v1759_v37  ;;  %v3569_v8 = vld [vmem:[%s5163_s2 + $0xfc] sm:$0xf]  ;;  %v3572_v58 = vld [vmem:[%s5163_s2 + $0x108] sm:$0xf]  ;;  %v3574_v37 = vld [vmem:[%s5163_s2 + $0x110] sm:$0xf] }
 0x1cc   : > { %v3573_v11 = vld [vmem:[%s5163_s2 + $0x10c] sm:$0xf]  ;;  %v3575_v13 = vld [vmem:[%s5163_s2 + $0x114] sm:$0xf] }
 0x1cd   : > { %v1796_v23 = vadd.f32 %v1794_v39, %v1777_v28  ;;  %v1797_v30 = vadd.f32 %v1795_v20, %v1778_v51  ;;  %v3578_v28 = vld [vmem:[%s5164_s3 + $0x4] sm:$0xf]  ;;  %v3577_v51 = vld [vmem:[%s5163_s2 + $0x11c] sm:$0xf]  ;;  %v4556_v39 = vpop.permute.xlu1 %1897  ;;  %v3580_v20 = vld [vmem:[%s5165_s4 + $0x128] sm:$0xff] }
 0x1cf   : > { %v1815_v31 = vadd.f32 %v1813_v33, %v1796_v23  ;;  %v1816_v17 = vadd.f32 %v1814_v4, %v1797_v30  ;;  %v1879_v23 = vpop.permute.xlu0 %1878  ;;  %v3579_v30 = vld [vmem:[%s5165_s4 + $0x120] sm:$0xff]  ;;  %v3582_v33 = vld [vmem:[%s5165_s4 + $0x138] sm:$0xff] }
 0x1d1   : > { %v1823_v34 = vadd.f32 %v1821_v46, %v1815_v31  ;;  %v1824_v21 = vadd.f32 %v1821_v46, %v1816_v17  ;;  %v4567_v4 = vpop.permute.xlu1 %1943  ;;  %v3581_v31 = vld [vmem:[%s5165_s4 + $0x130] sm:$0xff]  ;;  %v3584_v46 = vld [vmem:[%s5165_s4 + $0x148] sm:$0xff] }
 0x1d3   : > { %v1825_v19 = vmul.f32 0.5, %v1823_v34  ;;  %v1826_v29 = vmul.f32 0.5, %v1824_v21  ;;  %v4572_v17 = vpop.permute.xlu0 %1916 }
 0x1d5   : > { %3639 = vtanh.f32 %v1825_v19  ;;  %v3586_v19 = vld [vmem:[%s5165_s4 + $0x158] sm:$0xff] }
 0x1d6   : > { %3641 = vtanh.f32 %v1826_v29 }
 0x1d7   : > { %v4585_v29 = vpop.permute.xlu0 %1962 }
 0x1df   : > { %v3640_v42 = vpop.eup %3639 }
 0x1e0   : > { %v3642_v24 = vpop.eup %3641  ;;  %v1829_v35 = vmul.f32 1.442695, %v3640_v42  ;;  %v3585_v42 = vld [vmem:[%s5165_s4 + $0x150] sm:$0xff] }
 0x1e1   : > { %v1831_v43 = vmul.f32 1.442695, %v3642_v24  ;;  %v3588_v24 = vld [vmem:[%s5165_s4 + $0x168] sm:$0xff] }
 0x1e2   : > { %3643 = vpow2.f32 %v1829_v35 }
 0x1e3   : > { %3645 = vpow2.f32 %v1831_v43  ;;  %v3587_v43 = vld [vmem:[%s5165_s4 + $0x160] sm:$0xff] }
 0x1ec   : > { %v3644_v3 = vpop.eup %3643 }
 0x1ed   : > { %v3646_v41 = vpop.eup %3645  ;;  %v1835_v45 = vrot.slane %v3644_v3, 4  ;;  %v4598_v3 = vpop.permute.xlu0 %2000 }
 0x1ee   : > { %v1836_v40 = vrot.slane %v3646_v41, 4  ;;  %v3590_v41 = vld [vmem:[%s5165_s4 + $0x178] sm:$0xff] }
 0x1ef   : > { %v1839_v32 = vmul.f32 %v3655_v47, %v1835_v45  ;;  %v3589_v45 = vld [vmem:[%s5165_s4 + $0x170] sm:$0xff]  ;;  %v3592_v47 = vld [vmem:[%s5165_s4 + $0x188] sm:$0xff] }
 0x1f0   : > { %v1840_v22 = vmul.f32 %v3656_v53, %v1836_v40  ;;  %v3591_v53 = vld [vmem:[%s5165_s4 + $0x180] sm:$0xff] }
 0x1f1   : > { %v4464_v60 = vadd.f32 %v1839_v32, %v1823_v34  ;;  %v3583_v34 = vld [vmem:[%s5165_s4 + $0x140] sm:$0xff]  ;;  %v4611_v32 = vpop.permute.xlu0 %2048 }
 0x1f2   : > { %v4466_v50 = vadd.f32 %v1840_v22, %v1824_v21  ;;  %v4580_v21 = vpop.permute.xlu1 %1981  ;;  %v3594_v22 = vld [vmem:[%s5165_s4 + $0x198] sm:$0xff] }
 0x1f3   : > { %v1845_v0 = vrot.slane %v4464_v60, 4 }
 0x1f4   : > { %v1846_v2 = vrot.slane %v4466_v50, 4 }
 0x1f5   : > { %1847 = vrot.lane.b32.xlu1 %v1845_v0, %s3666_s9 }
 0x1f6   : > { %1849 = vrot.lane.b32.xlu0 %v1846_v2, %s3666_s9  ;;  %v4593_v35 = vpop.permute.xlu1 %2029 }
 0x1f9   : > { %2229 = vperm.xlu1 %3637, %v3560_v1   ;;  %v4624_v1 = vpop.permute.xlu0 %2086 }
 0x1fa   : > { %2210 = vperm.xlu0 %3638, %v3559_v62   ;;  %v4606_v40 = vpop.permute.xlu1 %2067  ;;  %v3595_v62 = vld [vmem:[%s5165_s4 + $0x1a0] sm:$0xff] }
 0x1fd   : > { %1931 = vrot.lane.b32.xlu1 %v1845_v0, %s3667_s10 }
 0x1fe   : > { %1933 = vrot.lane.b32.xlu0 %v1846_v2, %s3667_s10 }
 0x201   : > { %2015 = vrot.lane.b32.xlu1 %v1845_v0, %s3668_s19 }
 0x202   : > { %2248 = vperm.xlu0 %3638, %v3561_v25  }
 0x205   : > { %2277 = vperm.xlu1 %3637, %v3562_v27   ;;  %v4631_v27 = vpop.permute.xlu0 %2134 }
 0x206   : > { %2017 = vrot.lane.b32.xlu0 %v1846_v2, %s3668_s19 }
 0x209   : > { %2101 = vrot.lane.b32.xlu1 %v1845_v0, %s3669_s8  ;;  %v4619_v0 = vpop.permute.xlu1 %2115 }
 0x20a   : > { %2263 = vrot.lane.b32.xlu0 %v4464_v60, %s3670_s11 }
 0x20d   : > { %2265 = vrot.lane.b32.xlu1 %v4466_v50, %s3670_s11  ;;  %v4629_v25 = vpop.permute.xlu1 %2153 }
 0x20e   : > { %2103 = vrot.lane.b32.xlu0 %v1846_v2, %s3669_s8  ;;  %v3593_v2 = vld [vmem:[%s5165_s4 + $0x190] sm:$0xff] }
 0x211   : > { %2315 = vperm.xlu1 %3637, %v3564_v44   ;;  %v4633_v44 = vpop.permute.xlu1 %2191 }
 0x212   : > { %2296 = vperm.xlu0 %3638, %v3563_v6   ;;  %v4635_v6 = vpop.permute.xlu0 %2172 }
 0x215   : > { %2363 = vperm.xlu1 %3637, %v3566_v52  }
 0x216   : > { %2334 = vperm.xlu0 %3638, %v3565_v7  }
 0x219   : > { %2351 = vrot.lane.b32.xlu1 %v4466_v50, %s3671_s23 }
 0x21a   : > { %2349 = vrot.lane.b32.xlu0 %v4464_v60, %s3671_s23 }
 0x21d   : > { %2401 = vperm.xlu1 %3637, %v3568_v59  }
 0x21e   : > { %2382 = vperm.xlu0 %3638, %v3567_v26  }
 0x221   : > { %2447 = vperm.xlu1 %3637, %v3570_v10  }
 0x222   : > { %2420 = vperm.xlu0 %3638, %v3569_v8  }
 0x225   : > { %2435 = vrot.lane.b32.xlu1 %v4464_v60, %s3672_s14 }
 0x226   : > { %2466 = vperm.xlu0 %3638, %v3571_v9  }
 0x229   : > { %2485 = vperm.xlu1 %3637, %v3572_v58  }
 0x22a   : > { %2437 = vrot.lane.b32.xlu0 %v4466_v50, %s3672_s14 }
 0x22d   : > { %2533 = vperm.xlu1 %3637, %v3574_v37  }
 0x22e   : > { %2504 = vperm.xlu0 %3638, %v3573_v11  }
 0x231   : > { %2521 = vrot.lane.b32.xlu1 %v4466_v50, %s3673_s28 }
 0x232   : > { %2519 = vrot.lane.b32.xlu0 %v4464_v60, %s3673_s28 }
 0x235   : > { %2571 = vperm.xlu1 %3637, %v3576_v12  }
 0x236   : > { %2552 = vperm.xlu0 %3638, %v3575_v13  }
 0x239   : > { %2609 = vperm.xlu1 %3637, %v3578_v28  }
 0x23a   : > { %2590 = vperm.xlu0 %3638, %v3577_v51  }
 0x23d   : > { %2649 = vperm.xlu1 %3637, %v3580_v20  }
 0x23e   : > { %2632 = vperm.xlu0 %3638, %v3579_v30  }
 0x241   : > { %2687 = vperm.xlu1 %3637, %v3582_v33  }
 0x242   : > { %2668 = vperm.xlu0 %3638, %v3581_v31  }
 0x245   : > { %2733 = vperm.xlu1 %3637, %v3584_v46  }
 0x246   : > { %2714 = vperm.xlu0 %3638, %v3583_v34  }
 0x249   : > { %2771 = vperm.xlu1 %3637, %v3586_v19  }
 0x24a   : > { %2752 = vperm.xlu0 %3638, %v3585_v42  }
 0x24d   : > { %2819 = vperm.xlu1 %3637, %v3588_v24  }
 0x24e   : > { %2800 = vperm.xlu0 %3638, %v3587_v43  }
 0x251   : > { %2857 = vperm.xlu1 %3637, %v3590_v41  }
 0x252   : > { %2838 = vperm.xlu0 %3638, %v3589_v45  }
 0x255   : > { %2905 = vperm.xlu1 %3637, %v3592_v47  }
 0x256   : > { %2886 = vperm.xlu0 %3638, %v3591_v53  }
 0x259   : > { %2943 = vperm.xlu1 %3637, %v3594_v22  }
 0x25a   : > { %2924 = vperm.xlu0 %3638, %v3593_v2  }
 0x25e   : > { %2962 = vperm.xlu0 %3638, %v3595_v62  }
 0x267   : > { %v1848_v52 = vpop.permute.xlu1 %1847 }
 0x268   : > { %v1854_v7 = vsel %vm265_vm0, 0.0, %v1848_v52  ;;  %v1850_v59 = vpop.permute.xlu0 %1849 }
 0x269   : > { %v1855_v26 = vmul.f32 %v1854_v7, %v3921_v63  ;;  %v1851_v10 = vsel %vm265_vm0, %v1848_v52, %v1850_v59 }
 0x26a   : > { %v1856_v8 = vmul.f32 %v1851_v10, %v3915_v61 }
 0x26b   : > { %v1867_v9 = vrot.slane %v1855_v26, %v3906_v56  ;;  %v1884_v58 = vrot.slane %v1855_v26, %v3900_v54  ;;  %v1903_v28 = vrot.slane %v1855_v26, %v3944_v16  ;;  %v1922_v19 = vrot.slane %v1855_v26, %v3947_v18 }
 0x26c   : > { %v1871_v37 = vrot.slane %v1856_v8, %v3906_v56  ;;  %v1888_v11 = vrot.slane %v1856_v8, %v3900_v54  ;;  %v1907_v31 = vrot.slane %v1856_v8, %v3944_v16  ;;  %v1926_v45 = vrot.slane %v1856_v8, %v3947_v18 }
 0x26d   : > { %v1872_v12 = vmul.f32 %v1867_v9, %v4545_v36  ;;  %v1889_v13 = vmul.f32 %v1884_v58, %v1879_v23  ;;  %v1908_v34 = vmul.f32 %v1903_v28, %v4556_v39  ;;  %v1927_v47 = vmul.f32 %v1922_v19, %v4572_v17 }
 0x26e   : > { %v1873_v51 = vmul.f32 %v1871_v37, %v4545_v36  ;;  %v1890_v20 = vmul.f32 %v1888_v11, %v1879_v23  ;;  %v1909_v41 = vmul.f32 %v1907_v31, %v4556_v39  ;;  %v1928_v26 = vmul.f32 %v1926_v45, %v4572_v17 }
 0x26f   : > { %v1891_v30 = vadd.f32 %v1889_v13, %v1872_v12 }
 0x270   : > { %v1892_v42 = vadd.f32 %v1890_v20, %v1873_v51 }
 0x271   : > { %v1910_v43 = vadd.f32 %v1908_v34, %v1891_v30 }
 0x272   : > { %v1911_v2 = vadd.f32 %v1909_v41, %v1892_v42 }
 0x273   : > { %v1929_v52 = vadd.f32 %v1927_v47, %v1910_v43 }
 0x274   : > { %v1930_v13 = vadd.f32 %v1928_v26, %v1911_v2 }
 0x278   : > { %v4648_v33 = vpop.permute.xlu1 %2229 }
 0x279   : > { %v4651_v46 = vpop.permute.xlu0 %2210 }
 0x27c   : > { %v1932_v24 = vpop.permute.xlu1 %1931 }
 0x27d   : > { %v1938_v36 = vsel %vm360_vm1, 0.0, %v1932_v24  ;;  %v1934_v23 = vpop.permute.xlu0 %1933 }
 0x27e   : > { %v1949_v53 = vrot.slane %v1938_v36, %v3906_v56  ;;  %v1968_v22 = vrot.slane %v1938_v36, %v3900_v54  ;;  %v1935_v62 = vsel %vm360_vm1, %v1932_v24, %v1934_v23  ;;  %v1987_v59 = vrot.slane %v1938_v36, %v3944_v16 }
 0x27f   : > { %v1953_v10 = vrot.slane %v1935_v62, %v3906_v56  ;;  %v1972_v8 = vrot.slane %v1935_v62, %v3900_v54  ;;  %v2006_v11 = vrot.slane %v1938_v36, %v3947_v18  ;;  %v1991_v51 = vrot.slane %v1935_v62, %v3944_v16 }
 0x280   : > { %v1954_v7 = vmul.f32 %v1949_v53, %v4567_v4  ;;  %v2016_v39 = vpop.permute.xlu1 %2015  ;;  %v1973_v37 = vmul.f32 %v1968_v22, %v4585_v29  ;;  %v1992_v17 = vmul.f32 %v1987_v59, %v4580_v21  ;;  %v2010_v23 = vrot.slane %v1935_v62, %v3947_v18 }
 0x281   : > { %v4667_v9 = vpop.permute.xlu0 %2248  ;;  %v2022_v12 = vsel %vm445_vm2, 0.0, %v2016_v39  ;;  %v1955_v28 = vmul.f32 %v1953_v10, %v4567_v4  ;;  %v1974_v19 = vmul.f32 %v1972_v8, %v4585_v29  ;;  %v2011_v43 = vmul.f32 %v2006_v11, %v4598_v3 }
 0x282   : > { %v1956_v58 = vadd.f32 %v1954_v7, %v1929_v52  ;;  %v2023_v30 = vmul.f32 %v2022_v12, %v3966_v49  ;;  %v1993_v36 = vmul.f32 %v1991_v51, %v4580_v21 }
 0x283   : > { %v1957_v34 = vadd.f32 %v1955_v28, %v1930_v13 }
 0x284   : > { %v1975_v20 = vadd.f32 %v1973_v37, %v1956_v58  ;;  %v4676_v31 = vpop.permute.xlu1 %2277  ;;  %v2035_v41 = vrot.slane %v2023_v30, %v3906_v56  ;;  %v2054_v4 = vrot.slane %v2023_v30, %v3900_v54  ;;  %v2073_v29 = vrot.slane %v2023_v30, %v3944_v16 }
 0x285   : > { %v2018_v42 = vpop.permute.xlu0 %2017  ;;  %v1976_v45 = vadd.f32 %v1974_v19, %v1957_v34  ;;  %v2092_v21 = vrot.slane %v2023_v30, %v3947_v18 }
 0x286   : > { %v1994_v24 = vadd.f32 %v1992_v17, %v1975_v20  ;;  %v2019_v47 = vsel %vm445_vm2, %v2016_v39, %v2018_v42  ;;  %v2040_v22 = vmul.f32 %v2035_v41, %v4593_v35  ;;  %v2059_v8 = vmul.f32 %v2054_v4, %v4611_v32 }
 0x287   : > { %v1995_v52 = vadd.f32 %v1993_v36, %v1976_v45  ;;  %v2024_v7 = vmul.f32 %v2019_v47, %v3975_v14  ;;  %v2012_v39 = vmul.f32 %v2010_v23, %v4598_v3  ;;  %v2078_v12 = vmul.f32 %v2073_v29, %v4606_v40 }
 0x288   : > { %v2013_v53 = vadd.f32 %v2011_v43, %v1994_v24  ;;  %v2102_v2 = vpop.permute.xlu1 %2101  ;;  %v2097_v19 = vmul.f32 %v2092_v21, %v4624_v1 }
 0x289   : > { %v2108_v59 = vsel %vm543_vm3, 0.0, %v2102_v2  ;;  %v2264_v26 = vpop.permute.xlu0 %2263  ;;  %v2039_v58 = vrot.slane %v2024_v7, %v3906_v56  ;;  %v2058_v37 = vrot.slane %v2024_v7, %v3900_v54  ;;  %v2014_v51 = vadd.f32 %v2012_v39, %v1995_v52 }
 0x28a   : > { %v2042_v10 = vadd.f32 %v2040_v22, %v2013_v53  ;;  %v2109_v62 = vmul.f32 %v2108_v59, %v3921_v63  ;;  %v2077_v17 = vrot.slane %v2024_v7, %v3944_v16  ;;  %v2096_v43 = vrot.slane %v2024_v7, %v3947_v18 }
 0x28b   : > { %v2041_v20 = vmul.f32 %v2039_v58, %v4593_v35  ;;  %v2060_v24 = vmul.f32 %v2058_v37, %v4611_v32 }
 0x28c   : > { %v2061_v11 = vadd.f32 %v2059_v8, %v2042_v10  ;;  %v2121_v13 = vrot.slane %v2109_v62, %v3906_v56  ;;  %v2266_v28 = vpop.permute.xlu1 %2265  ;;  %v2140_v3 = vrot.slane %v2109_v62, %v3900_v54  ;;  %v2159_v45 = vrot.slane %v2109_v62, %v3944_v16 }
 0x28d   : > { %v2104_v30 = vpop.permute.xlu0 %2103  ;;  %v2043_v42 = vadd.f32 %v2041_v20, %v2014_v51  ;;  %v2079_v47 = vmul.f32 %v2077_v17, %v4606_v40  ;;  %v2178_v52 = vrot.slane %v2109_v62, %v3947_v18  ;;  %v2098_v59 = vmul.f32 %v2096_v43, %v4624_v1 }
 0x28e   : > { %v2080_v34 = vadd.f32 %v2078_v12, %v2061_v11  ;;  %v2126_v4 = vmul.f32 %v2121_v13, %v4619_v0  ;;  %v2105_v35 = vsel %vm543_vm3, %v2102_v2, %v2104_v30  ;;  %v2145_v32 = vmul.f32 %v2140_v3, %v4631_v27 }
 0x28f   : > { %v2062_v23 = vadd.f32 %v2060_v24, %v2043_v42  ;;  %v2110_v53 = vmul.f32 %v2105_v35, %v3915_v61  ;;  %v2197_v8 = vrot.slane %v4464_v60, %v3994_v5  ;;  %v2164_v21 = vmul.f32 %v2159_v45, %v4629_v25 }
 0x290   : > { %v2099_v41 = vadd.f32 %v2097_v19, %v2080_v34  ;;  %v4706_v36 = vpop.permute.xlu1 %2315  ;;  %v2267_v37 = vsel %vm706_vm4, %v2264_v26, %v2266_v28  ;;  %v2183_v13 = vmul.f32 %v2178_v52, %v4635_v6  ;;  %v2216_v34 = vrot.slane %v4464_v60, %v4000_v15 }
 0x291   : > { %v4710_v22 = vpop.permute.xlu0 %2296  ;;  %v2081_v7 = vadd.f32 %v2079_v47, %v2062_v23  ;;  %v2125_v10 = vrot.slane %v2110_v53, %v3906_v56  ;;  %v2144_v2 = vrot.slane %v2110_v53, %v3900_v54  ;;  %v2163_v11 = vrot.slane %v2110_v53, %v3944_v16 }
 0x292   : > { %v2128_v29 = vadd.f32 %v2126_v4, %v2099_v41  ;;  %v2182_v17 = vrot.slane %v2110_v53, %v3947_v18  ;;  %v2202_v30 = vmul.f32 %v2197_v8, %v4633_v44  ;;  %v2201_v3 = vrot.slane %v4466_v50, %v3994_v5 }
 0x293   : > { %v2100_v58 = vadd.f32 %v2098_v59, %v2081_v7  ;;  %v2127_v62 = vmul.f32 %v2125_v10, %v4619_v0  ;;  %v2146_v20 = vmul.f32 %v2144_v2, %v4631_v27  ;;  %v2271_v0 = vmul.f32 %v2267_v37, %v3966_v49 }
 0x294   : > { %v2147_v40 = vadd.f32 %v2145_v32, %v2128_v29  ;;  %v4720_v39 = vpop.permute.xlu1 %2363  ;;  %v2165_v24 = vmul.f32 %v2163_v11, %v4629_v25  ;;  %v2235_v27 = vrot.slane %v4464_v60, %v4012_v38  ;;  %v2221_v41 = vmul.f32 %v2216_v34, %v4651_v46 }
 0x295   : > { %v4725_v1 = vpop.permute.xlu0 %2334  ;;  %v2129_v51 = vadd.f32 %v2127_v62, %v2100_v58  ;;  %v2270_v4 = vsel %vm706_vm4, %v2266_v28, 0.0  ;;  %v2220_v35 = vrot.slane %v4466_v50, %v4000_v15  ;;  %v2184_v47 = vmul.f32 %v2182_v17, %v4635_v6 }
 0x296   : > { %v2166_v12 = vadd.f32 %v2164_v21, %v2147_v40  ;;  %v2240_v53 = vmul.f32 %v2235_v27, %v4648_v33  ;;  %v2254_v25 = vrot.slane %v4464_v60, %v4017_v48  ;;  %v2283_v32 = vrot.slane %v2271_v0, %v3994_v5 }
 0x297   : > { %v2148_v42 = vadd.f32 %v2146_v20, %v2129_v51  ;;  %v2203_v7 = vmul.f32 %v2201_v3, %v4633_v44  ;;  %v2272_v28 = vmul.f32 %v2270_v4, %v3975_v14  ;;  %v2302_v40 = vrot.slane %v2271_v0, %v4000_v15 }
 0x298   : > { %v2185_v26 = vadd.f32 %v2183_v13, %v2166_v12  ;;  %v2352_v19 = vpop.permute.xlu1 %2351  ;;  %v2259_v6 = vmul.f32 %v2254_v25, %v4667_v9  ;;  %v2239_v21 = vrot.slane %v4466_v50, %v4012_v38  ;;  %v2222_v58 = vmul.f32 %v2220_v35, %v4651_v46 }
 0x299   : > { %v2350_v43 = vpop.permute.xlu0 %2349  ;;  %v2167_v23 = vadd.f32 %v2165_v24, %v2148_v42  ;;  %v2321_v44 = vrot.slane %v2271_v0, %v4012_v38  ;;  %v2288_v11 = vmul.f32 %v2283_v32, %v4676_v31  ;;  %v2258_v20 = vrot.slane %v4466_v50, %v4017_v48 }
 0x29a   : > { %v2204_v45 = vadd.f32 %v2202_v30, %v2185_v26  ;;  %v2353_v10 = vsel %vm793_vm5, %v2350_v43, %v2352_v19  ;;  %v2241_v51 = vmul.f32 %v2239_v21, %v4648_v33  ;;  %v2287_v30 = vrot.slane %v2272_v28, %v3994_v5 }
 0x29b   : > { %v2186_v59 = vadd.f32 %v2184_v47, %v2167_v23  ;;  %v2357_v12 = vmul.f32 %v2353_v10, %v3921_v63  ;;  %v2307_v26 = vmul.f32 %v2302_v40, %v4710_v22  ;;  %v2356_v3 = vsel %vm793_vm5, %v2352_v19, 0.0 }
 0x29c   : > { %v2223_v29 = vadd.f32 %v2221_v41, %v2204_v45  ;;  %v4748_v52 = vpop.permute.xlu1 %2401  ;;  %v2260_v42 = vmul.f32 %v2258_v20, %v4667_v9  ;;  %v2306_v43 = vrot.slane %v2272_v28, %v4000_v15  ;;  %v2326_v33 = vmul.f32 %v2321_v44, %v4706_v36 }
 0x29d   : > { %v4753_v2 = vpop.permute.xlu0 %2382  ;;  %v2205_v37 = vadd.f32 %v2203_v7, %v2186_v59  ;;  %v2340_v41 = vrot.slane %v2271_v0, %v4017_v48  ;;  %v2369_v4 = vrot.slane %v2357_v12, %v3994_v5  ;;  %v2325_v35 = vrot.slane %v2272_v28, %v4012_v38 }
 0x29e   : > { %v2242_v8 = vadd.f32 %v2240_v53, %v2223_v29  ;;  %v2289_v47 = vmul.f32 %v2287_v30, %v4676_v31  ;;  %v2358_v19 = vmul.f32 %v2356_v3, %v3915_v61  ;;  %v2388_v29 = vrot.slane %v2357_v12, %v4000_v15 }
 0x29f   : > { %v2224_v17 = vadd.f32 %v2222_v58, %v2205_v37  ;;  %v2345_v25 = vmul.f32 %v2340_v41, %v4725_v1  ;;  %v2308_v0 = vmul.f32 %v2306_v43, %v4710_v22  ;;  %v2407_v59 = vrot.slane %v2357_v12, %v4012_v38 }
 0x2a0   : > { %v2261_v62 = vadd.f32 %v2259_v6, %v2242_v8  ;;  %v4763_v13 = vpop.permute.xlu1 %2447  ;;  %v2374_v10 = vmul.f32 %v2369_v4, %v4720_v39  ;;  %v2327_v31 = vmul.f32 %v2325_v35, %v4706_v36  ;;  %v2344_v40 = vrot.slane %v2272_v28, %v4017_v48 }
 0x2a1   : > { %v4769_v34 = vpop.permute.xlu0 %2420  ;;  %v2243_v24 = vadd.f32 %v2241_v51, %v2224_v17  ;;  %v2373_v21 = vrot.slane %v2358_v19, %v3994_v5  ;;  %v2393_v44 = vmul.f32 %v2388_v29, %v4753_v2  ;;  %v2392_v51 = vrot.slane %v2358_v19, %v4000_v15 }
 0x2a2   : > { %v2290_v46 = vadd.f32 %v2288_v11, %v2261_v62  ;;  %v2346_v11 = vmul.f32 %v2344_v40, %v4725_v1  ;;  %v2412_v20 = vmul.f32 %v2407_v59, %v4748_v52  ;;  %v2426_v36 = vrot.slane %v2357_v12, %v4017_v48 }
 0x2a3   : > { %v2262_v23 = vadd.f32 %v2260_v42, %v2243_v24  ;;  %v2375_v3 = vmul.f32 %v2373_v21, %v4720_v39  ;;  %v2394_v41 = vmul.f32 %v2392_v51, %v4753_v2  ;;  %v2430_v12 = vrot.slane %v2358_v19, %v4017_v48 }
 0x2a4   : > { %v2309_v27 = vadd.f32 %v2307_v26, %v2290_v46  ;;  %v2436_v45 = vpop.permute.xlu1 %2435  ;;  %v2411_v26 = vrot.slane %v2358_v19, %v4012_v38  ;;  %v2431_v1 = vmul.f32 %v2426_v36, %v4769_v34 }
 0x2a5   : > { %v4781_v53 = vpop.permute.xlu0 %2466  ;;  %v2291_v32 = vadd.f32 %v2289_v47, %v2262_v23  ;;  %v2432_v59 = vmul.f32 %v2430_v12, %v4769_v34 }
 0x2a6   : > { %v2328_v9 = vadd.f32 %v2326_v33, %v2309_v27  ;;  %v2413_v39 = vmul.f32 %v2411_v26, %v4748_v52 }
 0x2a7   : > { %v2310_v8 = vadd.f32 %v2308_v0, %v2291_v32 }
 0x2a8   : > { %v2347_v7 = vadd.f32 %v2345_v25, %v2328_v9  ;;  %v4788_v6 = vpop.permute.xlu1 %2485 }
 0x2a9   : > { %v2438_v58 = vpop.permute.xlu0 %2437  ;;  %v2329_v62 = vadd.f32 %v2327_v31, %v2310_v8 }
 0x2aa   : > { %v2376_v37 = vadd.f32 %v2374_v10, %v2347_v7  ;;  %v2439_v22 = vsel %vm880_vm6, %v2436_v45, %v2438_v58  ;;  %v2442_v33 = vsel %vm880_vm6, %v2438_v58, 0.0 }
 0x2ab   : > { %v2453_v28 = vrot.slane %v2439_v22, %v3994_v5  ;;  %v2348_v46 = vadd.f32 %v2346_v11, %v2329_v62  ;;  %v2472_v42 = vrot.slane %v2439_v22, %v4000_v15  ;;  %v2491_v35 = vrot.slane %v2439_v22, %v4012_v38 }
 0x2ac   : > { %v2395_v17 = vadd.f32 %v2393_v44, %v2376_v37  ;;  %v2534_v30 = vpop.permute.xlu1 %2533  ;;  %v2457_v9 = vrot.slane %v2442_v33, %v3994_v5  ;;  %v2510_v0 = vrot.slane %v2439_v22, %v4017_v48  ;;  %v2476_v10 = vrot.slane %v2442_v33, %v4000_v15 }
 0x2ad   : > { %v2505_v24 = vpop.permute.xlu0 %2504  ;;  %v2377_v27 = vadd.f32 %v2375_v3, %v2348_v46  ;;  %v2458_v45 = vmul.f32 %v2453_v28, %v4763_v13  ;;  %v2477_v25 = vmul.f32 %v2472_v42, %v4781_v53  ;;  %v2495_v31 = vrot.slane %v2442_v33, %v4012_v38 }
 0x2ae   : > { %v2414_v43 = vadd.f32 %v2412_v20, %v2395_v17  ;;  %v2496_v40 = vmul.f32 %v2491_v35, %v4788_v6  ;;  %v2459_v58 = vmul.f32 %v2457_v9, %v4763_v13  ;;  %v2515_v11 = vmul.f32 %v2510_v0, %v2505_v24 }
 0x2af   : > { %v2396_v47 = vadd.f32 %v2394_v41, %v2377_v27  ;;  %v2478_v51 = vmul.f32 %v2476_v10, %v4781_v53  ;;  %v2514_v17 = vrot.slane %v2442_v33, %v4017_v48  ;;  %v2497_v13 = vmul.f32 %v2495_v31, %v4788_v6  ;;  %v3598_v10 = vld [vmem:[%s5165_s4 + $0x1b8] sm:$0xff]  ;;  %v3600_v31 = vld [vmem:[%s5165_s4 + $0x1c8] sm:$0xff] }
 0x2b0   : > { %v2433_v4 = vadd.f32 %v2431_v1, %v2414_v43  ;;  %v2522_v23 = vpop.permute.xlu1 %2521 }
 0x2b1   : > { %v2520_v29 = vpop.permute.xlu0 %2519  ;;  %v2526_v2 = vsel %vm965_vm7, %v2522_v23, 0.0  ;;  %v2415_v7 = vadd.f32 %v2413_v39, %v2396_v47  ;;  %v2516_v41 = vmul.f32 %v2514_v17, %v2505_v24  ;;  %v3612_v17 = vld [vmem:[%s5165_s4 + $0x228] sm:$0xff] }
 0x2b2   : > { %v2460_v32 = vadd.f32 %v2458_v45, %v2433_v4  ;;  %v2523_v19 = vsel %vm965_vm7, %v2520_v29, %v2522_v23  ;;  %v2528_v37 = vmul.f32 %v2526_v2, %v3975_v14 }
 0x2b3   : > { %v2527_v52 = vmul.f32 %v2523_v19, %v3966_v49  ;;  %v2434_v21 = vadd.f32 %v2432_v59, %v2415_v7  ;;  %v3597_v7 = vld [vmem:[%s5165_s4 + $0x1b0] sm:$0xff] }
 0x2b4   : > { %v2479_v8 = vadd.f32 %v2477_v25, %v2460_v32  ;;  %v2572_v3 = vpop.permute.xlu1 %2571  ;;  %v2543_v42 = vrot.slane %v2528_v37, %v3994_v5  ;;  %v2562_v12 = vrot.slane %v2528_v37, %v4000_v15  ;;  %v2581_v23 = vrot.slane %v2528_v37, %v4012_v38 }
 0x2b5   : > { %v2539_v44 = vrot.slane %v2527_v52, %v3994_v5  ;;  %v2553_v22 = vpop.permute.xlu0 %2552  ;;  %v2558_v34 = vrot.slane %v2527_v52, %v4000_v15  ;;  %v2461_v20 = vadd.f32 %v2459_v58, %v2434_v21  ;;  %v2577_v28 = vrot.slane %v2527_v52, %v4012_v38  ;;  %v3602_v21 = vld [vmem:[%s5165_s4 + $0x1d8] sm:$0xff]  ;;  %v3604_v58 = vld [vmem:[%s5165_s4 + $0x1e8] sm:$0xff] }
 0x2b6   : > { %v2498_v62 = vadd.f32 %v2496_v40, %v2479_v8  ;;  %v2596_v33 = vrot.slane %v2527_v52, %v4017_v48  ;;  %v2545_v39 = vmul.f32 %v2543_v42, %v2534_v30  ;;  %v2564_v5 = vmul.f32 %v2562_v12, %v2553_v22  ;;  %v3601_v52 = vld [vmem:[%s5165_s4 + $0x1d0] sm:$0xff]  ;;  %v3603_v8 = vld [vmem:[%s5165_s4 + $0x1e0] sm:$0xff] }
 0x2b7   : > { %v2544_v46 = vmul.f32 %v2539_v44, %v2534_v30  ;;  %v2480_v26 = vadd.f32 %v2478_v51, %v2461_v20  ;;  %v2563_v1 = vmul.f32 %v2558_v34, %v2553_v22  ;;  %v2582_v4 = vmul.f32 %v2577_v28, %v2572_v3  ;;  %v3605_v40 = vld [vmem:[%s5165_s4 + $0x1f0] sm:$0xff]  ;;  %v3606_v44 = vld [vmem:[%s5165_s4 + $0x1f8] sm:$0xff] }
 0x2b8   : > { %v2517_v36 = vadd.f32 %v2515_v11, %v2498_v62  ;;  %v2583_v29 = vmul.f32 %v2581_v23, %v2572_v3  ;;  %v2610_v24 = vpop.permute.xlu1 %2609  ;;  %v2600_v15 = vrot.slane %v2528_v37, %v4017_v48  ;;  %v3607_v37 = vld [vmem:[%s5165_s4 + $0x200] sm:$0xff]  ;;  %v3609_v22 = vld [vmem:[%s5165_s4 + $0x210] sm:$0xff]  ;;  %v3608_v62 = vld [vmem:[%s5165_s4 + $0x208] sm:$0xff] }
 0x2b9   : > { %v2499_v27 = vadd.f32 %v2497_v13, %v2480_v26  ;;  %v2591_v53 = vpop.permute.xlu0 %2590  ;;  %v3611_v11 = vld [vmem:[%s5165_s4 + $0x220] sm:$0xff]  ;;  %v3610_v34 = vld [vmem:[%s5165_s4 + $0x218] sm:$0xff]  ;;  %v3613_v51 = vld [vmem:[%s5165_s4 + $0x230] sm:$0xff] }
 0x2ba   : > { %v2546_v43 = vadd.f32 %v2544_v46, %v2517_v36  ;;  %v2601_v47 = vmul.f32 %v2596_v33, %v2591_v53  ;;  %v2602_v19 = vmul.f32 %v2600_v15, %v2591_v53  ;;  %v3615_v36 = vld [vmem:[%s5166_s5 + $0x8] sm:$0xff]  ;;  %v3614_v46 = vld [vmem:[%s5165_s4 + $0x238] sm:$0xff] }
 0x2bb   : > { %v2518_v35 = vadd.f32 %v2516_v41, %v2499_v27 }
 0x2bc   : > { %v2565_v45 = vadd.f32 %v2563_v1, %v2546_v43  ;;  %v2650_v26 = vpop.permute.xlu1 %2649 }
 0x2bd   : > { %v2547_v9 = vadd.f32 %v2545_v39, %v2518_v35  ;;  %v2633_v20 = vpop.permute.xlu0 %2632 }
 0x2be   : > { %v2584_v6 = vadd.f32 %v2582_v4, %v2565_v45 }
 0x2bf   : > { %v2566_v32 = vadd.f32 %v2564_v5, %v2547_v9 }
 0x2c0   : > { %v2603_v25 = vadd.f32 %v2601_v47, %v2584_v6  ;;  %v2688_v3 = vpop.permute.xlu1 %2687 }
 0x2c1   : > { %v2585_v2 = vadd.f32 %v2583_v29, %v2566_v32  ;;  %v2669_v28 = vpop.permute.xlu0 %2668 }
 0x2c2   : > { %v2612_v0 = vadd.f32 %v2610_v24, %v2603_v25 }
 0x2c3   : > { %v2604_v30 = vadd.f32 %v2602_v19, %v2585_v2 }
 0x2c4   : > { %v4841_v38 = vadd.f32 %v2612_v0, %v4074_v55  ;;  %v3596_v55 = vld [vmem:[%s5165_s4 + $0x1a8] sm:$0xff]  ;;  %v2734_v43 = vpop.permute.xlu1 %2733 }
 0x2c5   : > { %v2613_v48 = vadd.f32 %v2610_v24, %v2604_v30  ;;  %v2715_v13 = vpop.permute.xlu0 %2714 }
 0x2c6   : > { %2618 = vrot.lane.b32.xlu0 %v4841_v38, %s3666_s9  ;;  %3403 = vst [vmem:[%s4838_s12] sm:$0xf] %v4841_v38 }
 0x2c7   : > { %v4851_v59 = vadd.f32 %v2613_v48, %v4077_v57  ;;  %v3599_v57 = vld [vmem:[%s5165_s4 + $0x1c0] sm:$0xff] }
 0x2c8   : > { %v4946_v27 = vpop.permute.xlu1 %2771 }
 0x2c9   : > { %2620 = vrot.lane.b32.xlu1 %v4851_v59, %s3666_s9  ;;  %3404 = vst [vmem:[%s4838_s12 + $0x8] sm:$0xf] %v4851_v59  ;;  %v4942_v42 = vpop.permute.xlu0 %2752 }
 0x2ca   : > { %3000 = vperm.xlu0 %3638, %v3597_v7  }
 0x2cc   : > { %v4950_v12 = vpop.permute.xlu1 %2819 }
 0x2cd   : > { %2981 = vperm.xlu1 %3637, %v3596_v55   ;;  %v4944_v1 = vpop.permute.xlu0 %2800 }
 0x2ce   : > { %2702 = vrot.lane.b32.xlu0 %v4841_v38, %s3667_s10 }
 0x2d0   : > { %v4954_v4 = vpop.permute.xlu1 %2857 }
 0x2d1   : > { %2704 = vrot.lane.b32.xlu1 %v4851_v59, %s3667_s10  ;;  %v4948_v41 = vpop.permute.xlu0 %2838 }
 0x2d2   : > { %2788 = vrot.lane.b32.xlu0 %v4851_v59, %s3668_s19 }
 0x2d4   : > { %v4958_v33 = vpop.permute.xlu1 %2905 }
 0x2d5   : > { %3019 = vperm.xlu1 %3637, %v3598_v10   ;;  %v4952_v53 = vpop.permute.xlu0 %2886 }
 0x2d6   : > { %3048 = vperm.xlu0 %3638, %v3599_v57  }
 0x2d8   : > { %v4962_v39 = vpop.permute.xlu1 %2943 }
 0x2d9   : > { %2786 = vrot.lane.b32.xlu1 %v4841_v38, %s3668_s19  ;;  %v4956_v45 = vpop.permute.xlu0 %2924 }
 0x2da   : > { %2874 = vrot.lane.b32.xlu0 %v4851_v59, %s3669_s8 }
 0x2dd   : > { %3067 = vperm.xlu1 %3637, %v3600_v31   ;;  %v4960_v35 = vpop.permute.xlu0 %2962 }
 0x2de   : > { %3086 = vperm.xlu0 %3638, %v3601_v52  }
 0x2e1   : > { %2872 = vrot.lane.b32.xlu1 %v4841_v38, %s3669_s8 }
 0x2e2   : > { %3134 = vperm.xlu0 %3638, %v3603_v8  }
 0x2e5   : > { %3105 = vperm.xlu1 %3637, %v3602_v21  }
 0x2e6   : > { %3172 = vperm.xlu0 %3638, %v3605_v40  }
 0x2e9   : > { %3153 = vperm.xlu1 %3637, %v3604_v58  }
 0x2ea   : > { %3036 = vrot.lane.b32.xlu0 %v4851_v59, %s3670_s11 }
 0x2ed   : > { %3191 = vperm.xlu1 %3637, %v3606_v44  }
 0x2ee   : > { %3218 = vperm.xlu0 %3638, %v3607_v37  }
 0x2f1   : > { %3034 = vrot.lane.b32.xlu1 %v4841_v38, %s3670_s11 }
 0x2f2   : > { %3122 = vrot.lane.b32.xlu0 %v4851_v59, %s3671_s23 }
 0x2f5   : > { %3237 = vperm.xlu1 %3637, %v3608_v62  }
 0x2f6   : > { %3256 = vperm.xlu0 %3638, %v3609_v22  }
 0x2f9   : > { %3120 = vrot.lane.b32.xlu1 %v4841_v38, %s3671_s23 }
 0x2fa   : > { %3304 = vperm.xlu0 %3638, %v3611_v11  }
 0x2fd   : > { %3275 = vperm.xlu1 %3637, %v3610_v34  }
 0x2fe   : > { %3206 = vrot.lane.b32.xlu0 %v4841_v38, %s3672_s14 }
 0x301   : > { %3208 = vrot.lane.b32.xlu1 %v4851_v59, %s3672_s14 }
 0x302   : > { %3292 = vrot.lane.b32.xlu0 %v4851_v59, %s3673_s28 }
 0x305   : > { %3323 = vperm.xlu1 %3637, %v3612_v17  }
 0x306   : > { %3342 = vperm.xlu0 %3638, %v3613_v51  }
 0x309   : > { %3290 = vrot.lane.b32.xlu1 %v4841_v38, %s3673_s28 }
 0x30a   : > { %3380 = vperm.xlu0 %3638, %v3615_v36  }
 0x30d   : > { %3361 = vperm.xlu1 %3637, %v3614_v46  }
 0x338   : > { %v2619_v23 = vpop.permute.xlu0 %2618 }
 0x339   : > { %v2625_v6 = vsel %vm265_vm0, 0.0, %v2619_v23 }
 0x33a   : > { %v2626_v9 = vmul.f32 %v2625_v6, %v3921_v63 }
 0x33b   : > { %v2621_v47 = vpop.permute.xlu1 %2620 }
 0x33c   : > { %v2622_v5 = vsel %vm265_vm0, %v2619_v23, %v2621_v47  ;;  %v2638_v29 = vrot.slane %v2626_v9, %v3906_v56  ;;  %v2655_v32 = vrot.slane %v2626_v9, %v3900_v54  ;;  %v2674_v19 = vrot.slane %v2626_v9, %v3944_v16 }
 0x33d   : > { %v2627_v25 = vmul.f32 %v2622_v5, %v3915_v61  ;;  %v2693_v52 = vrot.slane %v2626_v9, %v3947_v18 }
 0x33e   : > { %v2643_v0 = vmul.f32 %v2638_v29, %v2633_v20  ;;  %v2660_v2 = vmul.f32 %v2655_v32, %v2650_v26  ;;  %v2679_v10 = vmul.f32 %v2674_v19, %v2669_v28 }
 0x33f   : > { %v2642_v24 = vrot.slane %v2627_v25, %v3906_v56  ;;  %v2659_v15 = vrot.slane %v2627_v25, %v3900_v54  ;;  %v2678_v57 = vrot.slane %v2627_v25, %v3944_v16  ;;  %v2697_v44 = vrot.slane %v2627_v25, %v3947_v18 }
 0x340   : > { %v2662_v55 = vadd.f32 %v2660_v2, %v2643_v0  ;;  %v2698_v62 = vmul.f32 %v2693_v52, %v2688_v3 }
 0x341   : > { %v2644_v30 = vmul.f32 %v2642_v24, %v2633_v20  ;;  %v2661_v48 = vmul.f32 %v2659_v15, %v2650_v26  ;;  %v2680_v37 = vmul.f32 %v2678_v57, %v2669_v28  ;;  %v2699_v46 = vmul.f32 %v2697_v44, %v2688_v3 }
 0x342   : > { %v2681_v21 = vadd.f32 %v2679_v10, %v2662_v55 }
 0x343   : > { %v2663_v31 = vadd.f32 %v2661_v48, %v2644_v30 }
 0x344   : > { %v2700_v20 = vadd.f32 %v2698_v62, %v2681_v21 }
 0x345   : > { %v2682_v34 = vadd.f32 %v2680_v37, %v2663_v31 }
 0x347   : > { %v2701_v47 = vadd.f32 %v2699_v46, %v2682_v34 }
 0x349   : > { %v4973_v7 = vpop.permute.xlu0 %3000 }
 0x34c   : > { %v4977_v40 = vpop.permute.xlu1 %2981 }
 0x34d   : > { %v2703_v8 = vpop.permute.xlu0 %2702 }
 0x34e   : > { %v2709_v58 = vsel %vm360_vm1, 0.0, %v2703_v8 }
 0x34f   : > { %v2720_v22 = vrot.slane %v2709_v58, %v3906_v56  ;;  %v2739_v17 = vrot.slane %v2709_v58, %v3900_v54  ;;  %v2758_v25 = vrot.slane %v2709_v58, %v3944_v16  ;;  %v2777_v2 = vrot.slane %v2709_v58, %v3947_v18 }
 0x350   : > { %v2705_v36 = vpop.permute.xlu1 %2704 }
 0x351   : > { %v2725_v11 = vmul.f32 %v2720_v22, %v2715_v13  ;;  %v2789_v51 = vpop.permute.xlu0 %2788  ;;  %v2706_v26 = vsel %vm360_vm1, %v2703_v8, %v2705_v36  ;;  %v2744_v5 = vmul.f32 %v2739_v17, %v2734_v43  ;;  %v2763_v30 = vmul.f32 %v2758_v25, %v4942_v42 }
 0x352   : > { %v2724_v6 = vrot.slane %v2706_v26, %v3906_v56  ;;  %v2743_v28 = vrot.slane %v2706_v26, %v3900_v54  ;;  %v2762_v32 = vrot.slane %v2706_v26, %v3944_v16  ;;  %v2781_v57 = vrot.slane %v2706_v26, %v3947_v18 }
 0x353   : > { %v2727_v23 = vadd.f32 %v2725_v11, %v2700_v20  ;;  %v2782_v58 = vmul.f32 %v2777_v2, %v4946_v27 }
 0x354   : > { %v2726_v29 = vmul.f32 %v2724_v6, %v2715_v13  ;;  %v4990_v24 = vpop.permute.xlu1 %3019  ;;  %v2745_v0 = vmul.f32 %v2743_v28, %v2734_v43  ;;  %v2764_v55 = vmul.f32 %v2762_v32, %v4942_v42  ;;  %v2783_v44 = vmul.f32 %v2781_v57, %v4946_v27 }
 0x355   : > { %v4986_v9 = vpop.permute.xlu0 %3048  ;;  %v2746_v15 = vadd.f32 %v2744_v5, %v2727_v23 }
 0x356   : > { %v2728_v3 = vadd.f32 %v2726_v29, %v2701_v47 }
 0x357   : > { %v2765_v31 = vadd.f32 %v2763_v30, %v2746_v15 }
 0x358   : > { %v2747_v48 = vadd.f32 %v2745_v0, %v2728_v3  ;;  %v2787_v10 = vpop.permute.xlu1 %2786 }
 0x359   : > { %v2875_v19 = vpop.permute.xlu0 %2874  ;;  %v2790_v13 = vsel %vm445_vm2, %v2787_v10, %v2789_v51  ;;  %v2793_v52 = vsel %vm445_vm2, 0.0, %v2787_v10  ;;  %v2784_v17 = vadd.f32 %v2782_v58, %v2765_v31 }
 0x35a   : > { %v2766_v8 = vadd.f32 %v2764_v55, %v2747_v48  ;;  %v2794_v21 = vmul.f32 %v2793_v52, %v3966_v49  ;;  %v2795_v43 = vmul.f32 %v2790_v13, %v3975_v14 }
 0x35c   : > { %v2806_v42 = vrot.slane %v2794_v21, %v3906_v56  ;;  %v2810_v22 = vrot.slane %v2795_v43, %v3906_v56  ;;  %v2825_v62 = vrot.slane %v2794_v21, %v3900_v54  ;;  %v5007_v11 = vpop.permute.xlu1 %3067  ;;  %v2829_v34 = vrot.slane %v2795_v43, %v3900_v54 }
 0x35d   : > { %v5001_v37 = vpop.permute.xlu0 %3086  ;;  %v2844_v51 = vrot.slane %v2794_v21, %v3944_v16  ;;  %v2848_v20 = vrot.slane %v2795_v43, %v3944_v16  ;;  %v2785_v36 = vadd.f32 %v2783_v44, %v2766_v8  ;;  %v2863_v26 = vrot.slane %v2794_v21, %v3947_v18 }
 0x35e   : > { %v2811_v46 = vmul.f32 %v2806_v42, %v4944_v1  ;;  %v2812_v27 = vmul.f32 %v2810_v22, %v4944_v1  ;;  %v2867_v23 = vrot.slane %v2795_v43, %v3947_v18  ;;  %v2830_v5 = vmul.f32 %v2825_v62, %v4950_v12 }
 0x35f   : > { %v2831_v25 = vmul.f32 %v2829_v34, %v4950_v12  ;;  %v2849_v32 = vmul.f32 %v2844_v51, %v4948_v41  ;;  %v2850_v15 = vmul.f32 %v2848_v20, %v4948_v41  ;;  %v2868_v55 = vmul.f32 %v2863_v26, %v4954_v4 }
 0x360   : > { %v2813_v28 = vadd.f32 %v2811_v46, %v2784_v17  ;;  %v2814_v47 = vadd.f32 %v2812_v27, %v2785_v36  ;;  %v2873_v29 = vpop.permute.xlu1 %2872  ;;  %v2869_v57 = vmul.f32 %v2867_v23, %v4954_v4 }
 0x361   : > { %v5016_v6 = vpop.permute.xlu0 %3134  ;;  %v2876_v3 = vsel %vm543_vm3, %v2873_v29, %v2875_v19  ;;  %v2879_v1 = vsel %vm543_vm3, 0.0, %v2873_v29 }
 0x362   : > { %v2832_v0 = vadd.f32 %v2830_v5, %v2813_v28  ;;  %v2833_v2 = vadd.f32 %v2831_v25, %v2814_v47  ;;  %v2880_v30 = vmul.f32 %v2879_v1, %v3921_v63  ;;  %v2881_v48 = vmul.f32 %v2876_v3, %v3915_v61 }
 0x363   : > { %v2972_v47 = vrot.slane %v4851_v59, %v3906_v56  ;;  %v2991_v1 = vrot.slane %v4851_v59, %v3900_v54 }
 0x364   : > { %v2851_v10 = vadd.f32 %v2849_v32, %v2832_v0  ;;  %v2852_v13 = vadd.f32 %v2850_v15, %v2833_v2  ;;  %v2892_v41 = vrot.slane %v2880_v30, %v3906_v56  ;;  %v2896_v19 = vrot.slane %v2881_v48, %v3906_v56  ;;  %v5032_v52 = vpop.permute.xlu1 %3105 }
 0x365   : > { %v5028_v12 = vpop.permute.xlu0 %3172  ;;  %v2911_v31 = vrot.slane %v2880_v30, %v3900_v54  ;;  %v2915_v8 = vrot.slane %v2881_v48, %v3900_v54  ;;  %v2930_v21 = vrot.slane %v2880_v30, %v3944_v16  ;;  %v2934_v43 = vrot.slane %v2881_v48, %v3944_v16 }
 0x366   : > { %v2870_v58 = vadd.f32 %v2868_v55, %v2851_v10  ;;  %v2871_v4 = vadd.f32 %v2869_v57, %v2852_v13  ;;  %v2897_v44 = vmul.f32 %v2892_v41, %v4952_v53  ;;  %v2898_v42 = vmul.f32 %v2896_v19, %v4952_v53 }
 0x367   : > { %v2916_v22 = vmul.f32 %v2911_v31, %v4958_v33  ;;  %v2917_v62 = vmul.f32 %v2915_v8, %v4958_v33  ;;  %v2949_v17 = vrot.slane %v2880_v30, %v3947_v18  ;;  %v2953_v36 = vrot.slane %v2881_v48, %v3947_v18 }
 0x368   : > { %v2899_v51 = vadd.f32 %v2897_v44, %v2870_v58  ;;  %v2900_v20 = vadd.f32 %v2898_v42, %v2871_v4  ;;  %v5044_v46 = vpop.permute.xlu1 %3153  ;;  %v2935_v27 = vmul.f32 %v2930_v21, %v4956_v45  ;;  %v2936_v28 = vmul.f32 %v2934_v43, %v4956_v45 }
 0x369   : > { %v3037_v34 = vpop.permute.xlu0 %3036  ;;  %v2968_v33 = vrot.slane %v4841_v38, %v3906_v56  ;;  %v2954_v32 = vmul.f32 %v2949_v17, %v4962_v39  ;;  %v2955_v15 = vmul.f32 %v2953_v36, %v4962_v39  ;;  %v2987_v45 = vrot.slane %v4841_v38, %v3900_v54 }
 0x36a   : > { %v2918_v26 = vadd.f32 %v2916_v22, %v2899_v51  ;;  %v2919_v23 = vadd.f32 %v2917_v62, %v2900_v20  ;;  %v3041_v53 = vsel %vm706_vm4, %v3037_v34, 0.0  ;;  %v2974_v30 = vmul.f32 %v2972_v47, %v4960_v35 }
 0x36b   : > { %v3043_v0 = vmul.f32 %v3041_v53, %v3975_v14  ;;  %v2973_v2 = vmul.f32 %v2968_v33, %v4960_v35  ;;  %v3006_v57 = vrot.slane %v4841_v38, %v3944_v16  ;;  %v3010_v39 = vrot.slane %v4851_v59, %v3944_v16 }
 0x36c   : > { %v2937_v25 = vadd.f32 %v2935_v27, %v2918_v26  ;;  %v2938_v29 = vadd.f32 %v2936_v28, %v2919_v23  ;;  %v5057_v3 = vpop.permute.xlu1 %3191  ;;  %v3025_v10 = vrot.slane %v4841_v38, %v3947_v18  ;;  %v3029_v13 = vrot.slane %v4851_v59, %v3947_v18 }
 0x36d   : > { %v5053_v5 = vpop.permute.xlu0 %3218  ;;  %v2992_v19 = vmul.f32 %v2987_v45, %v4977_v40  ;;  %v2993_v31 = vmul.f32 %v2991_v1, %v4977_v40  ;;  %v3011_v43 = vmul.f32 %v3006_v57, %v4973_v7  ;;  %v3012_v58 = vmul.f32 %v3010_v39, %v4973_v7 }
 0x36e   : > { %v2956_v48 = vadd.f32 %v2954_v32, %v2937_v25  ;;  %v2957_v55 = vadd.f32 %v2955_v15, %v2938_v29  ;;  %v3058_v4 = vrot.slane %v3043_v0, %v3906_v56  ;;  %v3030_v62 = vmul.f32 %v3025_v10, %v4990_v24 }
 0x36f   : > { %v3031_v40 = vmul.f32 %v3029_v13, %v4990_v24  ;;  %v3077_v51 = vrot.slane %v3043_v0, %v3900_v54  ;;  %v3096_v23 = vrot.slane %v3043_v0, %v3944_v16  ;;  %v3115_v25 = vrot.slane %v3043_v0, %v3947_v18 }
 0x370   : > { %v2975_v35 = vadd.f32 %v2973_v2, %v2956_v48  ;;  %v2976_v8 = vadd.f32 %v2974_v30, %v2957_v55  ;;  %v3035_v21 = vpop.permute.xlu1 %3034  ;;  %v3060_v26 = vmul.f32 %v3058_v4, %v4986_v9 }
 0x371   : > { %v3123_v41 = vpop.permute.xlu0 %3122  ;;  %v3038_v44 = vsel %vm706_vm4, %v3035_v21, %v3037_v34  ;;  %v3079_v45 = vmul.f32 %v3077_v51, %v5007_v11  ;;  %v3117_v10 = vmul.f32 %v3115_v25, %v5032_v52 }
 0x372   : > { %v2994_v38 = vadd.f32 %v2992_v19, %v2975_v35  ;;  %v2995_v42 = vadd.f32 %v2993_v31, %v2976_v8  ;;  %v3042_v59 = vmul.f32 %v3038_v44, %v3966_v49  ;;  %v3127_v22 = vsel %vm793_vm5, %v3123_v41, 0.0 }
 0x373   : > { %v3129_v28 = vmul.f32 %v3127_v22, %v3915_v61  ;;  %v3098_v61 = vmul.f32 %v3096_v23, %v5001_v37 }
 0x374   : > { %v3014_v17 = vadd.f32 %v3012_v58, %v2995_v42  ;;  %v3013_v7 = vadd.f32 %v3011_v43, %v2994_v38  ;;  %v3054_v36 = vrot.slane %v3042_v59, %v3906_v56  ;;  %v3073_v34 = vrot.slane %v3042_v59, %v3900_v54  ;;  %v5089_v27 = vpop.permute.xlu1 %3237 }
 0x375   : > { %v5085_v20 = vpop.permute.xlu0 %3256  ;;  %v3092_v47 = vrot.slane %v3042_v59, %v3944_v16  ;;  %v3111_v29 = vrot.slane %v3042_v59, %v3947_v18  ;;  %v3144_v48 = vrot.slane %v3129_v28, %v3906_v56  ;;  %v3163_v19 = vrot.slane %v3129_v28, %v3900_v54 }
 0x376   : > { %v3033_v53 = vadd.f32 %v3031_v40, %v3014_v17  ;;  %v3032_v24 = vadd.f32 %v3030_v62, %v3013_v7  ;;  %v3059_v33 = vmul.f32 %v3054_v36, %v4986_v9  ;;  %v3078_v2 = vmul.f32 %v3073_v34, %v5007_v11 }
 0x377   : > { %v3097_v0 = vmul.f32 %v3092_v47, %v5001_v37  ;;  %v3116_v13 = vmul.f32 %v3111_v29, %v5032_v52  ;;  %v3182_v11 = vrot.slane %v3129_v28, %v3944_v16  ;;  %v3146_v4 = vmul.f32 %v3144_v48, %v5016_v6 }
 0x378   : > { %v3062_v15 = vadd.f32 %v3060_v26, %v3033_v53  ;;  %v3061_v1 = vadd.f32 %v3059_v33, %v3032_v24  ;;  %v3121_v30 = vpop.permute.xlu1 %3120  ;;  %v3165_v44 = vmul.f32 %v3163_v19, %v5044_v46  ;;  %v3201_v38 = vrot.slane %v3129_v28, %v3947_v18 }
 0x379   : > { %v5098_v32 = vpop.permute.xlu0 %3304  ;;  %v3124_v9 = vsel %vm793_vm5, %v3121_v30, %v3123_v41  ;;  %v3184_v62 = vmul.f32 %v3182_v11, %v5028_v12 }
 0x37a   : > { %v3081_v55 = vadd.f32 %v3079_v45, %v3062_v15  ;;  %v3080_v57 = vadd.f32 %v3078_v2, %v3061_v1  ;;  %v3128_v39 = vmul.f32 %v3124_v9, %v3921_v63  ;;  %v3203_v24 = vmul.f32 %v3201_v38, %v5057_v3 }
 0x37c   : > { %v3100_v35 = vadd.f32 %v3098_v61, %v3081_v55  ;;  %v3099_v8 = vadd.f32 %v3097_v0, %v3080_v57  ;;  %v3140_v21 = vrot.slane %v3128_v39, %v3906_v56  ;;  %v3159_v41 = vrot.slane %v3128_v39, %v3900_v54  ;;  %v3276_v43 = vpop.permute.xlu1 %3275 }
 0x37d   : > { %v3207_v31 = vpop.permute.xlu0 %3206  ;;  %v3178_v37 = vrot.slane %v3128_v39, %v3944_v16  ;;  %v3197_v42 = vrot.slane %v3128_v39, %v3947_v18 }
 0x37e   : > { %v3119_v58 = vadd.f32 %v3117_v10, %v3100_v35  ;;  %v3118_v63 = vadd.f32 %v3116_v13, %v3099_v8  ;;  %v3145_v52 = vmul.f32 %v3140_v21, %v5016_v6  ;;  %v3164_v51 = vmul.f32 %v3159_v41, %v5044_v46 }
 0x37f   : > { %v3183_v7 = vmul.f32 %v3178_v37, %v5028_v12  ;;  %v3202_v33 = vmul.f32 %v3197_v42, %v5057_v3 }
 0x380   : > { %v3148_v22 = vadd.f32 %v3146_v4, %v3119_v58  ;;  %v3147_v40 = vadd.f32 %v3145_v52, %v3118_v63  ;;  %v3209_v17 = vpop.permute.xlu1 %3208 }
 0x381   : > { %v3293_v59 = vpop.permute.xlu0 %3292  ;;  %v3210_v36 = vsel %vm880_vm6, %v3207_v31, %v3209_v17  ;;  %v3213_v6 = vsel %vm880_vm6, %v3209_v17, 0.0 }
 0x382   : > { %v3297_v34 = vsel %vm965_vm7, %v3293_v59, 0.0  ;;  %v3167_v26 = vadd.f32 %v3165_v44, %v3148_v22  ;;  %v3166_v23 = vadd.f32 %v3164_v51, %v3147_v40  ;;  %v3224_v28 = vrot.slane %v3210_v36, %v3906_v56 }
 0x383   : > { %v3228_v53 = vrot.slane %v3213_v6, %v3906_v56  ;;  %v3243_v12 = vrot.slane %v3210_v36, %v3900_v54  ;;  %v3247_v25 = vrot.slane %v3213_v6, %v3900_v54  ;;  %v3262_v15 = vrot.slane %v3210_v36, %v3944_v16 }
 0x384   : > { %v3185_v46 = vadd.f32 %v3183_v7, %v3166_v23  ;;  %v3186_v47 = vadd.f32 %v3184_v62, %v3167_v26  ;;  %v3324_v29 = vpop.permute.xlu1 %3323  ;;  %v3266_v45 = vrot.slane %v3213_v6, %v3944_v16  ;;  %v3299_v1 = vmul.f32 %v3297_v34, %v3975_v14 }
 0x385   : > { %v3229_v61 = vmul.f32 %v3224_v28, %v5053_v5  ;;  %v3230_v48 = vmul.f32 %v3228_v53, %v5053_v5  ;;  %v3281_v3 = vrot.slane %v3210_v36, %v3947_v18  ;;  %v3285_v9 = vrot.slane %v3213_v6, %v3947_v18 }
 0x386   : > { %v3204_v2 = vadd.f32 %v3202_v33, %v3185_v46  ;;  %v3205_v30 = vadd.f32 %v3203_v24, %v3186_v47  ;;  %v3248_v0 = vmul.f32 %v3243_v12, %v5089_v27  ;;  %v3249_v39 = vmul.f32 %v3247_v25, %v5089_v27 }
 0x387   : > { %v3267_v13 = vmul.f32 %v3262_v15, %v5085_v20  ;;  %v3314_v14 = vrot.slane %v3299_v1, %v3906_v56  ;;  %v3268_v5 = vmul.f32 %v3266_v45, %v5085_v20  ;;  %v3286_v8 = vmul.f32 %v3281_v3, %v3276_v43 }
 0x388   : > { %v3231_v55 = vadd.f32 %v3229_v61, %v3204_v2  ;;  %v3232_v57 = vadd.f32 %v3230_v48, %v3205_v30  ;;  %v3291_v10 = vpop.permute.xlu1 %3290  ;;  %v3287_v21 = vmul.f32 %v3285_v9, %v3276_v43  ;;  %v3333_v41 = vrot.slane %v3299_v1, %v3900_v54  ;;  %v3343_v43 = vpop.permute.xlu0 %3342 }
 0x389   : > { %v3294_v19 = vsel %vm965_vm7, %v3291_v10, %v3293_v59  ;;  %v3316_v4 = vmul.f32 %v3314_v14, %v5098_v32  ;;  %v3352_v52 = vrot.slane %v3299_v1, %v3944_v16 }
 0x38a   : > { %v3250_v11 = vadd.f32 %v3248_v0, %v3231_v55  ;;  %v3251_v31 = vadd.f32 %v3249_v39, %v3232_v57  ;;  %v3298_v35 = vmul.f32 %v3294_v19, %v3966_v49  ;;  %v3335_v42 = vmul.f32 %v3333_v41, %v3324_v29 }
 0x38b   : > { %v3354_v17 = vmul.f32 %v3352_v52, %v3343_v43 }
 0x38c   : > { %v3269_v37 = vadd.f32 %v3267_v13, %v3250_v11  ;;  %v3270_v58 = vadd.f32 %v3268_v5, %v3251_v31  ;;  %v3310_v27 = vrot.slane %v3298_v35, %v3906_v56  ;;  %v3329_v63 = vrot.slane %v3298_v35, %v3900_v54  ;;  %v3362_v56 = vpop.permute.xlu1 %3361  ;;  %v3381_v28 = vpop.permute.xlu0 %3380 }
 0x38d   : > { %v3348_v49 = vrot.slane %v3298_v35, %v3944_v16  ;;  %v3367_v40 = vrot.slane %v3298_v35, %v3947_v18  ;;  %v3371_v54 = vrot.slane %v3299_v1, %v3947_v18 }
 0x38e   : > { %v3288_v44 = vadd.f32 %v3286_v8, %v3269_v37  ;;  %v3289_v38 = vadd.f32 %v3287_v21, %v3270_v58  ;;  %v3315_v20 = vmul.f32 %v3310_v27, %v5098_v32  ;;  %v3334_v62 = vmul.f32 %v3329_v63, %v3324_v29 }
 0x38f   : > { %v3353_v36 = vmul.f32 %v3348_v49, %v3343_v43  ;;  %v3372_v26 = vmul.f32 %v3367_v40, %v3362_v56  ;;  %v3373_v32 = vmul.f32 %v3371_v54, %v3362_v56 }
 0x390   : > { %v3318_v59 = vadd.f32 %v3316_v4, %v3289_v38  ;;  %v3317_v22 = vadd.f32 %v3315_v20, %v3288_v44 }
 0x392   : > { %v3337_v51 = vadd.f32 %v3335_v42, %v3318_v59  ;;  %v3336_v7 = vadd.f32 %v3334_v62, %v3317_v22 }
 0x394   : > { %v3356_v6 = vadd.f32 %v3354_v17, %v3337_v51  ;;  %v3355_v34 = vadd.f32 %v3353_v36, %v3336_v7 }
 0x396   : > { %v3374_v23 = vadd.f32 %v3372_v26, %v3355_v34  ;;  %v3375_v16 = vadd.f32 %v3373_v32, %v3356_v6 }
 0x398   : > { %v3383_v53 = vadd.f32 %v3381_v28, %v3374_v23  ;;  %v3384_v24 = vadd.f32 %v3381_v28, %v3375_v16 }
 0x39a   : > { %v3385_v33 = vmul.f32 0.5, %v3383_v53  ;;  %v3386_v46 = vmul.f32 0.5, %v3384_v24 }
 0x39c   : > { %3647 = vtanh.f32 %v3385_v33 }
 0x39d   : > { %3649 = vtanh.f32 %v3386_v46 }
 0x3a6   : > { %v3648_v18 = vpop.eup %3647 }
 0x3a7   : > { %v3650_v47 = vpop.eup %3649  ;;  %v3389_v12 = vmul.f32 1.442695, %v3648_v18 }
 0x3a8   : > { %v3391_v25 = vmul.f32 1.442695, %v3650_v47 }
 0x3a9   : > { %3651 = vpow2.f32 %v3389_v12 }
 0x3aa   : > { %3653 = vpow2.f32 %v3391_v25 }
 0x3b3   : > { %v3652_v29 = vpop.eup %3651 }
 0x3b4   : > { %v3654_v15 = vpop.eup %3653  ;;  %v3395_v45 = vrot.slane %v3652_v29, 4 }
 0x3b5   : > { %v3396_v1 = vrot.slane %v3654_v15, 4 }
 0x3b6   : > { %v3399_v2 = vmul.f32 %v3395_v45, %v4464_v60 }
 0x3b7   : > { %v3400_v30 = vmul.f32 %v3396_v1, %v4466_v50 }
 0x3b8   : > { %v3401_v61 = vadd.f32 %v3399_v2, %v3383_v53 }
 0x3b9   : > { %v3402_v48 = vadd.f32 %v3400_v30, %v3384_v24 }
 0x3ba   : > { %3405 = vst [vmem:[%s4838_s12] sm:$0xf0] %v3401_v61 }
 0x3bb   : > { %3406 = vst [vmem:[%s4838_s12 + $0x8] sm:$0xf0] %v3402_v48 }
 0x3bc PF: > { %s16_s21 = sadd.s32 1, %s3663_s21  }
 0x3bd   : > { %p13_p4 = scmp.ge.s32.totalorder %s16_s21, 4  }
 0x3bf   :  { %15 = sbr.rel (!%p13_p4) target bundleno = 1 (0x1), region = 219 }

</bundles_post_ra>
